<compile_context>
chip_gen: v6e
topology: v6e:2x2x1
jax: 0.10.0
libtpu: 0.0.40
codegen_flags: <defaults>
</compile_context>

<pallas_src>
import numpy as np
import jax
import jax.numpy as jnp
from jax.experimental import pallas as pl
from jax.experimental.pallas import tpu as pltpu

BN_EPS = 1e-5      # nn.BatchNorm2d default
LANES = 128        # TPU lane width; channel padding target


def _round_up(x, m):
    return (x + m - 1) // m * m


# ----------------- fused 3x3 conv (+opt. input BN/ReLU) + stats -------------
def _conv_core(slab_ref, w_ref, y_ref, stats_ref, acc_ref):
    """9-tap 3x3 conv from an assembled (H+2, W+2, K_p) f32 VMEM slab.

    Each tap is one [H*W, K_p] @ [K_p, TILE_CO] bf16 MXU matmul accumulated in
    a VMEM f32 scratch.  Writes the raw conv output as bf16 plus the
    per-(batch, cout-tile) BatchNorm statistics (sum, sum of squares).
    """
    _, H, W, _ = y_ref.shape
    kp = slab_ref.shape[-1]
    tap = 0
    for dy in range(3):
        for dx in range(3):
            patch = slab_ref[dy:dy + H, dx:dx + W, :]
            patch = patch.reshape(H * W, kp).astype(jnp.bfloat16)
            contrib = jnp.dot(patch, w_ref[dy * 3 + dx],
                              preferred_element_type=jnp.float32)
            if tap == 0:
                acc_ref[...] = contrib
            else:
                acc_ref[...] += contrib
            tap += 1

    acc = acc_ref[...]
    y_ref[...] = acc.reshape(y_ref.shape).astype(y_ref.dtype)
    # Per-(n, cout-tile) statistics (summed over N in JAX afterwards): no
    # cross-grid-step accumulation, so both grid axes stay 'parallel'.
    stats_ref[0, 0:1, :] = jnp.sum(acc, axis=0, keepdims=True)
    stats_ref[0, 1:2, :] = jnp.sum(acc * acc, axis=0, keepdims=True)


def _conv1_kernel(x_ref, w_ref, y_ref, stats_ref, slab_ref, acc_ref):
    """First DoubleConv conv: assemble the zero-bordered, channel-padded slab
    from the (unpadded, concatenated) input, then 3x3 conv + stats."""
    _, H, W, cin = x_ref.shape
    slab_ref[...] = jnp.zeros_like(slab_ref)
    slab_ref[1:H + 1, 1:W + 1, 0:cin] = x_ref[0].astype(slab_ref.dtype)
    _conv_core(slab_ref, w_ref, y_ref, stats_ref, acc_ref)


def _conv2_kernel(x_ref, scale_ref, bias_ref, w_ref, y_ref, stats_ref,
                  slab_ref, acc_ref):
    """Second DoubleConv conv with the previous BatchNorm apply + ReLU + 1px
    zero pad fused into the slab assembly (no intermediate HBM passes)."""
    _, H, W, _ = x_ref.shape
    slab_ref[...] = jnp.zeros_like(slab_ref)
    h = jnp.maximum(x_ref[0].astype(jnp.float32) * scale_ref[...]
                    + bias_ref[...], 0.0)
    slab_ref[1:H + 1, 1:W + 1, :] = h
    _conv_core(slab_ref, w_ref, y_ref, stats_ref, acc_ref)


def _conv_vmem_limit(H, W, cin, kin_p, tile_co):
    """Derive vmem_limit_bytes from the per-step blocks instead of hard-coding
    32 MiB.  Capped under v7x's 64 MiB physical VMEM.
    TODO(synk): query pltpu.get_tpu_info() for per-generation caps (v5e/v6e
    could allow much larger budgets from their 128 MiB VMEM)."""
    x_blk = H * _round_up(W, 8) * _round_up(cin, LANES) * 2
    w_blk = 9 * kin_p * tile_co * 2
    y_blk = H * _round_up(W, 8) * tile_co * 2
    stats_blk = 8 * tile_co * 4
    slab = (H + 2) * _round_up(W + 2, 8) * kin_p * 4
    acc = H * W * tile_co * 4
    need = 2 * (x_blk + w_blk + y_blk + stats_blk) + slab + acc + (4 << 20)
    return int(min(max(need, 32 << 20), 48 << 20))


def conv3x3_bn_stats(x, w_taps, scale=None, bias=None):
    """Fused 3x3 conv (padding=1, no bias) + per-batch BatchNorm statistics.

    x      : [N, H, W, Cin] bf16 NHWC (channels unpadded).  If scale/bias are
             given the input is first mapped through max(x*scale + bias, 0),
             i.e. the previous layer's BatchNorm + ReLU are fused in.
    w_taps : [9, Kin_p, Cout_p] bf16 tap-major packed weights.
    Returns: y [N, H, W, Cout_p] bf16 (raw conv output) and
             stats [N, 2, Cout_p] f32 (per-batch sum / sum-of-squares).

    Grid = (N, Cout tiles); one whole image per step (read from HBM exactly
    once, halo + pad built in VMEM).
    TODO(synk): for images whose (H+2)x(W+2)xKin_p slab no longer fits VMEM,
    add an H-tile grid axis with a halo'd (pl.Element) input block.
    """
    N, H, W, cin = x.shape
    kin_p, cout_p = int(w_taps.shape[1]), int(w_taps.shape[2])
    tile_co = 256 if cout_p % 256 == 0 else LANES
    n_ct = cout_p // tile_co
    fused_bn = scale is not None

    kernel = _conv2_kernel if fused_bn else _conv1_kernel

    in_arrays = [x]
    in_specs = [pl.BlockSpec((1, H, W, cin), lambda n, ct: (n, 0, 0, 0))]
    if fused_bn:
        in_arrays += [scale.reshape(1, kin_p).astype(jnp.float32),
                      bias.reshape(1, kin_p).astype(jnp.float32)]
        in_specs += [pl.BlockSpec((1, kin_p), lambda n, ct: (0, 0)),
                     pl.BlockSpec((1, kin_p), lambda n, ct: (0, 0))]
    in_arrays.append(w_taps)
    in_specs.append(pl.BlockSpec((9, kin_p, tile_co), lambda n, ct: (0, 0, ct)))

    return pl.pallas_call(
        kernel,
        grid=(N, n_ct),
        in_specs=in_specs,
        out_specs=[
            pl.BlockSpec((1, H, W, tile_co), lambda n, ct: (n, 0, 0, ct)),
            pl.BlockSpec((1, 2, tile_co), lambda n, ct: (n, 0, ct)),
        ],
        out_shape=[
            jax.ShapeDtypeStruct((N, H, W, cout_p), jnp.bfloat16),
            jax.ShapeDtypeStruct((N, 2, cout_p), jnp.float32),
        ],
        scratch_shapes=[
            pltpu.VMEM((H + 2, W + 2, kin_p), jnp.float32),   # padded slab
            pltpu.VMEM((H * W, tile_co), jnp.float32),        # f32 accumulator
        ],
        compiler_params=pltpu.CompilerParams(
            dimension_semantics=("parallel", "parallel"),
            vmem_limit_bytes=_conv_vmem_limit(H, W, cin, kin_p, tile_co)),
    )(*in_arrays)


# -------------------- Pallas kernel: final BN apply + ReLU ------------------
def _bn_relu_kernel(y_ref, scale_ref, bias_ref, o_ref):
    y = y_ref[...].astype(jnp.float32)
    o_ref[...] = jnp.maximum(y * scale_ref[...] + bias_ref[...],
                             0.0).astype(o_ref.dtype)


def _pick_row_tile(H, W, cp, bytes_per_elem=6, target_bytes=8 << 20):
    """Largest divisor of H whose tile stays under the byte target (avoids the
    old decrement-to-1 collapse for awkward H)."""
    best = 1
    for d in range(1, H + 1):
        if H % d == 0 and d * W * cp * bytes_per_elem <= target_bytes:
            best = d
    return best


def bn_relu_apply(y, scale, bias, out_dtype):
    """Training-mode BatchNorm apply + ReLU as a tiled elementwise pass.
    y: [N, H, W, Cp] bf16."""
    N, H, W, cp = y.shape
    th = _pick_row_tile(H, W, cp)
    return pl.pallas_call(
        _bn_relu_kernel,
        grid=(N, H // th),
        in_specs=[pl.BlockSpec((1, th, W, cp), lambda n, m: (n, m, 0, 0)),
                  pl.BlockSpec((1, cp), lambda n, m: (0, 0)),
                  pl.BlockSpec((1, cp), lambda n, m: (0, 0))],
        out_specs=pl.BlockSpec((1, th, W, cp), lambda n, m: (n, m, 0, 0)),
        out_shape=jax.ShapeDtypeStruct((N, H, W, cp), out_dtype),
        compiler_params=pltpu.CompilerParams(
            dimension_semantics=("parallel", "parallel")),
    )(y, scale.reshape(1, cp).astype(jnp.float32),
      bias.reshape(1, cp).astype(jnp.float32))


# -------------------------------- JAX glue ----------------------------------
def _bn_scale_bias(stats, gamma_p, beta_p, count):
    """stats: [N, 2, Cp] per-batch (sum, sum-of-squares) -> affine BN params."""
    s = jnp.sum(stats, axis=0)
    mean = s[0] / count
    var = jnp.maximum(s[1] / count - mean * mean, 0.0)   # E[y^2] - E[y]^2
    scale = gamma_p * jax.lax.rsqrt(var + BN_EPS)
    bias = beta_p - mean * scale
    return scale, bias


def _lerp_indices(size_in):
    """Static indices/weights for 2x bilinear resize with align_corners=True."""
    size_out = 2 * size_in
    if size_in == 1:
        z = np.zeros((size_out,), np.int32)
        return z, z, np.zeros((size_out,), np.float32)
    src = np.arange(size_out, dtype=np.float64) * (size_in - 1) / (size_out - 1)
    lo = np.minimum(np.floor(src).astype(np.int32), size_in - 2)
    frac = (src - lo).astype(np.float32)
    return lo, lo + 1, frac


def upsample_bilinear_2x_nhwc(x):
    """nn.Upsample(scale_factor=2, mode='bilinear', align_corners=True), NHWC.
    Exact separable f32 lerp (static gathers + FMA on the VPU); no
    HIGHEST-precision MXU emulation (perf-review item)."""
    _, H, W, _ = x.shape
    ylo, yhi, fy = _lerp_indices(H)
    xlo, xhi, fx = _lerp_indices(W)
    fy = jnp.asarray(fy)[None, :, None, None]
    fx = jnp.asarray(fx)[None, None, :, None]
    rows = jnp.take(x, ylo, axis=1) * (1.0 - fy) + jnp.take(x, yhi, axis=1) * fy
    return (jnp.take(rows, xlo, axis=2) * (1.0 - fx)
            + jnp.take(rows, xhi, axis=2) * fx)


def _pack_weights(w_oihw, kin_p, cout_p):
    """[Cout, Cin, 3, 3] -> [9, Kin_p, Cout_p] bf16 (tap-major, zero pad)."""
    cout, cin = w_oihw.shape[:2]
    wt = jnp.transpose(w_oihw, (2, 3, 1, 0)).reshape(9, cin, cout)
    return (jnp.zeros((9, kin_p, cout_p), jnp.float32)
            .at[:, :cin, :cout].set(wt).astype(jnp.bfloat16))


def _pad_vec(v, cp):
    return jnp.zeros((cp,), jnp.float32).at[:v.shape[0]].set(v)


def up_forward(params, x1, x2):
    """Port of Up.forward (bilinear=True). x1, x2: NCHW float32."""
    # NCHW -> NHWC once at the module boundary; the Pallas path is NHWC.
    x1 = jnp.transpose(x1, (0, 2, 3, 1)).astype(jnp.float32)
    x2 = jnp.transpose(x2, (0, 2, 3, 1)).astype(jnp.float32)

    x1u = upsample_bilinear_2x_nhwc(x1)
    d_y = x2.shape[1] - x1u.shape[1]
    d_x = x2.shape[2] - x1u.shape[2]
    if d_y or d_x:
        x1u = jnp.pad(x1u, ((0, 0), (d_y // 2, d_y - d_y // 2),
                            (d_x // 2, d_x - d_x // 2), (0, 0)))

    N, H, W, c2 = x2.shape
    c1 = x1u.shape[-1]
    cin, cmid, cout = c1 + c2, params["w1"].shape[0], params["w2"].shape[0]
    cin_p, cmid_p, cout_p = (_round_up(c, LANES) for c in (cin, cmid, cout))
    count = float(N * H * W)

    # Cheap unpadded NHWC concat (true data size only); the 128-lane channel
    # pad, 1px spatial zero pad and (for conv2) the BN1 apply all happen
    # inside the conv kernels' VMEM slab assembly -- no inflated HBM buffer.
    x_cat = jnp.concatenate([x2, x1u], axis=-1).astype(jnp.bfloat16)

    # conv1 -> per-batch BN stats (BN1 apply is deferred / fused into conv2).
    y1, s1 = conv3x3_bn_stats(x_cat, _pack_weights(params["w1"], cin_p, cmid_p))
    scale1, bias1 = _bn_scale_bias(s1, _pad_vec(params["g1"], cmid_p),
                                   _pad_vec(params["b1"], cmid_p), count)

    # conv2 with fused BN1-apply + ReLU + 1px pad -> per-batch BN stats.
    y2, s2 = conv3x3_bn_stats(y1, _pack_weights(params["w2"], cmid_p, cout_p),
                              scale=scale1, bias=bias1)
    scale2, bias2 = _bn_scale_bias(s2, _pad_vec(params["g2"], cout_p),
                                   _pad_vec(params["b2"], cout_p), count)

    # Final BN2 apply + ReLU (nothing left to fuse it into).
    out = bn_relu_apply(y2, scale2, bias2, jnp.float32)

    out = out[..., :cout]                       # drop lane padding
    return jnp.transpose(out, (0, 3, 1, 2))     # back to NCHW


# --------------------------- pure-JAX reference -----------------------------
def _interp_matrix(size_in, size_out):
    if size_in == 1:
        return jnp.ones((size_out, 1), jnp.float32)
    src = jnp.arange(size_out, dtype=jnp.float32) * (size_in - 1) / (size_out - 1)
    lo = jnp.minimum(jnp.floor(src).astype(jnp.int32), size_in - 2)
    frac = src - lo.astype(jnp.float32)
    idx = jnp.arange(size_out)
    m = jnp.zeros((size_out, size_in), jnp.float32)
    m = m.at[idx, lo].add(1.0 - frac)
    m = m.at[idx, lo + 1].add(frac)
    return m


def _ref_upsample(x_nchw):
    _, _, H, W = x_nchw.shape
    my = _interp_matrix(H, 2 * H)
    mx = _interp_matrix(W, 2 * W)
    x = jnp.einsum("oh,nchw->ncow", my, x_nchw,
                   precision=jax.lax.Precision.HIGHEST)
    return jnp.einsum("pw,ncow->ncop", mx, x,
                      precision=jax.lax.Precision.HIGHEST)


def _ref_conv_bn_relu(x_nchw, w, gamma, beta):
    # conv with bf16 operands / f32 accumulation to mirror the MXU path.
    y = jax.lax.conv_general_dilated(
        x_nchw.astype(jnp.bfloat16), w.astype(jnp.bfloat16),
        window_strides=(1, 1), padding=((1, 1), (1, 1)),
        dimension_numbers=("NCHW", "OIHW", "NCHW"),
        preferred_element_type=jnp.float32)
    mean = jnp.mean(y, axis=(0, 2, 3), keepdims=True)
    var = jnp.mean((y - mean) ** 2, axis=(0, 2, 3), keepdims=True)
    # Mirror the Pallas path: activations are stored in bf16 between passes
    # while BN statistics come from the f32 accumulator.
    yq = y.astype(jnp.bfloat16).astype(jnp.float32)
    yn = (yq - mean) * jax.lax.rsqrt(var + BN_EPS)
    yn = yn * gamma[None, :, None, None] + beta[None, :, None, None]
    return jnp.maximum(yn, 0.0)


def _ref_up_forward(params, x1, x2):
    x1u = _ref_upsample(x1)
    d_y = x2.shape[2] - x1u.shape[2]
    d_x = x2.shape[3] - x1u.shape[3]
    x1u = jnp.pad(x1u, ((0, 0), (0, 0), (d_y // 2, d_y - d_y // 2),
                        (d_x // 2, d_x - d_x // 2)))
    x = jnp.concatenate([x2, x1u], axis=1)
    h = _ref_conv_bn_relu(x, params["w1"], params["g1"], params["b1"])
    return _ref_conv_bn_relu(h, params["w2"], params["g2"], params["b2"])


if __name__ == "__main__":
    key = jax.random.PRNGKey(0)
    in_channels, out_channels = 8, 4
    mid_channels = in_channels // 2            # DoubleConv mid when bilinear=True
    N, H2, W2 = 2, 16, 16                      # x2 (skip connection) spatial size
    k1, k2, k3, k4 = jax.random.split(key, 4)

    # UNet convention: x1 (coarser) and x2 (skip) each carry in_channels // 2.
    x1 = jax.random.normal(k1, (N, in_channels // 2, H2 // 2, W2 // 2), jnp.float32)
    x2 = jax.random.normal(k2, (N, in_channels // 2, H2, W2), jnp.float32)

    params = {
        "w1": 0.1 * jax.random.normal(k3, (mid_channels, in_channels, 3, 3), jnp.float32),
        "g1": jnp.ones((mid_channels,), jnp.float32),
        "b1": jnp.zeros((mid_channels,), jnp.float32),
        "w2": 0.1 * jax.random.normal(k4, (out_channels, mid_channels, 3, 3), jnp.float32),
        "g2": jnp.ones((out_channels,), jnp.float32),
        "b2": jnp.zeros((out_channels,), jnp.float32),
    }

    out = jax.block_until_ready(jax.jit(up_forward)(params, x1, x2))

    ref = _ref_up_forward(params, x1, x2)
    assert out.shape == (N, out_channels, H2, W2), out.shape
    err = float(jnp.max(jnp.abs(out - ref)))
    assert err < 2e-2, err
    print("KERNEL_OK")
</pallas_src>

<mosaic_0001>
module attributes {stable_mosaic.version = 11 : i64} {
  func.func @_conv1_kernel(%arg0: i32, %arg1: i32, %arg2: memref<1x16x16x8xbf16, #tpu.memory_space<vmem>>, %arg3: memref<9x128x128xbf16, #tpu.memory_space<vmem>>, %arg4: memref<1x16x16x128xbf16, #tpu.memory_space<vmem>>, %arg5: memref<1x2x128xf32, #tpu.memory_space<vmem>>, %arg6: memref<18x18x128xf32, #tpu.memory_space<vmem>>, %arg7: memref<256x128xf32, #tpu.memory_space<vmem>>) attributes {dimension_semantics = [#tpu.dimension_semantics<parallel>, #tpu.dimension_semantics<parallel>], iteration_bounds = array<i64: 2, 1>, scalar_prefetch = 0 : i64, scratch_operands = 2 : i64, tpu.core_type = #tpu.core_type<tc>, window_params = [{transform_indices = @transform_0, window_bounds = array<i64: 1, 16, 16, 8>}, {transform_indices = @transform_1, window_bounds = array<i64: 9, 128, 128>}, {transform_indices = @transform_2, window_bounds = array<i64: 1, 16, 16, 128>}, {transform_indices = @transform_3, window_bounds = array<i64: 1, 2, 128>}]} {
    %cst = arith.constant 0.000000e+00 : f32
    %0 = vector.broadcast %cst : f32 to vector<18x18x128xf32>
    %c0 = arith.constant 0 : index
    %c0_0 = arith.constant 0 : index
    %c0_1 = arith.constant 0 : index
    %1 = vector.load %arg6[%c0, %c0_0, %c0_1] : memref<18x18x128xf32, #tpu.memory_space<vmem>>, vector<18x18x128xf32>
    tpu.vector_store %arg6[%c0, %c0_0, %c0_1], %0 {strides = array<i32>} : memref<18x18x128xf32, #tpu.memory_space<vmem>>, vector<18x18x128xf32>,
    %c0_2 = arith.constant 0 : index
    %c0_3 = arith.constant 0 : index
    %c0_4 = arith.constant 0 : index
    %c0_5 = arith.constant 0 : index
    %2 = vector.load %arg2[%c0_2, %c0_3, %c0_4, %c0_5] : memref<1x16x16x8xbf16, #tpu.memory_space<vmem>>, vector<1x16x16x8xbf16>
    %3 = vector.shape_cast %2 : vector<1x16x16x8xbf16> to vector<16x16x8xbf16>
    %4 = arith.extf %3 : vector<16x16x8xbf16> to vector<16x16x8xf32>
    %c1 = arith.constant 1 : index
    %c1_6 = arith.constant 1 : index
    %c0_7 = arith.constant 0 : index
    %5 = vector.load %arg6[%c1, %c1_6, %c0_7] : memref<18x18x128xf32, #tpu.memory_space<vmem>>, vector<16x16x8xf32>
    tpu.vector_store %arg6[%c1, %c1_6, %c0_7], %4 {strides = array<i32>} : memref<18x18x128xf32, #tpu.memory_space<vmem>>, vector<16x16x8xf32>,
    %c0_8 = arith.constant 0 : index
    %c0_9 = arith.constant 0 : index
    %c0_10 = arith.constant 0 : index
    %6 = vector.load %arg6[%c0_8, %c0_9, %c0_10] : memref<18x18x128xf32, #tpu.memory_space<vmem>>, vector<16x16x128xf32>
    %7 = vector.shape_cast %6 : vector<16x16x128xf32> to vector<256x128xf32>
    %8 = arith.truncf %7 : vector<256x128xf32> to vector<256x128xbf16>
    %c0_11 = arith.constant 0 : index
    %c0_12 = arith.constant 0 : index
    %c0_13 = arith.constant 0 : index
    %9 = vector.load %arg3[%c0_11, %c0_12, %c0_13] : memref<9x128x128xbf16, #tpu.memory_space<vmem>>, vector<1x128x128xbf16>
    %10 = vector.shape_cast %9 : vector<1x128x128xbf16> to vector<128x128xbf16>
    %cst_14 = arith.constant dense<0.000000e+00> : vector<256x128xf32>
    %11 = tpu.matmul %8, %10, %cst_14 {dimension_numbers = #tpu.dot_dimension_numbers<[1], [0], [0], [1], [0, 0, 1, 1], [], []>} : vector<256x128xbf16>, vector<128x128xbf16>, vector<256x128xf32> -> vector<256x128xf32>
    %c0_15 = arith.constant 0 : index
    %c0_16 = arith.constant 0 : index
    %12 = vector.load %arg7[%c0_15, %c0_16] : memref<256x128xf32, #tpu.memory_space<vmem>>, vector<256x128xf32>
    tpu.vector_store %arg7[%c0_15, %c0_16], %11 {strides = array<i32>} : memref<256x128xf32, #tpu.memory_space<vmem>>, vector<256x128xf32>,
    %c0_17 = arith.constant 0 : index
    %c1_18 = arith.constant 1 : index
    %c0_19 = arith.constant 0 : index
    %13 = vector.load %arg6[%c0_17, %c1_18, %c0_19] : memref<18x18x128xf32, #tpu.memory_space<vmem>>, vector<16x16x128xf32>
    %14 = vector.shape_cast %13 : vector<16x16x128xf32> to vector<256x128xf32>
    %15 = arith.truncf %14 : vector<256x128xf32> to vector<256x128xbf16>
    %c1_20 = arith.constant 1 : index
    %c0_21 = arith.constant 0 : index
    %c0_22 = arith.constant 0 : index
    %16 = vector.load %arg3[%c1_20, %c0_21, %c0_22] : memref<9x128x128xbf16, #tpu.memory_space<vmem>>, vector<1x128x128xbf16>
    %17 = vector.shape_cast %16 : vector<1x128x128xbf16> to vector<128x128xbf16>
    %cst_23 = arith.constant dense<0.000000e+00> : vector<256x128xf32>
    %18 = tpu.matmul %15, %17, %cst_23 {dimension_numbers = #tpu.dot_dimension_numbers<[1], [0], [0], [1], [0, 0, 1, 1], [], []>} : vector<256x128xbf16>, vector<128x128xbf16>, vector<256x128xf32> -> vector<256x128xf32>
    %c0_24 = arith.constant 0 : index
    %c0_25 = arith.constant 0 : index
    %19 = vector.load %arg7[%c0_24, %c0_25] : memref<256x128xf32, #tpu.memory_space<vmem>>, vector<256x128xf32>
    %20 = arith.addf %19, %18 : vector<256x128xf32>
    %c0_26 = arith.constant 0 : index
    %c0_27 = arith.constant 0 : index
    %21 = vector.load %arg7[%c0_26, %c0_27] : memref<256x128xf32, #tpu.memory_space<vmem>>, vector<256x128xf32>
    tpu.vector_store %arg7[%c0_26, %c0_27], %20 {strides = array<i32>} : memref<256x128xf32, #tpu.memory_space<vmem>>, vector<256x128xf32>,
    %c0_28 = arith.constant 0 : index
    %c2 = arith.constant 2 : index
    %c0_29 = arith.constant 0 : index
    %22 = vector.load %arg6[%c0_28, %c2, %c0_29] : memref<18x18x128xf32, #tpu.memory_space<vmem>>, vector<16x16x128xf32>
    %23 = vector.shape_cast %22 : vector<16x16x128xf32> to vector<256x128xf32>
    %24 = arith.truncf %23 : vector<256x128xf32> to vector<256x128xbf16>
    %c2_30 = arith.constant 2 : index
    %c0_31 = arith.constant 0 : index
    %c0_32 = arith.constant 0 : index
    %25 = vector.load %arg3[%c2_30, %c0_31, %c0_32] : memref<9x128x128xbf16, #tpu.memory_space<vmem>>, vector<1x128x128xbf16>
    %26 = vector.shape_cast %25 : vector<1x128x128xbf16> to vector<128x128xbf16>
    %cst_33 = arith.constant dense<0.000000e+00> : vector<256x128xf32>
    %27 = tpu.matmul %24, %26, %cst_33 {dimension_numbers = #tpu.dot_dimension_numbers<[1], [0], [0], [1], [0, 0, 1, 1], [], []>} : vector<256x128xbf16>, vector<128x128xbf16>, vector<256x128xf32> -> vector<256x128xf32>
    %c0_34 = arith.constant 0 : index
    %c0_35 = arith.constant 0 : index
    %28 = vector.load %arg7[%c0_34, %c0_35] : memref<256x128xf32, #tpu.memory_space<vmem>>, vector<256x128xf32>
    %29 = arith.addf %28, %27 : vector<256x128xf32>
    %c0_36 = arith.constant 0 : index
    %c0_37 = arith.constant 0 : index
    %30 = vector.load %arg7[%c0_36, %c0_37] : memref<256x128xf32, #tpu.memory_space<vmem>>, vector<256x128xf32>
    tpu.vector_store %arg7[%c0_36, %c0_37], %29 {strides = array<i32>} : memref<256x128xf32, #tpu.memory_space<vmem>>, vector<256x128xf32>,
    %c1_38 = arith.constant 1 : index
    %c0_39 = arith.constant 0 : index
    %c0_40 = arith.constant 0 : index
    %31 = vector.load %arg6[%c1_38, %c0_39, %c0_40] : memref<18x18x128xf32, #tpu.memory_space<vmem>>, vector<16x16x128xf32>
    %32 = vector.shape_cast %31 : vector<16x16x128xf32> to vector<256x128xf32>
    %33 = arith.truncf %32 : vector<256x128xf32> to vector<256x128xbf16>
    %c3 = arith.constant 3 : index
    %c0_41 = arith.constant 0 : index
    %c0_42 = arith.constant 0 : index
    %34 = vector.load %arg3[%c3, %c0_41, %c0_42] : memref<9x128x128xbf16, #tpu.memory_space<vmem>>, vector<1x128x128xbf16>
    %35 = vector.shape_cast %34 : vector<1x128x128xbf16> to vector<128x128xbf16>
    %cst_43 = arith.constant dense<0.000000e+00> : vector<256x128xf32>
    %36 = tpu.matmul %33, %35, %cst_43 {dimension_numbers = #tpu.dot_dimension_numbers<[1], [0], [0], [1], [0, 0, 1, 1], [], []>} : vector<256x128xbf16>, vector<128x128xbf16>, vector<256x128xf32> -> vector<256x128xf32>
    %c0_44 = arith.constant 0 : index
    %c0_45 = arith.constant 0 : index
    %37 = vector.load %arg7[%c0_44, %c0_45] : memref<256x128xf32, #tpu.memory_space<vmem>>, vector<256x128xf32>
    %38 = arith.addf %37, %36 : vector<256x128xf32>
    %c0_46 = arith.constant 0 : index
    %c0_47 = arith.constant 0 : index
    %39 = vector.load %arg7[%c0_46, %c0_47] : memref<256x128xf32, #tpu.memory_space<vmem>>, vector<256x128xf32>
    tpu.vector_store %arg7[%c0_46, %c0_47], %38 {strides = array<i32>} : memref<256x128xf32, #tpu.memory_space<vmem>>, vector<256x128xf32>,
    %c1_48 = arith.constant 1 : index
    %c1_49 = arith.constant 1 : index
    %c0_50 = arith.constant 0 : index
    %40 = vector.load %arg6[%c1_48, %c1_49, %c0_50] : memref<18x18x128xf32, #tpu.memory_space<vmem>>, vector<16x16x128xf32>
    %41 = vector.shape_cast %40 : vector<16x16x128xf32> to vector<256x128xf32>
    %42 = arith.truncf %41 : vector<256x128xf32> to vector<256x128xbf16>
    %c4 = arith.constant 4 : index
    %c0_51 = arith.constant 0 : index
    %c0_52 = arith.constant 0 : index
    %43 = vector.load %arg3[%c4, %c0_51, %c0_52] : memref<9x128x128xbf16, #tpu.memory_space<vmem>>, vector<1x128x128xbf16>
    %44 = vector.shape_cast %43 : vector<1x128x128xbf16> to vector<128x128xbf16>
    %cst_53 = arith.constant dense<0.000000e+00> : vector<256x128xf32>
    %45 = tpu.matmul %42, %44, %cst_53 {dimension_numbers = #tpu.dot_dimension_numbers<[1], [0], [0], [1], [0, 0, 1, 1], [], []>} : vector<256x128xbf16>, vector<128x128xbf16>, vector<256x128xf32> -> vector<256x128xf32>
    %c0_54 = arith.constant 0 : index
    %c0_55 = arith.constant 0 : index
    %46 = vector.load %arg7[%c0_54, %c0_55] : memref<256x128xf32, #tpu.memory_space<vmem>>, vector<256x128xf32>
    %47 = arith.addf %46, %45 : vector<256x128xf32>
    %c0_56 = arith.constant 0 : index
    %c0_57 = arith.constant 0 : index
    %48 = vector.load %arg7[%c0_56, %c0_57] : memref<256x128xf32, #tpu.memory_space<vmem>>, vector<256x128xf32>
    tpu.vector_store %arg7[%c0_56, %c0_57], %47 {strides = array<i32>} : memref<256x128xf32, #tpu.memory_space<vmem>>, vector<256x128xf32>,
    %c1_58 = arith.constant 1 : index
    %c2_59 = arith.constant 2 : index
    %c0_60 = arith.constant 0 : index
    %49 = vector.load %arg6[%c1_58, %c2_59, %c0_60] : memref<18x18x128xf32, #tpu.memory_space<vmem>>, vector<16x16x128xf32>
    %50 = vector.shape_cast %49 : vector<16x16x128xf32> to vector<256x128xf32>
    %51 = arith.truncf %50 : vector<256x128xf32> to vector<256x128xbf16>
    %c5 = arith.constant 5 : index
    %c0_61 = arith.constant 0 : index
    %c0_62 = arith.constant 0 : index
    %52 = vector.load %arg3[%c5, %c0_61, %c0_62] : memref<9x128x128xbf16, #tpu.memory_space<vmem>>, vector<1x128x128xbf16>
    %53 = vector.shape_cast %52 : vector<1x128x128xbf16> to vector<128x128xbf16>
    %cst_63 = arith.constant dense<0.000000e+00> : vector<256x128xf32>
    %54 = tpu.matmul %51, %53, %cst_63 {dimension_numbers = #tpu.dot_dimension_numbers<[1], [0], [0], [1], [0, 0, 1, 1], [], []>} : vector<256x128xbf16>, vector<128x128xbf16>, vector<256x128xf32> -> vector<256x128xf32>
    %c0_64 = arith.constant 0 : index
    %c0_65 = arith.constant 0 : index
    %55 = vector.load %arg7[%c0_64, %c0_65] : memref<256x128xf32, #tpu.memory_space<vmem>>, vector<256x128xf32>
    %56 = arith.addf %55, %54 : vector<256x128xf32>
    %c0_66 = arith.constant 0 : index
    %c0_67 = arith.constant 0 : index
    %57 = vector.load %arg7[%c0_66, %c0_67] : memref<256x128xf32, #tpu.memory_space<vmem>>, vector<256x128xf32>
    tpu.vector_store %arg7[%c0_66, %c0_67], %56 {strides = array<i32>} : memref<256x128xf32, #tpu.memory_space<vmem>>, vector<256x128xf32>,
    %c2_68 = arith.constant 2 : index
    %c0_69 = arith.constant 0 : index
    %c0_70 = arith.constant 0 : index
    %58 = vector.load %arg6[%c2_68, %c0_69, %c0_70] : memref<18x18x128xf32, #tpu.memory_space<vmem>>, vector<16x16x128xf32>
    %59 = vector.shape_cast %58 : vector<16x16x128xf32> to vector<256x128xf32>
    %60 = arith.truncf %59 : vector<256x128xf32> to vector<256x128xbf16>
    %c6 = arith.constant 6 : index
    %c0_71 = arith.constant 0 : index
    %c0_72 = arith.constant 0 : index
    %61 = vector.load %arg3[%c6, %c0_71, %c0_72] : memref<9x128x128xbf16, #tpu.memory_space<vmem>>, vector<1x128x128xbf16>
    %62 = vector.shape_cast %61 : vector<1x128x128xbf16> to vector<128x128xbf16>
    %cst_73 = arith.constant dense<0.000000e+00> : vector<256x128xf32>
    %63 = tpu.matmul %60, %62, %cst_73 {dimension_numbers = #tpu.dot_dimension_numbers<[1], [0], [0], [1], [0, 0, 1, 1], [], []>} : vector<256x128xbf16>, vector<128x128xbf16>, vector<256x128xf32> -> vector<256x128xf32>
    %c0_74 = arith.constant 0 : index
    %c0_75 = arith.constant 0 : index
    %64 = vector.load %arg7[%c0_74, %c0_75] : memref<256x128xf32, #tpu.memory_space<vmem>>, vector<256x128xf32>
    %65 = arith.addf %64, %63 : vector<256x128xf32>
    %c0_76 = arith.constant 0 : index
    %c0_77 = arith.constant 0 : index
    %66 = vector.load %arg7[%c0_76, %c0_77] : memref<256x128xf32, #tpu.memory_space<vmem>>, vector<256x128xf32>
    tpu.vector_store %arg7[%c0_76, %c0_77], %65 {strides = array<i32>} : memref<256x128xf32, #tpu.memory_space<vmem>>, vector<256x128xf32>,
    %c2_78 = arith.constant 2 : index
    %c1_79 = arith.constant 1 : index
    %c0_80 = arith.constant 0 : index
    %67 = vector.load %arg6[%c2_78, %c1_79, %c0_80] : memref<18x18x128xf32, #tpu.memory_space<vmem>>, vector<16x16x128xf32>
    %68 = vector.shape_cast %67 : vector<16x16x128xf32> to vector<256x128xf32>
    %69 = arith.truncf %68 : vector<256x128xf32> to vector<256x128xbf16>
    %c7 = arith.constant 7 : index
    %c0_81 = arith.constant 0 : index
    %c0_82 = arith.constant 0 : index
    %70 = vector.load %arg3[%c7, %c0_81, %c0_82] : memref<9x128x128xbf16, #tpu.memory_space<vmem>>, vector<1x128x128xbf16>
    %71 = vector.shape_cast %70 : vector<1x128x128xbf16> to vector<128x128xbf16>
    %cst_83 = arith.constant dense<0.000000e+00> : vector<256x128xf32>
    %72 = tpu.matmul %69, %71, %cst_83 {dimension_numbers = #tpu.dot_dimension_numbers<[1], [0], [0], [1], [0, 0, 1, 1], [], []>} : vector<256x128xbf16>, vector<128x128xbf16>, vector<256x128xf32> -> vector<256x128xf32>
    %c0_84 = arith.constant 0 : index
    %c0_85 = arith.constant 0 : index
    %73 = vector.load %arg7[%c0_84, %c0_85] : memref<256x128xf32, #tpu.memory_space<vmem>>, vector<256x128xf32>
    %74 = arith.addf %73, %72 : vector<256x128xf32>
    %c0_86 = arith.constant 0 : index
    %c0_87 = arith.constant 0 : index
    %75 = vector.load %arg7[%c0_86, %c0_87] : memref<256x128xf32, #tpu.memory_space<vmem>>, vector<256x128xf32>
    tpu.vector_store %arg7[%c0_86, %c0_87], %74 {strides = array<i32>} : memref<256x128xf32, #tpu.memory_space<vmem>>, vector<256x128xf32>,
    %c2_88 = arith.constant 2 : index
    %c2_89 = arith.constant 2 : index
    %c0_90 = arith.constant 0 : index
    %76 = vector.load %arg6[%c2_88, %c2_89, %c0_90] : memref<18x18x128xf32, #tpu.memory_space<vmem>>, vector<16x16x128xf32>
    %77 = vector.shape_cast %76 : vector<16x16x128xf32> to vector<256x128xf32>
    %78 = arith.truncf %77 : vector<256x128xf32> to vector<256x128xbf16>
    %c8 = arith.constant 8 : index
    %c0_91 = arith.constant 0 : index
    %c0_92 = arith.constant 0 : index
    %79 = vector.load %arg3[%c8, %c0_91, %c0_92] : memref<9x128x128xbf16, #tpu.memory_space<vmem>>, vector<1x128x128xbf16>
    %80 = vector.shape_cast %79 : vector<1x128x128xbf16> to vector<128x128xbf16>
    %cst_93 = arith.constant dense<0.000000e+00> : vector<256x128xf32>
    %81 = tpu.matmul %78, %80, %cst_93 {dimension_numbers = #tpu.dot_dimension_numbers<[1], [0], [0], [1], [0, 0, 1, 1], [], []>} : vector<256x128xbf16>, vector<128x128xbf16>, vector<256x128xf32> -> vector<256x128xf32>
    %c0_94 = arith.constant 0 : index
    %c0_95 = arith.constant 0 : index
    %82 = vector.load %arg7[%c0_94, %c0_95] : memref<256x128xf32, #tpu.memory_space<vmem>>, vector<256x128xf32>
    %83 = arith.addf %82, %81 : vector<256x128xf32>
    %c0_96 = arith.constant 0 : index
    %c0_97 = arith.constant 0 : index
    %84 = vector.load %arg7[%c0_96, %c0_97] : memref<256x128xf32, #tpu.memory_space<vmem>>, vector<256x128xf32>
    tpu.vector_store %arg7[%c0_96, %c0_97], %83 {strides = array<i32>} : memref<256x128xf32, #tpu.memory_space<vmem>>, vector<256x128xf32>,
    %c0_98 = arith.constant 0 : index
    %c0_99 = arith.constant 0 : index
    %85 = vector.load %arg7[%c0_98, %c0_99] : memref<256x128xf32, #tpu.memory_space<vmem>>, vector<256x128xf32>
    %86 = vector.shape_cast %85 : vector<256x128xf32> to vector<1x16x16x128xf32>
    %87 = arith.truncf %86 : vector<1x16x16x128xf32> to vector<1x16x16x128xbf16>
    %c0_100 = arith.constant 0 : index
    %c0_101 = arith.constant 0 : index
    %c0_102 = arith.constant 0 : index
    %c0_103 = arith.constant 0 : index
    %88 = vector.load %arg4[%c0_100, %c0_101, %c0_102, %c0_103] : memref<1x16x16x128xbf16, #tpu.memory_space<vmem>>, vector<1x16x16x128xbf16>
    tpu.vector_store %arg4[%c0_100, %c0_101, %c0_102, %c0_103], %87 {strides = array<i32>} : memref<1x16x16x128xbf16, #tpu.memory_space<vmem>>, vector<1x16x16x128xbf16>,
    %cst_104 = arith.constant dense<0.000000e+00> : vector<128xf32>
    %89 = vector.multi_reduction <add>, %85, %cst_104 [0] : vector<256x128xf32> to vector<128xf32>
    %90 = vector.shape_cast %89 : vector<128xf32> to vector<1x128xf32>
    %c0_105 = arith.constant 0 : index
    %c0_106 = arith.constant 0 : index
    %c0_107 = arith.constant 0 : index
    %91 = vector.load %arg5[%c0_105, %c0_106, %c0_107] : memref<1x2x128xf32, #tpu.memory_space<vmem>>, vector<1x1x128xf32>
    %92 = vector.shape_cast %91 : vector<1x1x128xf32> to vector<1x128xf32>
    %93 = vector.shape_cast %90 : vector<1x128xf32> to vector<1x1x128xf32>
    tpu.vector_store %arg5[%c0_105, %c0_106, %c0_107], %93 {strides = array<i32>} : memref<1x2x128xf32, #tpu.memory_space<vmem>>, vector<1x1x128xf32>,
    %94 = arith.mulf %85, %85 : vector<256x128xf32>
    %cst_108 = arith.constant dense<0.000000e+00> : vector<128xf32>
    %95 = vector.multi_reduction <add>, %94, %cst_108 [0] : vector<256x128xf32> to vector<128xf32>
    %96 = vector.shape_cast %95 : vector<128xf32> to vector<1x128xf32>
    %c0_109 = arith.constant 0 : index
    %c1_110 = arith.constant 1 : index
    %c0_111 = arith.constant 0 : index
    %97 = vector.load %arg5[%c0_109, %c1_110, %c0_111] : memref<1x2x128xf32, #tpu.memory_space<vmem>>, vector<1x1x128xf32>
    %98 = vector.shape_cast %97 : vector<1x1x128xf32> to vector<1x128xf32>
    %99 = vector.shape_cast %96 : vector<1x128xf32> to vector<1x1x128xf32>
    tpu.vector_store %arg5[%c0_109, %c1_110, %c0_111], %99 {strides = array<i32>} : memref<1x2x128xf32, #tpu.memory_space<vmem>>, vector<1x1x128xf32>,
    return
  }
  func.func @transform_0(%arg0: i32, %arg1: i32) -> (i32, i32, i32, i32) {
    %c0_i32 = arith.constant 0 : i32
    %c0_i32_0 = arith.constant 0 : i32
    %c0_i32_1 = arith.constant 0 : i32
    %c0_i32_2 = arith.constant 0 : i32
    return %arg0, %c0_i32, %c0_i32_0, %c0_i32_1 : i32, i32, i32, i32
  }
  func.func @transform_1(%arg0: i32, %arg1: i32) -> (i32, i32, i32) {
    %c0_i32 = arith.constant 0 : i32
    %c0_i32_0 = arith.constant 0 : i32
    %c0_i32_1 = arith.constant 0 : i32
    return %c0_i32, %c0_i32_0, %arg1 : i32, i32, i32
  }
  func.func @transform_2(%arg0: i32, %arg1: i32) -> (i32, i32, i32, i32) {
    %c0_i32 = arith.constant 0 : i32
    %c0_i32_0 = arith.constant 0 : i32
    %c0_i32_1 = arith.constant 0 : i32
    return %arg0, %c0_i32, %c0_i32_0, %arg1 : i32, i32, i32, i32
  }
  func.func @transform_3(%arg0: i32, %arg1: i32) -> (i32, i32, i32) {
    %c0_i32 = arith.constant 0 : i32
    %c0_i32_0 = arith.constant 0 : i32
    return %arg0, %c0_i32, %arg1 : i32, i32, i32
  }
}

module attributes {stable_mosaic.version = 11 : i64} {
  func.func @_bn_relu_kernel(%arg0: i32, %arg1: i32, %arg2: memref<1x16x16x128xbf16, #tpu.memory_space<vmem>>, %arg3: memref<1x128xf32, #tpu.memory_space<vmem>>, %arg4: memref<1x128xf32, #tpu.memory_space<vmem>>, %arg5: memref<1x16x16x128xf32, #tpu.memory_space<vmem>>) attributes {dimension_semantics = [#tpu.dimension_semantics<parallel>, #tpu.dimension_semantics<parallel>], iteration_bounds = array<i64: 2, 1>, scalar_prefetch = 0 : i64, scratch_operands = 0 : i64, tpu.core_type = #tpu.core_type<tc>, window_params = [{transform_indices = @transform_0, window_bounds = array<i64: 1, 16, 16, 128>}, {pipeline_mode = #tpu.pipeline_mode<synchronous>, transform_indices = @transform_1, window_bounds = array<i64: 1, 128>}, {pipeline_mode = #tpu.pipeline_mode<synchronous>, transform_indices = @transform_2, window_bounds = array<i64: 1, 128>}, {transform_indices = @transform_3, window_bounds = array<i64: 1, 16, 16, 128>}]} {
    %c0 = arith.constant 0 : index
    %c0_0 = arith.constant 0 : index
    %c0_1 = arith.constant 0 : index
    %c0_2 = arith.constant 0 : index
    %0 = vector.load %arg2[%c0, %c0_0, %c0_1, %c0_2] : memref<1x16x16x128xbf16, #tpu.memory_space<vmem>>, vector<1x16x16x128xbf16>
    %1 = arith.extf %0 : vector<1x16x16x128xbf16> to vector<1x16x16x128xf32>
    %c0_3 = arith.constant 0 : index
    %c0_4 = arith.constant 0 : index
    %2 = vector.load %arg3[%c0_3, %c0_4] : memref<1x128xf32, #tpu.memory_space<vmem>>, vector<1x128xf32>
    %3 = vector.shape_cast %2 : vector<1x128xf32> to vector<1x1x1x128xf32>
    %4 = vector.broadcast %3 : vector<1x1x1x128xf32> to vector<1x16x16x128xf32>
    %5 = arith.mulf %1, %4 : vector<1x16x16x128xf32>
    %c0_5 = arith.constant 0 : index
    %c0_6 = arith.constant 0 : index
    %6 = vector.load %arg4[%c0_5, %c0_6] : memref<1x128xf32, #tpu.memory_space<vmem>>, vector<1x128xf32>
    %7 = vector.shape_cast %6 : vector<1x128xf32> to vector<1x1x1x128xf32>
    %8 = vector.broadcast %7 : vector<1x1x1x128xf32> to vector<1x16x16x128xf32>
    %9 = arith.addf %5, %8 : vector<1x16x16x128xf32>
    %cst = arith.constant 0.000000e+00 : f32
    %10 = vector.broadcast %cst : f32 to vector<1x16x16x128xf32>
    %11 = arith.maximumf %9, %10 : vector<1x16x16x128xf32>
    %c0_7 = arith.constant 0 : index
    %c0_8 = arith.constant 0 : index
    %c0_9 = arith.constant 0 : index
    %c0_10 = arith.constant 0 : index
    %12 = vector.load %arg5[%c0_7, %c0_8, %c0_9, %c0_10] : memref<1x16x16x128xf32, #tpu.memory_space<vmem>>, vector<1x16x16x128xf32>
    tpu.vector_store %arg5[%c0_7, %c0_8, %c0_9, %c0_10], %11 {strides = array<i32>} : memref<1x16x16x128xf32, #tpu.memory_space<vmem>>, vector<1x16x16x128xf32>,
    return
  }
  func.func @transform_0(%arg0: i32, %arg1: i32) -> (i32, i32, i32, i32) {
    %c0_i32 = arith.constant 0 : i32
    %c0_i32_0 = arith.constant 0 : i32
    %c0_i32_1 = arith.constant 0 : i32
    return %arg0, %arg1, %c0_i32, %c0_i32_0 : i32, i32, i32, i32
  }
  func.func @transform_1(%arg0: i32, %arg1: i32) -> (i32, i32) {
    %c0_i32 = arith.constant 0 : i32
    %c0_i32_0 = arith.constant 0 : i32
    %c0_i32_1 = arith.constant 0 : i32
    return %c0_i32, %c0_i32_0 : i32, i32
  }
  func.func @transform_2(%arg0: i32, %arg1: i32) -> (i32, i32) {
    %c0_i32 = arith.constant 0 : i32
    %c0_i32_0 = arith.constant 0 : i32
    %c0_i32_1 = arith.constant 0 : i32
    return %c0_i32, %c0_i32_0 : i32, i32
  }
  func.func @transform_3(%arg0: i32, %arg1: i32) -> (i32, i32, i32, i32) {
    %c0_i32 = arith.constant 0 : i32
    %c0_i32_0 = arith.constant 0 : i32
    %c0_i32_1 = arith.constant 0 : i32
    return %arg0, %arg1, %c0_i32, %c0_i32_0 : i32, i32, i32, i32
  }
}

module attributes {stable_mosaic.version = 11 : i64} {
  func.func @_conv2_kernel(%arg0: i32, %arg1: i32, %arg2: memref<1x16x16x128xbf16, #tpu.memory_space<vmem>>, %arg3: memref<1x128xf32, #tpu.memory_space<vmem>>, %arg4: memref<1x128xf32, #tpu.memory_space<vmem>>, %arg5: memref<9x128x128xbf16, #tpu.memory_space<vmem>>, %arg6: memref<1x16x16x128xbf16, #tpu.memory_space<vmem>>, %arg7: memref<1x2x128xf32, #tpu.memory_space<vmem>>, %arg8: memref<18x18x128xf32, #tpu.memory_space<vmem>>, %arg9: memref<256x128xf32, #tpu.memory_space<vmem>>) attributes {dimension_semantics = [#tpu.dimension_semantics<parallel>, #tpu.dimension_semantics<parallel>], iteration_bounds = array<i64: 2, 1>, scalar_prefetch = 0 : i64, scratch_operands = 2 : i64, tpu.core_type = #tpu.core_type<tc>, window_params = [{transform_indices = @transform_0, window_bounds = array<i64: 1, 16, 16, 128>}, {pipeline_mode = #tpu.pipeline_mode<synchronous>, transform_indices = @transform_1, window_bounds = array<i64: 1, 128>}, {pipeline_mode = #tpu.pipeline_mode<synchronous>, transform_indices = @transform_2, window_bounds = array<i64: 1, 128>}, {transform_indices = @transform_3, window_bounds = array<i64: 9, 128, 128>}, {transform_indices = @transform_4, window_bounds = array<i64: 1, 16, 16, 128>}, {transform_indices = @transform_5, window_bounds = array<i64: 1, 2, 128>}]} {
    %cst = arith.constant 0.000000e+00 : f32
    %0 = vector.broadcast %cst : f32 to vector<18x18x128xf32>
    %c0 = arith.constant 0 : index
    %c0_0 = arith.constant 0 : index
    %c0_1 = arith.constant 0 : index
    %1 = vector.load %arg8[%c0, %c0_0, %c0_1] : memref<18x18x128xf32, #tpu.memory_space<vmem>>, vector<18x18x128xf32>
    tpu.vector_store %arg8[%c0, %c0_0, %c0_1], %0 {strides = array<i32>} : memref<18x18x128xf32, #tpu.memory_space<vmem>>, vector<18x18x128xf32>,
    %c0_2 = arith.constant 0 : index
    %c0_3 = arith.constant 0 : index
    %c0_4 = arith.constant 0 : index
    %c0_5 = arith.constant 0 : index
    %2 = vector.load %arg2[%c0_2, %c0_3, %c0_4, %c0_5] : memref<1x16x16x128xbf16, #tpu.memory_space<vmem>>, vector<1x16x16x128xbf16>
    %3 = vector.shape_cast %2 : vector<1x16x16x128xbf16> to vector<16x16x128xbf16>
    %4 = arith.extf %3 : vector<16x16x128xbf16> to vector<16x16x128xf32>
    %c0_6 = arith.constant 0 : index
    %c0_7 = arith.constant 0 : index
    %5 = vector.load %arg3[%c0_6, %c0_7] : memref<1x128xf32, #tpu.memory_space<vmem>>, vector<1x128xf32>
    %6 = vector.shape_cast %5 : vector<1x128xf32> to vector<1x1x128xf32>
    %7 = vector.broadcast %6 : vector<1x1x128xf32> to vector<16x16x128xf32>
    %8 = arith.mulf %4, %7 : vector<16x16x128xf32>
    %c0_8 = arith.constant 0 : index
    %c0_9 = arith.constant 0 : index
    %9 = vector.load %arg4[%c0_8, %c0_9] : memref<1x128xf32, #tpu.memory_space<vmem>>, vector<1x128xf32>
    %10 = vector.shape_cast %9 : vector<1x128xf32> to vector<1x1x128xf32>
    %11 = vector.broadcast %10 : vector<1x1x128xf32> to vector<16x16x128xf32>
    %12 = arith.addf %8, %11 : vector<16x16x128xf32>
    %cst_10 = arith.constant 0.000000e+00 : f32
    %13 = vector.broadcast %cst_10 : f32 to vector<16x16x128xf32>
    %14 = arith.maximumf %12, %13 : vector<16x16x128xf32>
    %c1 = arith.constant 1 : index
    %c1_11 = arith.constant 1 : index
    %c0_12 = arith.constant 0 : index
    %15 = vector.load %arg8[%c1, %c1_11, %c0_12] : memref<18x18x128xf32, #tpu.memory_space<vmem>>, vector<16x16x128xf32>
    tpu.vector_store %arg8[%c1, %c1_11, %c0_12], %14 {strides = array<i32>} : memref<18x18x128xf32, #tpu.memory_space<vmem>>, vector<16x16x128xf32>,
    %c0_13 = arith.constant 0 : index
    %c0_14 = arith.constant 0 : index
    %c0_15 = arith.constant 0 : index
    %16 = vector.load %arg8[%c0_13, %c0_14, %c0_15] : memref<18x18x128xf32, #tpu.memory_space<vmem>>, vector<16x16x128xf32>
    %17 = vector.shape_cast %16 : vector<16x16x128xf32> to vector<256x128xf32>
    %18 = arith.truncf %17 : vector<256x128xf32> to vector<256x128xbf16>
    %c0_16 = arith.constant 0 : index
    %c0_17 = arith.constant 0 : index
    %c0_18 = arith.constant 0 : index
    %19 = vector.load %arg5[%c0_16, %c0_17, %c0_18] : memref<9x128x128xbf16, #tpu.memory_space<vmem>>, vector<1x128x128xbf16>
    %20 = vector.shape_cast %19 : vector<1x128x128xbf16> to vector<128x128xbf16>
    %cst_19 = arith.constant dense<0.000000e+00> : vector<256x128xf32>
    %21 = tpu.matmul %18, %20, %cst_19 {dimension_numbers = #tpu.dot_dimension_numbers<[1], [0], [0], [1], [0, 0, 1, 1], [], []>} : vector<256x128xbf16>, vector<128x128xbf16>, vector<256x128xf32> -> vector<256x128xf32>
    %c0_20 = arith.constant 0 : index
    %c0_21 = arith.constant 0 : index
    %22 = vector.load %arg9[%c0_20, %c0_21] : memref<256x128xf32, #tpu.memory_space<vmem>>, vector<256x128xf32>
    tpu.vector_store %arg9[%c0_20, %c0_21], %21 {strides = array<i32>} : memref<256x128xf32, #tpu.memory_space<vmem>>, vector<256x128xf32>,
    %c0_22 = arith.constant 0 : index
    %c1_23 = arith.constant 1 : index
    %c0_24 = arith.constant 0 : index
    %23 = vector.load %arg8[%c0_22, %c1_23, %c0_24] : memref<18x18x128xf32, #tpu.memory_space<vmem>>, vector<16x16x128xf32>
    %24 = vector.shape_cast %23 : vector<16x16x128xf32> to vector<256x128xf32>
    %25 = arith.truncf %24 : vector<256x128xf32> to vector<256x128xbf16>
    %c1_25 = arith.constant 1 : index
    %c0_26 = arith.constant 0 : index
    %c0_27 = arith.constant 0 : index
    %26 = vector.load %arg5[%c1_25, %c0_26, %c0_27] : memref<9x128x128xbf16, #tpu.memory_space<vmem>>, vector<1x128x128xbf16>
    %27 = vector.shape_cast %26 : vector<1x128x128xbf16> to vector<128x128xbf16>
    %cst_28 = arith.constant dense<0.000000e+00> : vector<256x128xf32>
    %28 = tpu.matmul %25, %27, %cst_28 {dimension_numbers = #tpu.dot_dimension_numbers<[1], [0], [0], [1], [0, 0, 1, 1], [], []>} : vector<256x128xbf16>, vector<128x128xbf16>, vector<256x128xf32> -> vector<256x128xf32>
    %c0_29 = arith.constant 0 : index
    %c0_30 = arith.constant 0 : index
    %29 = vector.load %arg9[%c0_29, %c0_30] : memref<256x128xf32, #tpu.memory_space<vmem>>, vector<256x128xf32>
    %30 = arith.addf %29, %28 : vector<256x128xf32>
    %c0_31 = arith.constant 0 : index
    %c0_32 = arith.constant 0 : index
    %31 = vector.load %arg9[%c0_31, %c0_32] : memref<256x128xf32, #tpu.memory_space<vmem>>, vector<256x128xf32>
    tpu.vector_store %arg9[%c0_31, %c0_32], %30 {strides = array<i32>} : memref<256x128xf32, #tpu.memory_space<vmem>>, vector<256x128xf32>,
    %c0_33 = arith.constant 0 : index
    %c2 = arith.constant 2 : index
    %c0_34 = arith.constant 0 : index
    %32 = vector.load %arg8[%c0_33, %c2, %c0_34] : memref<18x18x128xf32, #tpu.memory_space<vmem>>, vector<16x16x128xf32>
    %33 = vector.shape_cast %32 : vector<16x16x128xf32> to vector<256x128xf32>
    %34 = arith.truncf %33 : vector<256x128xf32> to vector<256x128xbf16>
    %c2_35 = arith.constant 2 : index
    %c0_36 = arith.constant 0 : index
    %c0_37 = arith.constant 0 : index
    %35 = vector.load %arg5[%c2_35, %c0_36, %c0_37] : memref<9x128x128xbf16, #tpu.memory_space<vmem>>, vector<1x128x128xbf16>
    %36 = vector.shape_cast %35 : vector<1x128x128xbf16> to vector<128x128xbf16>
    %cst_38 = arith.constant dense<0.000000e+00> : vector<256x128xf32>
    %37 = tpu.matmul %34, %36, %cst_38 {dimension_numbers = #tpu.dot_dimension_numbers<[1], [0], [0], [1], [0, 0, 1, 1], [], []>} : vector<256x128xbf16>, vector<128x128xbf16>, vector<256x128xf32> -> vector<256x128xf32>
    %c0_39 = arith.constant 0 : index
    %c0_40 = arith.constant 0 : index
    %38 = vector.load %arg9[%c0_39, %c0_40] : memref<256x128xf32, #tpu.memory_space<vmem>>, vector<256x128xf32>
    %39 = arith.addf %38, %37 : vector<256x128xf32>
    %c0_41 = arith.constant 0 : index
    %c0_42 = arith.constant 0 : index
    %40 = vector.load %arg9[%c0_41, %c0_42] : memref<256x128xf32, #tpu.memory_space<vmem>>, vector<256x128xf32>
    tpu.vector_store %arg9[%c0_41, %c0_42], %39 {strides = array<i32>} : memref<256x128xf32, #tpu.memory_space<vmem>>, vector<256x128xf32>,
    %c1_43 = arith.constant 1 : index
    %c0_44 = arith.constant 0 : index
    %c0_45 = arith.constant 0 : index
    %41 = vector.load %arg8[%c1_43, %c0_44, %c0_45] : memref<18x18x128xf32, #tpu.memory_space<vmem>>, vector<16x16x128xf32>
    %42 = vector.shape_cast %41 : vector<16x16x128xf32> to vector<256x128xf32>
    %43 = arith.truncf %42 : vector<256x128xf32> to vector<256x128xbf16>
    %c3 = arith.constant 3 : index
    %c0_46 = arith.constant 0 : index
    %c0_47 = arith.constant 0 : index
    %44 = vector.load %arg5[%c3, %c0_46, %c0_47] : memref<9x128x128xbf16, #tpu.memory_space<vmem>>, vector<1x128x128xbf16>
    %45 = vector.shape_cast %44 : vector<1x128x128xbf16> to vector<128x128xbf16>
    %cst_48 = arith.constant dense<0.000000e+00> : vector<256x128xf32>
    %46 = tpu.matmul %43, %45, %cst_48 {dimension_numbers = #tpu.dot_dimension_numbers<[1], [0], [0], [1], [0, 0, 1, 1], [], []>} : vector<256x128xbf16>, vector<128x128xbf16>, vector<256x128xf32> -> vector<256x128xf32>
    %c0_49 = arith.constant 0 : index
    %c0_50 = arith.constant 0 : index
    %47 = vector.load %arg9[%c0_49, %c0_50] : memref<256x128xf32, #tpu.memory_space<vmem>>, vector<256x128xf32>
    %48 = arith.addf %47, %46 : vector<256x128xf32>
    %c0_51 = arith.constant 0 : index
    %c0_52 = arith.constant 0 : index
    %49 = vector.load %arg9[%c0_51, %c0_52] : memref<256x128xf32, #tpu.memory_space<vmem>>, vector<256x128xf32>
    tpu.vector_store %arg9[%c0_51, %c0_52], %48 {strides = array<i32>} : memref<256x128xf32, #tpu.memory_space<vmem>>, vector<256x128xf32>,
    %c1_53 = arith.constant 1 : index
    %c1_54 = arith.constant 1 : index
    %c0_55 = arith.constant 0 : index
    %50 = vector.load %arg8[%c1_53, %c1_54, %c0_55] : memref<18x18x128xf32, #tpu.memory_space<vmem>>, vector<16x16x128xf32>
    %51 = vector.shape_cast %50 : vector<16x16x128xf32> to vector<256x128xf32>
    %52 = arith.truncf %51 : vector<256x128xf32> to vector<256x128xbf16>
    %c4 = arith.constant 4 : index
    %c0_56 = arith.constant 0 : index
    %c0_57 = arith.constant 0 : index
    %53 = vector.load %arg5[%c4, %c0_56, %c0_57] : memref<9x128x128xbf16, #tpu.memory_space<vmem>>, vector<1x128x128xbf16>
    %54 = vector.shape_cast %53 : vector<1x128x128xbf16> to vector<128x128xbf16>
    %cst_58 = arith.constant dense<0.000000e+00> : vector<256x128xf32>
    %55 = tpu.matmul %52, %54, %cst_58 {dimension_numbers = #tpu.dot_dimension_numbers<[1], [0], [0], [1], [0, 0, 1, 1], [], []>} : vector<256x128xbf16>, vector<128x128xbf16>, vector<256x128xf32> -> vector<256x128xf32>
    %c0_59 = arith.constant 0 : index
    %c0_60 = arith.constant 0 : index
    %56 = vector.load %arg9[%c0_59, %c0_60] : memref<256x128xf32, #tpu.memory_space<vmem>>, vector<256x128xf32>
    %57 = arith.addf %56, %55 : vector<256x128xf32>
    %c0_61 = arith.constant 0 : index
    %c0_62 = arith.constant 0 : index
    %58 = vector.load %arg9[%c0_61, %c0_62] : memref<256x128xf32, #tpu.memory_space<vmem>>, vector<256x128xf32>
    tpu.vector_store %arg9[%c0_61, %c0_62], %57 {strides = array<i32>} : memref<256x128xf32, #tpu.memory_space<vmem>>, vector<256x128xf32>,
    %c1_63 = arith.constant 1 : index
    %c2_64 = arith.constant 2 : index
    %c0_65 = arith.constant 0 : index
    %59 = vector.load %arg8[%c1_63, %c2_64, %c0_65] : memref<18x18x128xf32, #tpu.memory_space<vmem>>, vector<16x16x128xf32>
    %60 = vector.shape_cast %59 : vector<16x16x128xf32> to vector<256x128xf32>
    %61 = arith.truncf %60 : vector<256x128xf32> to vector<256x128xbf16>
    %c5 = arith.constant 5 : index
    %c0_66 = arith.constant 0 : index
    %c0_67 = arith.constant 0 : index
    %62 = vector.load %arg5[%c5, %c0_66, %c0_67] : memref<9x128x128xbf16, #tpu.memory_space<vmem>>, vector<1x128x128xbf16>
    %63 = vector.shape_cast %62 : vector<1x128x128xbf16> to vector<128x128xbf16>
    %cst_68 = arith.constant dense<0.000000e+00> : vector<256x128xf32>
    %64 = tpu.matmul %61, %63, %cst_68 {dimension_numbers = #tpu.dot_dimension_numbers<[1], [0], [0], [1], [0, 0, 1, 1], [], []>} : vector<256x128xbf16>, vector<128x128xbf16>, vector<256x128xf32> -> vector<256x128xf32>
    %c0_69 = arith.constant 0 : index
    %c0_70 = arith.constant 0 : index
    %65 = vector.load %arg9[%c0_69, %c0_70] : memref<256x128xf32, #tpu.memory_space<vmem>>, vector<256x128xf32>
    %66 = arith.addf %65, %64 : vector<256x128xf32>
    %c0_71 = arith.constant 0 : index
    %c0_72 = arith.constant 0 : index
    %67 = vector.load %arg9[%c0_71, %c0_72] : memref<256x128xf32, #tpu.memory_space<vmem>>, vector<256x128xf32>
    tpu.vector_store %arg9[%c0_71, %c0_72], %66 {strides = array<i32>} : memref<256x128xf32, #tpu.memory_space<vmem>>, vector<256x128xf32>,
    %c2_73 = arith.constant 2 : index
    %c0_74 = arith.constant 0 : index
    %c0_75 = arith.constant 0 : index
    %68 = vector.load %arg8[%c2_73, %c0_74, %c0_75] : memref<18x18x128xf32, #tpu.memory_space<vmem>>, vector<16x16x128xf32>
    %69 = vector.shape_cast %68 : vector<16x16x128xf32> to vector<256x128xf32>
    %70 = arith.truncf %69 : vector<256x128xf32> to vector<256x128xbf16>
    %c6 = arith.constant 6 : index
    %c0_76 = arith.constant 0 : index
    %c0_77 = arith.constant 0 : index
    %71 = vector.load %arg5[%c6, %c0_76, %c0_77] : memref<9x128x128xbf16, #tpu.memory_space<vmem>>, vector<1x128x128xbf16>
    %72 = vector.shape_cast %71 : vector<1x128x128xbf16> to vector<128x128xbf16>
    %cst_78 = arith.constant dense<0.000000e+00> : vector<256x128xf32>
    %73 = tpu.matmul %70, %72, %cst_78 {dimension_numbers = #tpu.dot_dimension_numbers<[1], [0], [0], [1], [0, 0, 1, 1], [], []>} : vector<256x128xbf16>, vector<128x128xbf16>, vector<256x128xf32> -> vector<256x128xf32>
    %c0_79 = arith.constant 0 : index
    %c0_80 = arith.constant 0 : index
    %74 = vector.load %arg9[%c0_79, %c0_80] : memref<256x128xf32, #tpu.memory_space<vmem>>, vector<256x128xf32>
    %75 = arith.addf %74, %73 : vector<256x128xf32>
    %c0_81 = arith.constant 0 : index
    %c0_82 = arith.constant 0 : index
    %76 = vector.load %arg9[%c0_81, %c0_82] : memref<256x128xf32, #tpu.memory_space<vmem>>, vector<256x128xf32>
    tpu.vector_store %arg9[%c0_81, %c0_82], %75 {strides = array<i32>} : memref<256x128xf32, #tpu.memory_space<vmem>>, vector<256x128xf32>,
    %c2_83 = arith.constant 2 : index
    %c1_84 = arith.constant 1 : index
    %c0_85 = arith.constant 0 : index
    %77 = vector.load %arg8[%c2_83, %c1_84, %c0_85] : memref<18x18x128xf32, #tpu.memory_space<vmem>>, vector<16x16x128xf32>
    %78 = vector.shape_cast %77 : vector<16x16x128xf32> to vector<256x128xf32>
    %79 = arith.truncf %78 : vector<256x128xf32> to vector<256x128xbf16>
    %c7 = arith.constant 7 : index
    %c0_86 = arith.constant 0 : index
    %c0_87 = arith.constant 0 : index
    %80 = vector.load %arg5[%c7, %c0_86, %c0_87] : memref<9x128x128xbf16, #tpu.memory_space<vmem>>, vector<1x128x128xbf16>
    %81 = vector.shape_cast %80 : vector<1x128x128xbf16> to vector<128x128xbf16>
    %cst_88 = arith.constant dense<0.000000e+00> : vector<256x128xf32>
    %82 = tpu.matmul %79, %81, %cst_88 {dimension_numbers = #tpu.dot_dimension_numbers<[1], [0], [0], [1], [0, 0, 1, 1], [], []>} : vector<256x128xbf16>, vector<128x128xbf16>, vector<256x128xf32> -> vector<256x128xf32>
    %c0_89 = arith.constant 0 : index
    %c0_90 = arith.constant 0 : index
    %83 = vector.load %arg9[%c0_89, %c0_90] : memref<256x128xf32, #tpu.memory_space<vmem>>, vector<256x128xf32>
    %84 = arith.addf %83, %82 : vector<256x128xf32>
    %c0_91 = arith.constant 0 : index
    %c0_92 = arith.constant 0 : index
    %85 = vector.load %arg9[%c0_91, %c0_92] : memref<256x128xf32, #tpu.memory_space<vmem>>, vector<256x128xf32>
    tpu.vector_store %arg9[%c0_91, %c0_92], %84 {strides = array<i32>} : memref<256x128xf32, #tpu.memory_space<vmem>>, vector<256x128xf32>,
    %c2_93 = arith.constant 2 : index
    %c2_94 = arith.constant 2 : index
    %c0_95 = arith.constant 0 : index
    %86 = vector.load %arg8[%c2_93, %c2_94, %c0_95] : memref<18x18x128xf32, #tpu.memory_space<vmem>>, vector<16x16x128xf32>
    %87 = vector.shape_cast %86 : vector<16x16x128xf32> to vector<256x128xf32>
    %88 = arith.truncf %87 : vector<256x128xf32> to vector<256x128xbf16>
    %c8 = arith.constant 8 : index
    %c0_96 = arith.constant 0 : index
    %c0_97 = arith.constant 0 : index
    %89 = vector.load %arg5[%c8, %c0_96, %c0_97] : memref<9x128x128xbf16, #tpu.memory_space<vmem>>, vector<1x128x128xbf16>
    %90 = vector.shape_cast %89 : vector<1x128x128xbf16> to vector<128x128xbf16>
    %cst_98 = arith.constant dense<0.000000e+00> : vector<256x128xf32>
    %91 = tpu.matmul %88, %90, %cst_98 {dimension_numbers = #tpu.dot_dimension_numbers<[1], [0], [0], [1], [0, 0, 1, 1], [], []>} : vector<256x128xbf16>, vector<128x128xbf16>, vector<256x128xf32> -> vector<256x128xf32>
    %c0_99 = arith.constant 0 : index
    %c0_100 = arith.constant 0 : index
    %92 = vector.load %arg9[%c0_99, %c0_100] : memref<256x128xf32, #tpu.memory_space<vmem>>, vector<256x128xf32>
    %93 = arith.addf %92, %91 : vector<256x128xf32>
    %c0_101 = arith.constant 0 : index
    %c0_102 = arith.constant 0 : index
    %94 = vector.load %arg9[%c0_101, %c0_102] : memref<256x128xf32, #tpu.memory_space<vmem>>, vector<256x128xf32>
    tpu.vector_store %arg9[%c0_101, %c0_102], %93 {strides = array<i32>} : memref<256x128xf32, #tpu.memory_space<vmem>>, vector<256x128xf32>,
    %c0_103 = arith.constant 0 : index
    %c0_104 = arith.constant 0 : index
    %95 = vector.load %arg9[%c0_103, %c0_104] : memref<256x128xf32, #tpu.memory_space<vmem>>, vector<256x128xf32>
    %96 = vector.shape_cast %95 : vector<256x128xf32> to vector<1x16x16x128xf32>
    %97 = arith.truncf %96 : vector<1x16x16x128xf32> to vector<1x16x16x128xbf16>
    %c0_105 = arith.constant 0 : index
    %c0_106 = arith.constant 0 : index
    %c0_107 = arith.constant 0 : index
    %c0_108 = arith.constant 0 : index
    %98 = vector.load %arg6[%c0_105, %c0_106, %c0_107, %c0_108] : memref<1x16x16x128xbf16, #tpu.memory_space<vmem>>, vector<1x16x16x128xbf16>
    tpu.vector_store %arg6[%c0_105, %c0_106, %c0_107, %c0_108], %97 {strides = array<i32>} : memref<1x16x16x128xbf16, #tpu.memory_space<vmem>>, vector<1x16x16x128xbf16>,
    %cst_109 = arith.constant dense<0.000000e+00> : vector<128xf32>
    %99 = vector.multi_reduction <add>, %95, %cst_109 [0] : vector<256x128xf32> to vector<128xf32>
    %100 = vector.shape_cast %99 : vector<128xf32> to vector<1x128xf32>
    %c0_110 = arith.constant 0 : index
    %c0_111 = arith.constant 0 : index
    %c0_112 = arith.constant 0 : index
    %101 = vector.load %arg7[%c0_110, %c0_111, %c0_112] : memref<1x2x128xf32, #tpu.memory_space<vmem>>, vector<1x1x128xf32>
    %102 = vector.shape_cast %101 : vector<1x1x128xf32> to vector<1x128xf32>
    %103 = vector.shape_cast %100 : vector<1x128xf32> to vector<1x1x128xf32>
    tpu.vector_store %arg7[%c0_110, %c0_111, %c0_112], %103 {strides = array<i32>} : memref<1x2x128xf32, #tpu.memory_space<vmem>>, vector<1x1x128xf32>,
    %104 = arith.mulf %95, %95 : vector<256x128xf32>
    %cst_113 = arith.constant dense<0.000000e+00> : vector<128xf32>
    %105 = vector.multi_reduction <add>, %104, %cst_113 [0] : vector<256x128xf32> to vector<128xf32>
    %106 = vector.shape_cast %105 : vector<128xf32> to vector<1x128xf32>
    %c0_114 = arith.constant 0 : index
    %c1_115 = arith.constant 1 : index
    %c0_116 = arith.constant 0 : index
    %107 = vector.load %arg7[%c0_114, %c1_115, %c0_116] : memref<1x2x128xf32, #tpu.memory_space<vmem>>, vector<1x1x128xf32>
    %108 = vector.shape_cast %107 : vector<1x1x128xf32> to vector<1x128xf32>
    %109 = vector.shape_cast %106 : vector<1x128xf32> to vector<1x1x128xf32>
    tpu.vector_store %arg7[%c0_114, %c1_115, %c0_116], %109 {strides = array<i32>} : memref<1x2x128xf32, #tpu.memory_space<vmem>>, vector<1x1x128xf32>,
    return
  }
  func.func @transform_0(%arg0: i32, %arg1: i32) -> (i32, i32, i32, i32) {
    %c0_i32 = arith.constant 0 : i32
    %c0_i32_0 = arith.constant 0 : i32
    %c0_i32_1 = arith.constant 0 : i32
    %c0_i32_2 = arith.constant 0 : i32
    return %arg0, %c0_i32, %c0_i32_0, %c0_i32_1 : i32, i32, i32, i32
  }
  func.func @transform_1(%arg0: i32, %arg1: i32) -> (i32, i32) {
    %c0_i32 = arith.constant 0 : i32
    %c0_i32_0 = arith.constant 0 : i32
    %c0_i32_1 = arith.constant 0 : i32
    return %c0_i32, %c0_i32_0 : i32, i32
  }
  func.func @transform_2(%arg0: i32, %arg1: i32) -> (i32, i32) {
    %c0_i32 = arith.constant 0 : i32
    %c0_i32_0 = arith.constant 0 : i32
    %c0_i32_1 = arith.constant 0 : i32
    return %c0_i32, %c0_i32_0 : i32, i32
  }
  func.func @transform_3(%arg0: i32, %arg1: i32) -> (i32, i32, i32) {
    %c0_i32 = arith.constant 0 : i32
    %c0_i32_0 = arith.constant 0 : i32
    %c0_i32_1 = arith.constant 0 : i32
    return %c0_i32, %c0_i32_0, %arg1 : i32, i32, i32
  }
  func.func @transform_4(%arg0: i32, %arg1: i32) -> (i32, i32, i32, i32) {
    %c0_i32 = arith.constant 0 : i32
    %c0_i32_0 = arith.constant 0 : i32
    %c0_i32_1 = arith.constant 0 : i32
    return %arg0, %c0_i32, %c0_i32_0, %arg1 : i32, i32, i32, i32
  }
  func.func @transform_5(%arg0: i32, %arg1: i32) -> (i32, i32, i32) {
    %c0_i32 = arith.constant 0 : i32
    %c0_i32_0 = arith.constant 0 : i32
    return %arg0, %c0_i32, %arg1 : i32, i32, i32
  }
}

</mosaic_0001>

<bundles_post_ra>
// kernel: up_forward.5
= control target key start
LH: loop header
LB: loop body
LE: loop exit
PB: predicated region body
PF: predicated region fallthrough
CT: control target
= control target key end

     0   :  { %s679_s12 = smov 0   ;;  %s681_s13 = smov 0   ;;  %s842_s0 = inlined_call_operand.vmem [shape: bf16[2,16,16,128], index: 0, kind: input, shape index: {}]   ;;  %s843_s1 = inlined_call_operand.vmem [shape: f32[1,128], index: 1, kind: input, shape index: {}]   ;;  %s844_s2 = inlined_call_operand.vmem [shape: f32[1,128], index: 2, kind: input, shape index: {}]   ;;  %s845_s3 = inlined_call_operand.vmem [shape: f32[2,16,16,128], index: 3, kind: output, shape index: {}]  }
   0x1   :  { %s683_s14 = smov 0  }
   0x2 LB: > { %s25_s15 = sadd.s32 1, %s653_s13  ;;  %p521_p0 = scmp.ge.s32.totalorder %s657_s14, 1  ;;  %s657_s14 = sphi %s683_s14, %s13_s14   ;;  %s653_s13 = sphi %s681_s13, %s847_s13   ;;  %s649_s12 = sphi %s679_s12, %s846_s12  }
   0x3   : > { %p27_p1 = scmp.ge.s32.totalorder %s25_s15, 2  ;;  %p159_p2 = scmp.lt.s32.totalorder %s657_s14, 3 }
   0x5   : > { %s849_s15 = smov (%p27_p1, %s25_s15), 0  ;;  %p160_p3 = pnand %p521_p0, %p159_p2 }
   0x6   : > { %p194_p4 = scmp.lt.s32.totalorder (!%p160_p3), %s649_s12, 1 }
   0x7   : > { %163 = sbr.rel (%p160_p3) target bundleno = 52 (0x34), region = 32 }
   0xc   : > { %s851_s12 = smov (!%p194_p4, %s649_s12), 1  ;;  %v708_v0 = vld [vmem:[%s843_s1] ss:$0 sm:$0xff] }
   0xd   : > { %s530_s16 = sshll.u32 %s851_s12, 7  ;;  %v717_v9 = vld [vmem:[%s844_s2] ss:$0 sm:$0xff]  ;;  %s531_s24 = sshll.u32 %s851_s12, 8 }
   0xe   : > { %s703_s19 = scalar_lea.vmem %s842_s0, %s530_s16  ;;  %s735_s27 = scalar_lea.vmem %s845_s3, %s531_s24 }
   0xf   : > { %v533_v1 = vld [vmem:[%s703_s19] sm:$0xff]   ;;  %v596_v2 = vld [vmem:[%s703_s19 + $0x8] sm:$0xff]   ;;  %v597_v3 = vld [vmem:[%s703_s19 + $0x10] sm:$0xff]  }
  0x10   : > { %v534_v4 = vunpack.c.l.bf16 %v533_v1  ;;  %v535_v5 = vunpack.c.h.bf16 %v533_v1  ;;  %v538_v6 = vunpack.c.l.bf16 %v596_v2  ;;  %v539_v7 = vunpack.c.h.bf16 %v596_v2  ;;  %v598_v8 = vld [vmem:[%s703_s19 + $0x18] sm:$0xff]   ;;  %v599_v30 = vld [vmem:[%s703_s19 + $0x20] sm:$0xff]   ;;  %v600_v31 = vld [vmem:[%s703_s19 + $0x28] sm:$0xff]  }
  0x11   : > { %v542_v10 = vunpack.c.l.bf16 %v597_v3  ;;  %v543_v11 = vunpack.c.h.bf16 %v597_v3  ;;  %v546_v12 = vunpack.c.l.bf16 %v598_v8  ;;  %v547_v13 = vunpack.c.h.bf16 %v598_v8  ;;  %v601_v36 = vld [vmem:[%s703_s19 + $0x30] sm:$0xff]   ;;  %v602_v37 = vld [vmem:[%s703_s19 + $0x38] sm:$0xff]   ;;  %v603_v3 = vld [vmem:[%s703_s19 + $0x40] sm:$0xff]  }
  0x12   : > { %v286_v14 = vmul.f32 %v534_v4, %v708_v0  ;;  %v287_v15 = vmul.f32 %v535_v5, %v708_v0  ;;  %v288_v16 = vmul.f32 %v538_v6, %v708_v0  ;;  %v289_v17 = vmul.f32 %v539_v7, %v708_v0  ;;  %v604_v4 = vld [vmem:[%s703_s19 + $0x48] sm:$0xff]  }
  0x13   : > { %v290_v18 = vmul.f32 %v542_v10, %v708_v0  ;;  %v291_v19 = vmul.f32 %v543_v11, %v708_v0  ;;  %v292_v20 = vmul.f32 %v546_v12, %v708_v0  ;;  %v293_v21 = vmul.f32 %v547_v13, %v708_v0  ;;  %v605_v10 = vld [vmem:[%s703_s19 + $0x50] sm:$0xff]   ;;  %v606_v11 = vld [vmem:[%s703_s19 + $0x58] sm:$0xff]  }
  0x14   : > { %v325_v22 = vadd.f32 %v717_v9, %v286_v14  ;;  %v326_v23 = vadd.f32 %v717_v9, %v287_v15  ;;  %v327_v24 = vadd.f32 %v717_v9, %v288_v16  ;;  %v328_v25 = vadd.f32 %v717_v9, %v289_v17 }
  0x15   : > { %v329_v26 = vadd.f32 %v717_v9, %v290_v18  ;;  %v330_v27 = vadd.f32 %v717_v9, %v291_v19  ;;  %v331_v28 = vadd.f32 %v717_v9, %v292_v20  ;;  %v332_v29 = vadd.f32 %v717_v9, %v293_v21 }
  0x16   : > { %v357_v32 = vmax.f32 %v325_v22, 0.0  ;;  %v358_v33 = vmax.f32 %v326_v23, 0.0  ;;  %v359_v34 = vmax.f32 %v327_v24, 0.0  ;;  %v360_v35 = vmax.f32 %v328_v25, 0.0 }
  0x17   : > { %v361_v38 = vmax.f32 %v329_v26, 0.0  ;;  %v362_v39 = vmax.f32 %v330_v27, 0.0  ;;  %v363_v40 = vmax.f32 %v331_v28, 0.0  ;;  %v364_v41 = vmax.f32 %v332_v29, 0.0 }
  0x18   : > { %389 = vst [vmem:[%s735_s27] sm:$0xff] %v357_v32  ;;  %390 = vst [vmem:[%s735_s27 + $0x8] sm:$0xff] %v358_v33  ;;  %v550_v42 = vunpack.c.l.bf16 %v599_v30  ;;  %v551_v43 = vunpack.c.h.bf16 %v599_v30  ;;  %v554_v44 = vunpack.c.l.bf16 %v600_v31  ;;  %v555_v45 = vunpack.c.h.bf16 %v600_v31 }
  0x19   : > { %391 = vst [vmem:[%s735_s27 + $0x10] sm:$0xff] %v359_v34  ;;  %392 = vst [vmem:[%s735_s27 + $0x18] sm:$0xff] %v360_v35  ;;  %v558_v46 = vunpack.c.l.bf16 %v601_v36  ;;  %v559_v47 = vunpack.c.h.bf16 %v601_v36  ;;  %v562_v48 = vunpack.c.l.bf16 %v602_v37  ;;  %v563_v49 = vunpack.c.h.bf16 %v602_v37 }
  0x1a   : > { %393 = vst [vmem:[%s735_s27 + $0x20] sm:$0xff] %v361_v38  ;;  %394 = vst [vmem:[%s735_s27 + $0x28] sm:$0xff] %v362_v39  ;;  %v294_v50 = vmul.f32 %v550_v42, %v708_v0  ;;  %v295_v51 = vmul.f32 %v551_v43, %v708_v0  ;;  %v296_v52 = vmul.f32 %v554_v44, %v708_v0  ;;  %v566_v16 = vunpack.c.l.bf16 %v603_v3 }
  0x1b   : > { %395 = vst [vmem:[%s735_s27 + $0x30] sm:$0xff] %v363_v40  ;;  %396 = vst [vmem:[%s735_s27 + $0x38] sm:$0xff] %v364_v41  ;;  %v297_v53 = vmul.f32 %v555_v45, %v708_v0  ;;  %v298_v54 = vmul.f32 %v558_v46, %v708_v0  ;;  %v299_v55 = vmul.f32 %v559_v47, %v708_v0  ;;  %v567_v17 = vunpack.c.h.bf16 %v603_v3  ;;  %v607_v40 = vld [vmem:[%s703_s19 + $0x60] sm:$0xff]   ;;  %v608_v41 = vld [vmem:[%s703_s19 + $0x68] sm:$0xff]  }
  0x1c   : > { %v300_v56 = vmul.f32 %v562_v48, %v708_v0  ;;  %v301_v57 = vmul.f32 %v563_v49, %v708_v0  ;;  %v333_v58 = vadd.f32 %v717_v9, %v294_v50  ;;  %v334_v59 = vadd.f32 %v717_v9, %v295_v51  ;;  %v609_v46 = vld [vmem:[%s703_s19 + $0x70] sm:$0xff]   ;;  %v610_v47 = vld [vmem:[%s703_s19 + $0x78] sm:$0xff]  }
  0x1d   : > { %v335_v60 = vadd.f32 %v717_v9, %v296_v52  ;;  %v336_v61 = vadd.f32 %v717_v9, %v297_v53  ;;  %v337_v62 = vadd.f32 %v717_v9, %v298_v54  ;;  %v338_v63 = vadd.f32 %v717_v9, %v299_v55 }
  0x1e   : > { %v339_v1 = vadd.f32 %v717_v9, %v300_v56  ;;  %v340_v2 = vadd.f32 %v717_v9, %v301_v57  ;;  %v365_v5 = vmax.f32 %v333_v58, 0.0  ;;  %v366_v6 = vmax.f32 %v334_v59, 0.0 }
  0x1f   : > { %v367_v7 = vmax.f32 %v335_v60, 0.0  ;;  %v368_v8 = vmax.f32 %v336_v61, 0.0  ;;  %v369_v12 = vmax.f32 %v337_v62, 0.0  ;;  %v370_v13 = vmax.f32 %v338_v63, 0.0 }
  0x20   : > { %v371_v14 = vmax.f32 %v339_v1, 0.0  ;;  %v372_v15 = vmax.f32 %v340_v2, 0.0  ;;  %397 = vst [vmem:[%s735_s27 + $0x40] sm:$0xff] %v365_v5  ;;  %398 = vst [vmem:[%s735_s27 + $0x48] sm:$0xff] %v366_v6  ;;  %v570_v18 = vunpack.c.l.bf16 %v604_v4  ;;  %v571_v19 = vunpack.c.h.bf16 %v604_v4 }
  0x21   : > { %399 = vst [vmem:[%s735_s27 + $0x50] sm:$0xff] %v367_v7  ;;  %400 = vst [vmem:[%s735_s27 + $0x58] sm:$0xff] %v368_v8  ;;  %v574_v20 = vunpack.c.l.bf16 %v605_v10  ;;  %v575_v21 = vunpack.c.h.bf16 %v605_v10  ;;  %v578_v22 = vunpack.c.l.bf16 %v606_v11  ;;  %v579_v23 = vunpack.c.h.bf16 %v606_v11 }
  0x22   : > { %401 = vst [vmem:[%s735_s27 + $0x60] sm:$0xff] %v369_v12  ;;  %402 = vst [vmem:[%s735_s27 + $0x68] sm:$0xff] %v370_v13  ;;  %v302_v24 = vmul.f32 %v566_v16, %v708_v0  ;;  %v303_v25 = vmul.f32 %v567_v17, %v708_v0  ;;  %v304_v26 = vmul.f32 %v570_v18, %v708_v0  ;;  %v582_v52 = vunpack.c.l.bf16 %v607_v40 }
  0x23   : > { %403 = vst [vmem:[%s735_s27 + $0x70] sm:$0xff] %v371_v14  ;;  %404 = vst [vmem:[%s735_s27 + $0x78] sm:$0xff] %v372_v15  ;;  %v305_v27 = vmul.f32 %v571_v19, %v708_v0  ;;  %v306_v28 = vmul.f32 %v574_v20, %v708_v0  ;;  %v307_v29 = vmul.f32 %v575_v21, %v708_v0  ;;  %v583_v53 = vunpack.c.h.bf16 %v607_v40 }
  0x24   : > { %v308_v30 = vmul.f32 %v578_v22, %v708_v0  ;;  %v309_v31 = vmul.f32 %v579_v23, %v708_v0  ;;  %v341_v32 = vadd.f32 %v717_v9, %v302_v24  ;;  %v342_v33 = vadd.f32 %v717_v9, %v303_v25 }
  0x25   : > { %v343_v34 = vadd.f32 %v717_v9, %v304_v26  ;;  %v344_v35 = vadd.f32 %v717_v9, %v305_v27  ;;  %v345_v36 = vadd.f32 %v717_v9, %v306_v28  ;;  %v346_v37 = vadd.f32 %v717_v9, %v307_v29 }
  0x26   : > { %v347_v38 = vadd.f32 %v717_v9, %v308_v30  ;;  %v348_v39 = vadd.f32 %v717_v9, %v309_v31  ;;  %v373_v42 = vmax.f32 %v341_v32, 0.0  ;;  %v374_v43 = vmax.f32 %v342_v33, 0.0 }
  0x27   : > { %v375_v44 = vmax.f32 %v343_v34, 0.0  ;;  %v376_v45 = vmax.f32 %v344_v35, 0.0  ;;  %v377_v48 = vmax.f32 %v345_v36, 0.0  ;;  %v378_v49 = vmax.f32 %v346_v37, 0.0 }
  0x28   : > { %v379_v50 = vmax.f32 %v347_v38, 0.0  ;;  %v380_v51 = vmax.f32 %v348_v39, 0.0  ;;  %405 = vst [vmem:[%s735_s27 + $0x80] sm:$0xff] %v373_v42  ;;  %406 = vst [vmem:[%s735_s27 + $0x88] sm:$0xff] %v374_v43  ;;  %v586_v54 = vunpack.c.l.bf16 %v608_v41  ;;  %v587_v55 = vunpack.c.h.bf16 %v608_v41 }
  0x29   : > { %407 = vst [vmem:[%s735_s27 + $0x90] sm:$0xff] %v375_v44  ;;  %408 = vst [vmem:[%s735_s27 + $0x98] sm:$0xff] %v376_v45  ;;  %v590_v56 = vunpack.c.l.bf16 %v609_v46  ;;  %v591_v57 = vunpack.c.h.bf16 %v609_v46  ;;  %v594_v58 = vunpack.c.l.bf16 %v610_v47  ;;  %v595_v59 = vunpack.c.h.bf16 %v610_v47 }
  0x2a   : > { %409 = vst [vmem:[%s735_s27 + $0xa0] sm:$0xff] %v377_v48  ;;  %410 = vst [vmem:[%s735_s27 + $0xa8] sm:$0xff] %v378_v49  ;;  %v310_v60 = vmul.f32 %v582_v52, %v708_v0  ;;  %v311_v61 = vmul.f32 %v583_v53, %v708_v0  ;;  %v312_v62 = vmul.f32 %v586_v54, %v708_v0 }
  0x2b   : > { %411 = vst [vmem:[%s735_s27 + $0xb0] sm:$0xff] %v379_v50  ;;  %412 = vst [vmem:[%s735_s27 + $0xb8] sm:$0xff] %v380_v51  ;;  %v313_v63 = vmul.f32 %v587_v55, %v708_v0  ;;  %v314_v1 = vmul.f32 %v590_v56, %v708_v0  ;;  %v315_v2 = vmul.f32 %v591_v57, %v708_v0 }
  0x2c   : > { %v316_v3 = vmul.f32 %v594_v58, %v708_v0  ;;  %v317_v4 = vmul.f32 %v595_v59, %v708_v0  ;;  %v349_v5 = vadd.f32 %v717_v9, %v310_v60  ;;  %v350_v6 = vadd.f32 %v717_v9, %v311_v61 }
  0x2d   : > { %v351_v7 = vadd.f32 %v717_v9, %v312_v62  ;;  %v352_v8 = vadd.f32 %v717_v9, %v313_v63  ;;  %v353_v10 = vadd.f32 %v717_v9, %v314_v1  ;;  %v354_v11 = vadd.f32 %v717_v9, %v315_v2 }
  0x2e   : > { %v355_v0 = vadd.f32 %v717_v9, %v316_v3  ;;  %v356_v12 = vadd.f32 %v717_v9, %v317_v4  ;;  %v381_v13 = vmax.f32 %v349_v5, 0.0  ;;  %v382_v14 = vmax.f32 %v350_v6, 0.0 }
  0x2f   : > { %v383_v15 = vmax.f32 %v351_v7, 0.0  ;;  %v384_v16 = vmax.f32 %v352_v8, 0.0  ;;  %v385_v17 = vmax.f32 %v353_v10, 0.0  ;;  %v386_v18 = vmax.f32 %v354_v11, 0.0 }
  0x30   : > { %v387_v19 = vmax.f32 %v355_v0, 0.0  ;;  %v388_v20 = vmax.f32 %v356_v12, 0.0  ;;  %413 = vst [vmem:[%s735_s27 + $0xc0] sm:$0xff] %v381_v13  ;;  %414 = vst [vmem:[%s735_s27 + $0xc8] sm:$0xff] %v382_v14 }
  0x31   : > { %415 = vst [vmem:[%s735_s27 + $0xd0] sm:$0xff] %v383_v15  ;;  %416 = vst [vmem:[%s735_s27 + $0xd8] sm:$0xff] %v384_v16 }
  0x32   : > { %417 = vst [vmem:[%s735_s27 + $0xe0] sm:$0xff] %v385_v17  ;;  %418 = vst [vmem:[%s735_s27 + $0xe8] sm:$0xff] %v386_v18 }
  0x33   : > { %419 = vst [vmem:[%s735_s27 + $0xf0] sm:$0xff] %v387_v19  ;;  %420 = vst [vmem:[%s735_s27 + $0xf8] sm:$0xff] %v388_v20 }
  0x34 PF: > { %s13_s14 = sadd.s32 1, %s657_s14   ;;  %s846_s12 = smov %s653_s13 }
  0x35   : > { %p10_p5 = scmp.ge.s32.totalorder %s13_s14, 4   ;;  %s847_s13 = smov %s849_s15 }
  0x37   :  { %12 = sbr.rel (!%p10_p5) target bundleno = 2 (0x2), region = 62 }

// kernel: up_forward.3
= control target key start
LH: loop header
LB: loop body
LE: loop exit
PB: predicated region body
PF: predicated region fallthrough
CT: control target
= control target key end

     0   :  { %s5341_s12 = smov 0   ;;  %s5343_s13 = smov 0   ;;  %s6324_s0 = inlined_call_operand.vmem [shape: bf16[2,16,16,8], index: 0, kind: input, shape index: {}]   ;;  %s6325_s1 = inlined_call_operand.vmem [shape: bf16[9,128,128], index: 1, kind: input, shape index: {}]   ;;  %s6326_s2 = inlined_call_operand.vmem [shape: bf16[2,16,16,128], index: 2, kind: output, shape index: {0}]   ;;  %s6327_s3 = inlined_call_operand.vmem [shape: f32[2,2,128], index: 3, kind: output, shape index: {1}]  }
   0x1   :  { %s5345_s14 = smov 0  }
   0x2 LB: > { %s26_s15 = sadd.s32 1, %s5313_s13  ;;  %p4085_p0 = scmp.ge.s32.totalorder %s5317_s14, 1  ;;  %s5317_s14 = sphi %s5345_s14, %s14_s14   ;;  %s5313_s13 = sphi %s5343_s13, %s6387_s13   ;;  %s5309_s12 = sphi %s5341_s12, %s6386_s12  }
   0x3   : > { %p28_p1 = scmp.ge.s32.totalorder %s26_s15, 2  ;;  %p165_p2 = scmp.lt.s32.totalorder %s5317_s14, 3 }
   0x5   : > { %s6389_s15 = smov (%p28_p1, %s26_s15), 0  ;;  %p166_p3 = pnand %p4085_p0, %p165_p2 }
   0x7   : > { %169 = sbr.rel (%p166_p3) target bundleno = 557 (0x22d), region = 28 }
   0xc   : > { %v5222_v0 = vld [vmem:[%s6325_s1 + $0x38] sm:$0xff]   ;;  %v5367_v1 = vld [vmem:[%s6325_s1 + $0x30] sm:$0xff]   ;;  %v5319_v2 = vmov 0.0   ;;  %p203_p4 = scmp.lt.s32.totalorder %s5309_s12, 1  ;;  %v5224_v3 = vld [vmem:[%s6325_s1 + $0x28] sm:$0xff]   ;;  %v5320_v4 = vmov 0.0|0.0  }
   0xd   : > { %228 = vst [vmem:[#allocation2] sm:$0xff] %v5319_v2  ;;  %229 = vst [vmem:[#allocation2 + $0x8] sm:$0xff] %v5319_v2  ;;  %4749 = vmatprep.subr.bf16.mxu0 %v5222_v0  ;;  %5181 = vmatprep.subr.bf16.mxu1 %v5222_v0  ;;  %v5225_v5 = vld [vmem:[%s6325_s1 + $0x20] sm:$0xff]   ;;  %vm347_vm0 = vcmask 64512   ;;  %v5226_v15 = vld [vmem:[%s6325_s1 + $0x18] sm:$0xff]  }
   0xe   : > { %230 = vst [vmem:[#allocation2 + $0x10] sm:$0x3] %v5319_v2  ;;  %231 = vst [vmem:[#allocation2 + $0x18] sm:$0xff] %v5319_v2  ;;  %4750 = vmatpush3.bf16.msra.mxu0 %v5222_v0  ;;  %5189 = vmatpush3.bf16.msra.mxu1 %v5222_v0  ;;  %s6391_s12 = smov (!%p203_p4, %s5309_s12), 1  ;;  %v5227_v28 = vld [vmem:[%s6325_s1 + $0x10] sm:$0xff]   ;;  %v5228_v32 = vld [vmem:[%s6325_s1 + $0x8] sm:$0xff]  }
   0xf   : > { %232 = vst [vmem:[#allocation2 + $0x20] sm:$0xff] %v5319_v2  ;;  %233 = vst [vmem:[#allocation2 + $0x28] sm:$0x3] %v5319_v2  ;;  %4751 = vmatprep.subr.bf16.mxu0 %v5367_v1  ;;  %5182 = vmatprep.subr.bf16.mxu1 %v5367_v1  ;;  %s4325_s22 = sshll.u32 %s6391_s12, 7  ;;  %v5229_v45 = vld [vmem:[%s6325_s1] sm:$0xff]   ;;  %v5230_v50 = vld [vmem:[%s6325_s1 + $0x78] sm:$0xff]  }
  0x10   : > { %234 = vst [vmem:[#allocation2 + $0x30] sm:$0xff] %v5319_v2  ;;  %235 = vst [vmem:[#allocation2 + $0x38] sm:$0xff] %v5319_v2  ;;  %4765 = vmatprep.mubr.bf16.mxu0 %v5320_v4  ;;  %s5384_s25 = scalar_lea.vmem %s6324_s0, %s4325_s22  ;;  %v5231_v51 = vld [vmem:[%s6325_s1 + $0xb8] sm:$0xff]   ;;  %s6229_s10 = scalar_lea.vmem %s6326_s2, %s4325_s22 }
  0x11   : > { %236 = vst [vmem:[#allocation2 + $0x40] sm:$0x3] %v5319_v2  ;;  %237 = vst [vmem:[#allocation2 + $0x48] sm:$0xff] %v5319_v2  ;;  %v4509_v6 = vld [vmem:[%s5384_s25 + $0x38] sm:$0xff]   ;;  %v4360_v7 = vld [vmem:[%s5384_s25] sm:$0xff]   ;;  %s4090_s22 = sshll.u32 %s6391_s12, 1 }
  0x12   : > { %238 = vst [vmem:[#allocation2 + $0x50] sm:$0xff] %v5319_v2  ;;  %239 = vst [vmem:[#allocation2 + $0x58] sm:$0x3] %v5319_v2  ;;  %4752 = vmatpush3.bf16.msra.mxu0 %v5367_v1  ;;  %5190 = vmatpush3.bf16.msra.mxu1 %v5367_v1  ;;  %v4510_v8 = vld [vmem:[%s5384_s25 + $0x40] sm:$0xff]   ;;  %v4389_v9 = vunpack.c.l.bf16 %v4509_v6  ;;  %v4390_v10 = vunpack.c.h.bf16 %v4509_v6  ;;  %v4361_v11 = vunpack.c.l.bf16 %v4360_v7  ;;  %v4362_v12 = vunpack.c.h.bf16 %v4360_v7  ;;  %v4503_v16 = vld [vmem:[%s5384_s25 + $0x8] sm:$0xff]   ;;  %s226_s17 = scalar_lea.vmem %s6327_s3, %s4090_s22 }
  0x13   : > { %240 = vst [vmem:[#allocation2 + $0x60] sm:$0xff] %v5319_v2  ;;  %241 = vst [vmem:[#allocation2 + $0x68] sm:$0xff] %v5319_v2  ;;  %4753 = vmatprep.subr.bf16.mxu0 %v5224_v3  ;;  %5183 = vmatprep.subr.bf16.mxu1 %v5224_v3  ;;  %v4393_v13 = vunpack.c.l.bf16 %v4510_v8  ;;  %v4394_v14 = vunpack.c.h.bf16 %v4510_v8  ;;  %v4511_v17 = vld [vmem:[%s5384_s25 + $0x48] sm:$0xff]   ;;  %v4504_v18 = vld [vmem:[%s5384_s25 + $0x10] sm:$0xff]   ;;  %v4365_v19 = vunpack.c.l.bf16 %v4503_v16  ;;  %v4366_v20 = vunpack.c.h.bf16 %v4503_v16 }
  0x14   : > { %242 = vst [vmem:[#allocation2 + $0x70] sm:$0x3] %v5319_v2  ;;  %243 = vst [vmem:[#allocation2 + $0x78] sm:$0xff] %v5319_v2  ;;  %v4397_v21 = vunpack.c.l.bf16 %v4511_v17  ;;  %v4398_v22 = vunpack.c.h.bf16 %v4511_v17  ;;  %v4512_v23 = vld [vmem:[%s5384_s25 + $0x50] sm:$0xff]   ;;  %v4369_v24 = vunpack.c.l.bf16 %v4504_v18  ;;  %v4370_v25 = vunpack.c.h.bf16 %v4504_v18  ;;  %v4505_v33 = vld [vmem:[%s5384_s25 + $0x18] sm:$0xff]  }
  0x15   : > { %244 = vst [vmem:[#allocation2 + $0x80] sm:$0xff] %v5319_v2  ;;  %245 = vst [vmem:[#allocation2 + $0x88] sm:$0x3] %v5319_v2  ;;  %v4401_v26 = vunpack.c.l.bf16 %v4512_v23  ;;  %v4402_v27 = vunpack.c.h.bf16 %v4512_v23  ;;  %v4513_v34 = vld [vmem:[%s5384_s25 + $0x58] sm:$0xff]   ;;  %v4373_v35 = vunpack.c.l.bf16 %v4505_v33  ;;  %v4374_v36 = vunpack.c.h.bf16 %v4505_v33  ;;  %v4506_v39 = vld [vmem:[%s5384_s25 + $0x20] sm:$0xff]  }
  0x16   : > { %246 = vst [vmem:[#allocation2 + $0x90] sm:$0xff] %v5319_v2  ;;  %247 = vst [vmem:[#allocation2 + $0x98] sm:$0xff] %v5319_v2  ;;  %4754 = vmatpush3.bf16.msra.mxu0 %v5224_v3  ;;  %5191 = vmatpush3.bf16.msra.mxu1 %v5224_v3  ;;  %v4405_v37 = vunpack.c.l.bf16 %v4513_v34  ;;  %v4406_v38 = vunpack.c.h.bf16 %v4513_v34  ;;  %v4514_v40 = vld [vmem:[%s5384_s25 + $0x60] sm:$0xff]   ;;  %v4377_v41 = vunpack.c.l.bf16 %v4506_v39  ;;  %v4378_v42 = vunpack.c.h.bf16 %v4506_v39  ;;  %v4507_v55 = vld [vmem:[%s5384_s25 + $0x28] sm:$0xff]  }
  0x17   : > { %248 = vst [vmem:[#allocation2 + $0xa0] sm:$0x3] %v5319_v2  ;;  %249 = vst [vmem:[#allocation2 + $0xa8] sm:$0xff] %v5319_v2  ;;  %4755 = vmatprep.subr.bf16.mxu0 %v5225_v5  ;;  %5184 = vmatprep.subr.bf16.mxu1 %v5225_v5  ;;  %v4409_v43 = vunpack.c.l.bf16 %v4514_v40  ;;  %v4410_v44 = vunpack.c.h.bf16 %v4514_v40  ;;  %v4515_v56 = vld [vmem:[%s5384_s25 + $0x68] sm:$0xff]   ;;  %v4381_v57 = vunpack.c.l.bf16 %v4507_v55  ;;  %v4382_v58 = vunpack.c.h.bf16 %v4507_v55  ;;  %v4508_v61 = vld [vmem:[%s5384_s25 + $0x30] sm:$0xff]  }
  0x18   : > { %250 = vst [vmem:[#allocation2 + $0xb0] sm:$0xff] %v5319_v2  ;;  %251 = vst [vmem:[#allocation2 + $0xb8] sm:$0x3] %v5319_v2  ;;  %v4413_v59 = vunpack.c.l.bf16 %v4515_v56  ;;  %v4414_v60 = vunpack.c.h.bf16 %v4515_v56  ;;  %v4516_v62 = vld [vmem:[%s5384_s25 + $0x70] sm:$0xff]   ;;  %v4386_v3 = vunpack.c.h.bf16 %v4508_v61  ;;  %v5237_v23 = vld [vmem:[%s6325_s1 + $0xa0] sm:$0xff]  }
  0x19   : > { %252 = vst [vmem:[#allocation2 + $0xc0] sm:$0xff] %v5319_v2  ;;  %253 = vst [vmem:[#allocation2 + $0xc8] sm:$0xff] %v5319_v2  ;;  %v4417_v4 = vunpack.c.l.bf16 %v4516_v62  ;;  %v5232_v6 = vld [vmem:[%s6325_s1 + $0x70] sm:$0xff]   ;;  %v1055_v55 = vld [vmem:[#allocation2 + $0x2] sm:$0xff] }
  0x1a   : > { %254 = vst [vmem:[#allocation2 + $0xd0] sm:$0x3] %v5319_v2  ;;  %255 = vst [vmem:[#allocation2 + $0xd8] sm:$0xff] %v5319_v2  ;;  %4756 = vmatpush3.bf16.msra.mxu0 %v5225_v5  ;;  %5192 = vmatpush3.bf16.msra.mxu1 %v5225_v5  ;;  %v4418_v5 = vunpack.c.h.bf16 %v4516_v62  ;;  %v5233_v7 = vld [vmem:[%s6325_s1 + $0xb0] sm:$0xff]  }
  0x1b   : > { %256 = vst [vmem:[#allocation2 + $0xe0] sm:$0xff] %v5319_v2  ;;  %257 = vst [vmem:[#allocation2 + $0xe8] sm:$0x3] %v5319_v2  ;;  %4757 = vmatprep.subr.bf16.mxu0 %v5226_v15  ;;  %5185 = vmatprep.subr.bf16.mxu1 %v5226_v15  ;;  %v5240_v39 = vld [vmem:[%s6325_s1 + $0x50] sm:$0xff]  }
  0x1c   : > { %258 = vst [vmem:[#allocation2 + $0xf0] sm:$0xff] %v5319_v2  ;;  %259 = vst [vmem:[#allocation2 + $0xf8] sm:$0xff] %v5319_v2  ;;  %v5241_v40 = vld [vmem:[%s6325_s1 + $0x90] sm:$0xff]  }
  0x1d   : > { %260 = vst [vmem:[#allocation2 + $0x100] sm:$0x3] %v5319_v2  ;;  %261 = vst [vmem:[#allocation2 + $0x108] sm:$0xff] %v5319_v2  ;;  %v1056_v56 = vld [vmem:[#allocation2 + $0xa] sm:$0xff] }
  0x1e   : > { %262 = vst [vmem:[#allocation2 + $0x110] sm:$0xff] %v5319_v2  ;;  %263 = vst [vmem:[#allocation2 + $0x118] sm:$0x3] %v5319_v2  ;;  %4758 = vmatpush3.bf16.msra.mxu0 %v5226_v15  ;;  %5193 = vmatpush3.bf16.msra.mxu1 %v5226_v15  ;;  %v5235_v15 = vld [vmem:[%s6325_s1 + $0xa8] sm:$0xff]  }
  0x1f   : > { %264 = vst [vmem:[#allocation2 + $0x120] sm:$0xff] %v5319_v2  ;;  %265 = vst [vmem:[#allocation2 + $0x128] sm:$0xff] %v5319_v2  ;;  %4759 = vmatprep.subr.bf16.mxu0 %v5227_v28  ;;  %5186 = vmatprep.subr.bf16.mxu1 %v5227_v28 }
  0x20   : > { %266 = vst [vmem:[#allocation2 + $0x130] sm:$0x3] %v5319_v2  ;;  %267 = vst [vmem:[#allocation2 + $0x138] sm:$0xff] %v5319_v2 }
  0x21   : > { %268 = vst [vmem:[#allocation2 + $0x140] sm:$0xff] %v5319_v2  ;;  %269 = vst [vmem:[#allocation2 + $0x148] sm:$0x3] %v5319_v2 }
  0x22   : > { %270 = vst [vmem:[#allocation2 + $0x150] sm:$0xff] %v5319_v2  ;;  %271 = vst [vmem:[#allocation2 + $0x158] sm:$0xff] %v5319_v2  ;;  %4760 = vmatpush3.bf16.msra.mxu0 %v5227_v28  ;;  %5194 = vmatpush3.bf16.msra.mxu1 %v5227_v28 }
  0x23   : > { %272 = vst [vmem:[#allocation2 + $0x160] sm:$0x3] %v5319_v2  ;;  %273 = vst [vmem:[#allocation2 + $0x168] sm:$0xff] %v5319_v2  ;;  %4761 = vmatprep.subr.bf16.mxu0 %v5228_v32  ;;  %5187 = vmatprep.subr.bf16.mxu1 %v5228_v32 }
  0x24   : > { %274 = vst [vmem:[#allocation2 + $0x170] sm:$0xff] %v5319_v2  ;;  %275 = vst [vmem:[#allocation2 + $0x178] sm:$0x3] %v5319_v2 }
  0x25   : > { %276 = vst [vmem:[#allocation2 + $0x180] sm:$0xff] %v5319_v2  ;;  %277 = vst [vmem:[#allocation2 + $0x188] sm:$0xff] %v5319_v2 }
  0x26   : > { %278 = vst [vmem:[#allocation2 + $0x190] sm:$0x3] %v5319_v2  ;;  %279 = vst [vmem:[#allocation2 + $0x198] sm:$0xff] %v5319_v2  ;;  %4762 = vmatpush3.bf16.msra.mxu0 %v5228_v32  ;;  %5195 = vmatpush3.bf16.msra.mxu1 %v5228_v32  ;;  %v5239_v32 = vld [vmem:[%s6325_s1 + $0x98] sm:$0xff]  }
  0x27   : > { %280 = vst [vmem:[#allocation2 + $0x1a0] sm:$0xff] %v5319_v2  ;;  %281 = vst [vmem:[#allocation2 + $0x1a8] sm:$0x3] %v5319_v2  ;;  %4763 = vmatprep.subr.bf16.mxu0 %v5229_v45  ;;  %5188 = vmatprep.subr.bf16.mxu1 %v5229_v45  ;;  %v4385_v2 = vunpack.c.l.bf16 %v4508_v61 }
  0x28   : > { %362 = vst.msk [vmem:[#allocation2 + $0xc1] sm:$0xff] %vm347_vm0, %v4389_v9  ;;  %363 = vst.msk [vmem:[#allocation2 + $0xc9] sm:$0xff] %vm347_vm0, %v4390_v10 }
  0x29   : > { %348 = vst.msk [vmem:[#allocation2 + $0x19] sm:$0xff] %vm347_vm0, %v4361_v11  ;;  %349 = vst.msk [vmem:[#allocation2 + $0x21] sm:$0xff] %vm347_vm0, %v4362_v12 }
  0x2a   : > { %364 = vst.msk [vmem:[#allocation2 + $0xd9] sm:$0xff] %vm347_vm0, %v4393_v13  ;;  %365 = vst.msk [vmem:[#allocation2 + $0xe1] sm:$0xff] %vm347_vm0, %v4394_v14  ;;  %4764 = vmatpush3.bf16.msra.mxu0 %v5229_v45  ;;  %5196 = vmatpush3.bf16.msra.mxu1 %v5229_v45  ;;  %v5234_v14 = vld [vmem:[%s6325_s1 + $0x68] sm:$0xff]  }
  0x2b   : > { %350 = vst.msk [vmem:[#allocation2 + $0x31] sm:$0xff] %vm347_vm0, %v4365_v19  ;;  %351 = vst.msk [vmem:[#allocation2 + $0x39] sm:$0xff] %vm347_vm0, %v4366_v20  ;;  %4797 = vmatprep.subr.bf16.mxu1 %v5230_v50  ;;  %4845 = vmatprep.subr.bf16.mxu0 %v5231_v51 }
  0x2c   : > { %366 = vst.msk [vmem:[#allocation2 + $0xf1] sm:$0xff] %vm347_vm0, %v4397_v21  ;;  %367 = vst.msk [vmem:[#allocation2 + $0xf9] sm:$0xff] %vm347_vm0, %v4398_v22  ;;  %v5236_v22 = vld [vmem:[%s6325_s1 + $0x60] sm:$0xff]  }
  0x2d   : > { %352 = vst.msk [vmem:[#allocation2 + $0x49] sm:$0xff] %vm347_vm0, %v4369_v24  ;;  %353 = vst.msk [vmem:[#allocation2 + $0x51] sm:$0xff] %vm347_vm0, %v4370_v25 }
  0x2e   : > { %368 = vst.msk [vmem:[#allocation2 + $0x109] sm:$0xff] %vm347_vm0, %v4401_v26  ;;  %369 = vst.msk [vmem:[#allocation2 + $0x111] sm:$0xff] %vm347_vm0, %v4402_v27 }
  0x2f   : > { %v396_v29 = vld [vmem:[#allocation2 + $0xc0] sm:$0xff]  ;;  %v397_v30 = vld [vmem:[#allocation2 + $0xc8] sm:$0xff]  ;;  %354 = vst.msk [vmem:[#allocation2 + $0x61] sm:$0xff] %vm347_vm0, %v4373_v35  ;;  %355 = vst.msk [vmem:[#allocation2 + $0x69] sm:$0xff] %vm347_vm0, %v4374_v36 }
  0x30   : > { %v5418_v31 = vpack.c.bf16 %v397_v30, %v396_v29  ;;  %370 = vst.msk [vmem:[#allocation2 + $0x121] sm:$0xff] %vm347_vm0, %v4405_v37  ;;  %371 = vst.msk [vmem:[#allocation2 + $0x129] sm:$0xff] %vm347_vm0, %v4406_v38  ;;  %v382_v46 = vld [vmem:[#allocation2 + $0x18] sm:$0xff]  ;;  %v383_v47 = vld [vmem:[#allocation2 + $0x20] sm:$0xff] }
  0x31   : > { %356 = vst.msk [vmem:[#allocation2 + $0x79] sm:$0xff] %vm347_vm0, %v4377_v41  ;;  %357 = vst.msk [vmem:[#allocation2 + $0x81] sm:$0xff] %vm347_vm0, %v4378_v42  ;;  %v398_v48 = vld [vmem:[#allocation2 + $0xd8] sm:$0xff]  ;;  %v399_v49 = vld [vmem:[#allocation2 + $0xe0] sm:$0xff]  ;;  %v5445_v52 = vpack.c.bf16 %v383_v47, %v382_v46 }
  0x32   : > { %4781 = vmatprep.mubr.bf16.mxu1 %v5418_v31  ;;  %372 = vst.msk [vmem:[#allocation2 + $0x139] sm:$0xff] %vm347_vm0, %v4409_v43  ;;  %373 = vst.msk [vmem:[#allocation2 + $0x141] sm:$0xff] %vm347_vm0, %v4410_v44  ;;  %v5447_v53 = vpack.c.bf16 %v399_v49, %v398_v48  ;;  %v384_v54 = vld [vmem:[#allocation2 + $0x30] sm:$0xff]  ;;  %v385_v63 = vld [vmem:[#allocation2 + $0x38] sm:$0xff] }
  0x33   : > { %v400_v0 = vld [vmem:[#allocation2 + $0xf0] sm:$0xff]  ;;  %v401_v1 = vld [vmem:[#allocation2 + $0xf8] sm:$0xff]  ;;  %358 = vst.msk [vmem:[#allocation2 + $0x91] sm:$0xff] %vm347_vm0, %v4381_v57  ;;  %359 = vst.msk [vmem:[#allocation2 + $0x99] sm:$0xff] %vm347_vm0, %v4382_v58  ;;  %v5467_v8 = vpack.c.bf16 %v385_v63, %v384_v54  ;;  %4766 = vmatmul.mubr.bf16.vlgmr.msra.gmra.mxu0 %v5445_v52 }
  0x34   : > { %374 = vst.msk [vmem:[#allocation2 + $0x151] sm:$0xff] %vm347_vm0, %v4413_v59  ;;  %375 = vst.msk [vmem:[#allocation2 + $0x159] sm:$0xff] %vm347_vm0, %v4414_v60  ;;  %v5469_v9 = vpack.c.bf16 %v401_v1, %v400_v0  ;;  %v386_v10 = vld [vmem:[#allocation2 + $0x48] sm:$0xff]  ;;  %v387_v11 = vld [vmem:[#allocation2 + $0x50] sm:$0xff]  ;;  %4782 = vmatmul.mubr.bf16.vlgmr.msra.gmra.mxu1 %v5447_v53  ;;  %4846 = vmatpush3.bf16.msra.mxu0 %v5231_v51  ;;  %v1087_v60 = vpack.c.bf16 %v1056_v56, %v1055_v55 }
  0x35   : > { %360 = vst.msk [vmem:[#allocation2 + $0xa9] sm:$0xff] %vm347_vm0, %v4385_v2  ;;  %361 = vst.msk [vmem:[#allocation2 + $0xb1] sm:$0xff] %vm347_vm0, %v4386_v3  ;;  %v402_v12 = vld [vmem:[#allocation2 + $0x108] sm:$0xff]  ;;  %4798 = vmatpush3.bf16.msra.mxu1 %v5230_v50  ;;  %v403_v13 = vld [vmem:[#allocation2 + $0x110] sm:$0xff]  ;;  %4847 = vmatprep.subr.bf16.mxu0 %v5233_v7  ;;  %v5481_v17 = vpack.c.bf16 %v387_v11, %v386_v10 }
  0x36   : > { %376 = vst.msk [vmem:[#allocation2 + $0x169] sm:$0xff] %vm347_vm0, %v4417_v4  ;;  %377 = vst.msk [vmem:[#allocation2 + $0x171] sm:$0xff] %vm347_vm0, %v4418_v5  ;;  %4799 = vmatprep.subr.bf16.mxu1 %v5232_v6  ;;  %4769 = vmatprep.mubr.bf16.mxu0 %v5467_v8  ;;  %v388_v16 = vld [vmem:[#allocation2 + $0x60] sm:$0xff]  ;;  %v5483_v18 = vpack.c.bf16 %v403_v13, %v402_v12  ;;  %v389_v19 = vld [vmem:[#allocation2 + $0x68] sm:$0xff] }
  0x37   : > { %4785 = vmatprep.mubr.bf16.mxu1 %v5469_v9  ;;  %v404_v20 = vld [vmem:[#allocation2 + $0x120] sm:$0xff]  ;;  %v405_v21 = vld [vmem:[#allocation2 + $0x128] sm:$0xff]  ;;  %v5491_v24 = vpack.c.bf16 %v389_v19, %v388_v16  ;;  %v5238_v30 = vld [vmem:[%s6325_s1 + $0x58] sm:$0xff]  }
  0x38   : > { %4848 = vmatpush3.bf16.msra.mxu0 %v5233_v7  ;;  %v5493_v25 = vpack.c.bf16 %v405_v21, %v404_v20  ;;  %v390_v26 = vld [vmem:[#allocation2 + $0x78] sm:$0xff]  ;;  %v391_v27 = vld [vmem:[#allocation2 + $0x80] sm:$0xff]  ;;  %v5242_v46 = vld [vmem:[%s6325_s1 + $0x48] sm:$0xff]  }
  0x39   : > { %4800 = vmatpush3.bf16.msra.mxu1 %v5232_v6  ;;  %4849 = vmatprep.subr.bf16.mxu0 %v5235_v15  ;;  %v406_v28 = vld [vmem:[#allocation2 + $0x138] sm:$0xff]  ;;  %v407_v29 = vld [vmem:[#allocation2 + $0x140] sm:$0xff]  ;;  %v5505_v36 = vpack.c.bf16 %v391_v27, %v390_v26  ;;  %v5243_v48 = vld [vmem:[%s6325_s1 + $0x88] sm:$0xff]  }
  0x3a   : > { %4801 = vmatprep.subr.bf16.mxu1 %v5234_v14  ;;  %v392_v33 = vld [vmem:[#allocation2 + $0x90] sm:$0xff]  ;;  %v393_v34 = vld [vmem:[#allocation2 + $0x98] sm:$0xff]  ;;  %v5507_v37 = vpack.c.bf16 %v407_v29, %v406_v28  ;;  %v685_v49 = vld [vmem:[#allocation2 + $0x1] sm:$0xff] }
  0x3b   : > { %4770 = vmatmul.mubr.bf16.gmra.mxu0 %v5481_v17  ;;  %v408_v35 = vld [vmem:[#allocation2 + $0x150] sm:$0xff]  ;;  %v409_v38 = vld [vmem:[#allocation2 + $0x158] sm:$0xff]  ;;  %v5515_v41 = vpack.c.bf16 %v393_v34, %v392_v33  ;;  %v5244_v57 = vld [vmem:[%s6325_s1 + $0x40] sm:$0xff]  }
  0x3c   : > { %4786 = vmatmul.mubr.bf16.gmra.mxu1 %v5483_v18  ;;  %4850 = vmatpush3.bf16.msra.mxu0 %v5235_v15  ;;  %v5517_v42 = vpack.c.bf16 %v409_v38, %v408_v35  ;;  %v394_v43 = vld [vmem:[#allocation2 + $0xa8] sm:$0xff]  ;;  %v395_v44 = vld [vmem:[#allocation2 + $0xb0] sm:$0xff]  ;;  %v5245_v58 = vld [vmem:[%s6325_s1 + $0x80] sm:$0xff]  }
  0x3d   : > { %4802 = vmatpush3.bf16.msra.mxu1 %v5234_v14  ;;  %4851 = vmatprep.subr.bf16.mxu0 %v5237_v23  ;;  %v410_v45 = vld [vmem:[#allocation2 + $0x168] sm:$0xff]  ;;  %v411_v47 = vld [vmem:[#allocation2 + $0x170] sm:$0xff]  ;;  %v5529_v50 = vpack.c.bf16 %v395_v44, %v394_v43  ;;  %v687_v61 = vld [vmem:[#allocation2 + $0x19] sm:$0xff] }
  0x3e   : > { %4803 = vmatprep.subr.bf16.mxu1 %v5236_v22  ;;  %4773 = vmatprep.mubr.bf16.mxu0 %v5491_v24  ;;  %v5531_v51 = vpack.c.bf16 %v411_v47, %v410_v45  ;;  %v686_v54 = vld [vmem:[#allocation2 + $0x9] sm:$0xff]  ;;  %v688_v62 = vld [vmem:[#allocation2 + $0x21] sm:$0xff]  ;;  %v5246_v1 = vld [vmem:[%s6325_s1 + $0xf8] sm:$0xff]  }
  0x3f   : > { %4789 = vmatprep.mubr.bf16.mxu1 %v5493_v25  ;;  %v717_v59 = vpack.c.bf16 %v686_v54, %v685_v49  ;;  %v1057_v63 = vld [vmem:[#allocation2 + $0x1a] sm:$0xff]  ;;  %v1058_v0 = vld [vmem:[#allocation2 + $0x22] sm:$0xff]  ;;  %v689_v3 = vld [vmem:[#allocation2 + $0x31] sm:$0xff]  ;;  %v5547_v7 = vpack.c.bf16 %v688_v62, %v687_v61 }
  0x40   : > { %4852 = vmatpush3.bf16.msra.mxu0 %v5237_v23  ;;  %v5247_v2 = vld [vmem:[%s6325_s1 + $0x138] sm:$0xff]   ;;  %v5549_v10 = vpack.c.bf16 %v1058_v0, %v1057_v63  ;;  %v5248_v13 = vld [vmem:[%s6325_s1 + $0xf0] sm:$0xff]   ;;  %v693_v21 = vld [vmem:[#allocation2 + $0x61] sm:$0xff] }
  0x41   : > { %4804 = vmatpush3.bf16.msra.mxu1 %v5236_v22  ;;  %4853 = vmatprep.subr.bf16.mxu0 %v5239_v32  ;;  %v690_v4 = vld [vmem:[#allocation2 + $0x39] sm:$0xff]  ;;  %v691_v14 = vld [vmem:[#allocation2 + $0x49] sm:$0xff]  ;;  %v692_v15 = vld [vmem:[#allocation2 + $0x51] sm:$0xff] }
  0x42   : > { %4805 = vmatprep.subr.bf16.mxu1 %v5238_v30  ;;  %v1059_v5 = vld [vmem:[#allocation2 + $0x32] sm:$0xff]  ;;  %v1060_v6 = vld [vmem:[#allocation2 + $0x3a] sm:$0xff]  ;;  %v5551_v11 = vpack.c.bf16 %v690_v4, %v689_v3  ;;  %v1061_v16 = vld [vmem:[#allocation2 + $0x4a] sm:$0xff]  ;;  %v5571_v29 = vpack.c.bf16 %v692_v15, %v691_v14 }
  0x43   : > { %4774 = vmatmul.mubr.bf16.gmra.mxu0 %v5505_v36  ;;  %v5553_v12 = vpack.c.bf16 %v1060_v6, %v1059_v5  ;;  %v5249_v19 = vld [vmem:[%s6325_s1 + $0x130] sm:$0xff]   ;;  %v1063_v23 = vld [vmem:[#allocation2 + $0x62] sm:$0xff]  ;;  %v695_v34 = vld [vmem:[#allocation2 + $0x79] sm:$0xff] }
  0x44   : > { %4790 = vmatmul.mubr.bf16.gmra.mxu1 %v5507_v37  ;;  %4854 = vmatpush3.bf16.msra.mxu0 %v5239_v32  ;;  %v1062_v20 = vld [vmem:[#allocation2 + $0x52] sm:$0xff]  ;;  %v694_v22 = vld [vmem:[#allocation2 + $0x69] sm:$0xff]  ;;  %v696_v35 = vld [vmem:[#allocation2 + $0x81] sm:$0xff] }
  0x45   : > { %4806 = vmatpush3.bf16.msra.mxu1 %v5238_v30  ;;  %4855 = vmatprep.subr.bf16.mxu0 %v5241_v40  ;;  %v1064_v26 = vld [vmem:[#allocation2 + $0x6a] sm:$0xff]  ;;  %v5573_v30 = vpack.c.bf16 %v1062_v20, %v1061_v16  ;;  %v5575_v32 = vpack.c.bf16 %v694_v22, %v693_v21  ;;  %v1065_v38 = vld [vmem:[#allocation2 + $0x7a] sm:$0xff]  ;;  %v5595_v54 = vpack.c.bf16 %v696_v35, %v695_v34  ;;  %v1070_v62 = vld [vmem:[#allocation2 + $0xb2] sm:$0xff] }
  0x46   : > { %4807 = vmatprep.subr.bf16.mxu1 %v5240_v39  ;;  %4777 = vmatprep.mubr.bf16.mxu0 %v5515_v41  ;;  %v5250_v27 = vld [vmem:[%s6325_s1 + $0xe8] sm:$0xff]   ;;  %v5577_v33 = vpack.c.bf16 %v1064_v26, %v1063_v23  ;;  %v5253_v43 = vld [vmem:[%s6325_s1 + $0x120] sm:$0xff]   ;;  %v697_v44 = vld [vmem:[#allocation2 + $0x91] sm:$0xff] }
  0x47   : > { %4793 = vmatprep.mubr.bf16.mxu1 %v5517_v42  ;;  %v5251_v28 = vld [vmem:[%s6325_s1 + $0x128] sm:$0xff]   ;;  %v698_v45 = vld [vmem:[#allocation2 + $0x99] sm:$0xff]  ;;  %v5257_v63 = vld [vmem:[%s6325_s1 + $0x110] sm:$0xff]  }
  0x48   : > { %4856 = vmatpush3.bf16.msra.mxu0 %v5241_v40  ;;  %v5252_v40 = vld [vmem:[%s6325_s1 + $0xe0] sm:$0xff]   ;;  %v5255_v49 = vld [vmem:[%s6325_s1 + $0x118] sm:$0xff]   ;;  %v5599_v56 = vpack.c.bf16 %v698_v45, %v697_v44  ;;  %v1069_v61 = vld [vmem:[#allocation2 + $0xaa] sm:$0xff] }
  0x49   : > { %4808 = vmatpush3.bf16.msra.mxu1 %v5240_v39  ;;  %4857 = vmatprep.subr.bf16.mxu0 %v5243_v48  ;;  %v1066_v39 = vld [vmem:[#allocation2 + $0x82] sm:$0xff]  ;;  %v1068_v47 = vld [vmem:[#allocation2 + $0x9a] sm:$0xff]  ;;  %v1072_v3 = vld [vmem:[#allocation2 + $0xca] sm:$0xff] }
  0x4a   : > { %4809 = vmatprep.subr.bf16.mxu1 %v5242_v46  ;;  %v5597_v55 = vpack.c.bf16 %v1066_v39, %v1065_v38  ;;  %v701_v0 = vld [vmem:[#allocation2 + $0xc1] sm:$0xff]  ;;  %v705_v26 = vld [vmem:[#allocation2 + $0xf1] sm:$0xff] }
  0x4b   : > { %4778 = vmatmul.mubr.bf16.gmra.mxu0 %v5529_v50  ;;  %v5258_v4 = vld [vmem:[%s6325_s1 + $0xc8] sm:$0xff]   ;;  %v5260_v16 = vld [vmem:[%s6325_s1 + $0xc0] sm:$0xff]   ;;  %v1075_v38 = vld [vmem:[#allocation2 + $0xf2] sm:$0xff] }
  0x4c   : > { %4794 = vmatmul.mubr.bf16.gmra.mxu1 %v5531_v51  ;;  %4858 = vmatpush3.bf16.msra.mxu0 %v5243_v48  ;;  %v5254_v48 = vld [vmem:[%s6325_s1 + $0xd8] sm:$0xff]   ;;  %v5259_v5 = vld [vmem:[%s6325_s1 + $0x108] sm:$0xff]   ;;  %v5261_v23 = vld [vmem:[%s6325_s1 + $0x100] sm:$0xff]  }
  0x4d   : > { %4810 = vmatpush3.bf16.msra.mxu1 %v5242_v46  ;;  %4859 = vmatprep.subr.bf16.mxu0 %v5245_v58  ;;  %v1067_v46 = vld [vmem:[#allocation2 + $0x92] sm:$0xff]  ;;  %v704_v20 = vld [vmem:[#allocation2 + $0xe1] sm:$0xff] }
  0x4e   : > { %4811 = vmatprep.subr.bf16.mxu1 %v5244_v57  ;;  %4813 = vmatprep.mubr.bf16.mxu1 %v717_v59  ;;  %v699_v59 = vld [vmem:[#allocation2 + $0xa9] sm:$0xff]  ;;  %v1073_v21 = vld [vmem:[#allocation2 + $0xda] sm:$0xff] }
  0x4f   : > { %4861 = vmatprep.mubr.bf16.mxu0 %v1087_v60  ;;  %v700_v60 = vld [vmem:[#allocation2 + $0xb1] sm:$0xff]  ;;  %v1074_v22 = vld [vmem:[#allocation2 + $0xe2] sm:$0xff]  ;;  %v1076_v39 = vld [vmem:[#allocation2 + $0xfa] sm:$0xff] }
  0x50   : > { %4860 = vmatpush3.bf16.msra.mxu0 %v5245_v58  ;;  %v5256_v58 = vld [vmem:[%s6325_s1 + $0xd0] sm:$0xff]   ;;  %v5619_v6 = vpack.c.bf16 %v700_v60, %v699_v59  ;;  %v5648_v45 = vpack.c.bf16 %v1074_v22, %v1073_v21  ;;  %v709_v60 = vld [vmem:[#allocation2 + $0x121] sm:$0xff]  ;;  %v714_v21 = vld [vmem:[#allocation2 + $0x159] sm:$0xff] }
  0x51   : > { %4812 = vmatpush3.bf16.msra.mxu1 %v5244_v57  ;;  %4941 = vmatprep.subr.bf16.mxu0 %v5247_v2  ;;  %v5601_v57 = vpack.c.bf16 %v1068_v47, %v1067_v46  ;;  %v5652_v47 = vpack.c.bf16 %v1076_v39, %v1075_v38  ;;  %v1078_v59 = vld [vmem:[#allocation2 + $0x112] sm:$0xff]  ;;  %v1085_v39 = vld [vmem:[#allocation2 + $0x16a] sm:$0xff] }
  0x52   : > { %4893 = vmatprep.subr.bf16.mxu1 %v5246_v1  ;;  %v1083_v22 = vld [vmem:[#allocation2 + $0x152] sm:$0xff] }
  0x53   : > { %4862 = vmatmul.mubr.bf16.vlgmr.msra.gmra.mxu0 %v5549_v10  ;;  %v716_v38 = vld [vmem:[#allocation2 + $0x171] sm:$0xff] }
  0x54   : > { %4814 = vmatmul.mubr.bf16.vlgmr.msra.gmra.mxu1 %v5547_v7  ;;  %4942 = vmatpush3.bf16.msra.mxu0 %v5247_v2  ;;  %v1071_v2 = vld [vmem:[#allocation2 + $0xc2] sm:$0xff] }
  0x55   : > { %4894 = vmatpush3.bf16.msra.mxu1 %v5246_v1  ;;  %4817 = vmatprep.mubr.bf16.mxu1 %v5551_v11  ;;  %v702_v1 = vld [vmem:[#allocation2 + $0xc9] sm:$0xff]  ;;  %v5625_v15 = vpack.c.bf16 %v1072_v3, %v1071_v2 }
  0x56   : > { %4865 = vmatprep.mubr.bf16.mxu0 %v5553_v12  ;;  %4895 = vmatprep.subr.bf16.mxu1 %v5248_v13  ;;  %v5623_v14 = vpack.c.bf16 %v702_v1, %v701_v0 }
  0x57   : > { %4943 = vmatprep.subr.bf16.mxu0 %v5249_v19 }
  0x58   : > { %4944 = vmatpush3.bf16.msra.mxu0 %v5249_v19  ;;  %v703_v19 = vld [vmem:[#allocation2 + $0xd9] sm:$0xff] }
  0x59   : > { %4896 = vmatpush3.bf16.msra.mxu1 %v5248_v13  ;;  %4945 = vmatprep.subr.bf16.mxu0 %v5251_v28  ;;  %v5621_v13 = vpack.c.bf16 %v1070_v62, %v1069_v61  ;;  %v5646_v44 = vpack.c.bf16 %v704_v20, %v703_v19  ;;  %v710_v61 = vld [vmem:[#allocation2 + $0x129] sm:$0xff]  ;;  %v713_v20 = vld [vmem:[#allocation2 + $0x151] sm:$0xff] }
  0x5a   : > { %4897 = vmatprep.subr.bf16.mxu1 %v5250_v27  ;;  %v1079_v62 = vld [vmem:[#allocation2 + $0x122] sm:$0xff]  ;;  %v5662_v2 = vpack.c.bf16 %v710_v61, %v709_v60  ;;  %v5265_v60 = vld [vmem:[%s6325_s1 + $0x1b0] sm:$0xff]  }
  0x5b   : > { %4866 = vmatmul.mubr.bf16.gmra.mxu0 %v5573_v30  ;;  %v1082_v19 = vld [vmem:[#allocation2 + $0x142] sm:$0xff] }
  0x5c   : > { %4818 = vmatmul.mubr.bf16.gmra.mxu1 %v5571_v29  ;;  %4869 = vmatprep.mubr.bf16.mxu0 %v5577_v33 }
  0x5d   : > { %4821 = vmatprep.mubr.bf16.mxu1 %v5575_v32  ;;  %4898 = vmatpush3.bf16.msra.mxu1 %v5250_v27  ;;  %v4517_v27 = vld [vmem:[%s5384_s25 + $0x78] sm:$0xff]  }
  0x5e   : > { %4946 = vmatpush3.bf16.msra.mxu0 %v5251_v28  ;;  %4899 = vmatprep.subr.bf16.mxu1 %v5252_v40  ;;  %v706_v28 = vld [vmem:[#allocation2 + $0xf9] sm:$0xff]  ;;  %v4421_v34 = vunpack.c.l.bf16 %v4517_v27  ;;  %v4422_v35 = vunpack.c.h.bf16 %v4517_v27 }
  0x5f   : > { %4947 = vmatprep.subr.bf16.mxu0 %v5253_v43  ;;  %v5650_v46 = vpack.c.bf16 %v706_v28, %v705_v26  ;;  %v5674_v28 = vpack.c.bf16 %v714_v21, %v713_v20  ;;  %v5285_v21 = vld [vmem:[%s6325_s1 + $0x220] sm:$0xff]  }
  0x60   : > { %378 = vst.msk [vmem:[#allocation2 + $0x181] sm:$0xff] %vm347_vm0, %v4421_v34  ;;  %379 = vst.msk [vmem:[#allocation2 + $0x189] sm:$0xff] %vm347_vm0, %v4422_v35  ;;  %v715_v35 = vld [vmem:[#allocation2 + $0x169] sm:$0xff] }
  0x61   : > { %4900 = vmatpush3.bf16.msra.mxu1 %v5252_v40  ;;  %v5262_v40 = vld [vmem:[%s6325_s1 + $0x178] sm:$0xff]  }
  0x62   : > { %4948 = vmatpush3.bf16.msra.mxu0 %v5253_v43  ;;  %4901 = vmatprep.subr.bf16.mxu1 %v5254_v48  ;;  %v5263_v43 = vld [vmem:[%s6325_s1 + $0x1b8] sm:$0xff]  }
  0x63   : > { %4949 = vmatprep.subr.bf16.mxu0 %v5255_v49  ;;  %4870 = vmatmul.mubr.bf16.gmra.mxu0 %v5597_v55 }
  0x64   : > { %4822 = vmatmul.mubr.bf16.gmra.mxu1 %v5595_v54  ;;  %4873 = vmatprep.mubr.bf16.mxu0 %v5601_v57 }
  0x65   : > { %4825 = vmatprep.mubr.bf16.mxu1 %v5599_v56  ;;  %4902 = vmatpush3.bf16.msra.mxu1 %v5254_v48  ;;  %v707_v48 = vld [vmem:[#allocation2 + $0x109] sm:$0xff] }
  0x66   : > { %4950 = vmatpush3.bf16.msra.mxu0 %v5255_v49  ;;  %4903 = vmatprep.subr.bf16.mxu1 %v5256_v58  ;;  %v708_v49 = vld [vmem:[#allocation2 + $0x111] sm:$0xff] }
  0x67   : > { %4951 = vmatprep.subr.bf16.mxu0 %v5257_v63  ;;  %v5658_v0 = vpack.c.bf16 %v708_v49, %v707_v48  ;;  %v1086_v48 = vld [vmem:[#allocation2 + $0x172] sm:$0xff]  ;;  %v5682_v49 = vpack.c.bf16 %v716_v38, %v715_v35 }
  0x68   : > { %v5286_v35 = vld [vmem:[%s6325_s1 + $0x1d8] sm:$0xff]  }
  0x69   : > { %4904 = vmatpush3.bf16.msra.mxu1 %v5256_v58  ;;  %v1077_v58 = vld [vmem:[#allocation2 + $0x10a] sm:$0xff] }
  0x6a   : > { %4952 = vmatpush3.bf16.msra.mxu0 %v5257_v63  ;;  %4905 = vmatprep.subr.bf16.mxu1 %v5258_v4  ;;  %v1080_v63 = vld [vmem:[#allocation2 + $0x12a] sm:$0xff]  ;;  %v5660_v1 = vpack.c.bf16 %v1078_v59, %v1077_v58  ;;  %v5684_v58 = vpack.c.bf16 %v1086_v48, %v1085_v39 }
  0x6b   : > { %4953 = vmatprep.subr.bf16.mxu0 %v5259_v5  ;;  %4874 = vmatmul.mubr.bf16.gmra.mxu0 %v5621_v13  ;;  %v5664_v3 = vpack.c.bf16 %v1080_v63, %v1079_v62  ;;  %v5264_v59 = vld [vmem:[%s6325_s1 + $0x170] sm:$0xff]  }
  0x6c   : > { %4826 = vmatmul.mubr.bf16.gmra.mxu1 %v5619_v6  ;;  %4877 = vmatprep.mubr.bf16.mxu0 %v5625_v15  ;;  %v5280_v63 = vld [vmem:[%s6325_s1 + $0x1f0] sm:$0xff]  }
  0x6d   : > { %4829 = vmatprep.mubr.bf16.mxu1 %v5623_v14  ;;  %4906 = vmatpush3.bf16.msra.mxu1 %v5258_v4  ;;  %v711_v4 = vld [vmem:[#allocation2 + $0x139] sm:$0xff]  ;;  %v5289_v48 = vld [vmem:[%s6325_s1 + $0x210] sm:$0xff]  }
  0x6e   : > { %4954 = vmatpush3.bf16.msra.mxu0 %v5259_v5  ;;  %4907 = vmatprep.subr.bf16.mxu1 %v5260_v16  ;;  %v712_v5 = vld [vmem:[#allocation2 + $0x141] sm:$0xff] }
  0x6f   : > { %4955 = vmatprep.subr.bf16.mxu0 %v5261_v23  ;;  %v5670_v26 = vpack.c.bf16 %v712_v5, %v711_v4  ;;  %v2544_v4 = vld [vmem:[#allocation2 + $0x90] sm:$0xff]  ;;  %v2545_v5 = vld [vmem:[#allocation2 + $0x98] sm:$0xff] }
  0x70   : > { %v2572_v20 = vpack.c.bf16 %v2545_v5, %v2544_v4 }
  0x71   : > { %4908 = vmatpush3.bf16.msra.mxu1 %v5260_v16  ;;  %v1081_v16 = vld [vmem:[#allocation2 + $0x13a] sm:$0xff] }
  0x72   : > { %4956 = vmatpush3.bf16.msra.mxu0 %v5261_v23  ;;  %4989 = vmatprep.subr.bf16.mxu1 %v5262_v40  ;;  %v1084_v23 = vld [vmem:[#allocation2 + $0x15a] sm:$0xff]  ;;  %v5672_v27 = vpack.c.bf16 %v1082_v19, %v1081_v16  ;;  %v5282_v16 = vld [vmem:[%s6325_s1 + $0x1e8] sm:$0xff]  }
  0x73   : > { %5037 = vmatprep.subr.bf16.mxu0 %v5263_v43  ;;  %4878 = vmatmul.mubr.bf16.gmra.mxu0 %v5648_v45  ;;  %v5676_v34 = vpack.c.bf16 %v1084_v23, %v1083_v22  ;;  %v5283_v19 = vld [vmem:[%s6325_s1 + $0x228] sm:$0xff]   ;;  %v2547_v23 = vld [vmem:[#allocation2 + $0xb0] sm:$0xff] }
  0x74   : > { %4830 = vmatmul.mubr.bf16.gmra.mxu1 %v5646_v44  ;;  %4881 = vmatprep.mubr.bf16.mxu0 %v5652_v47  ;;  %v2546_v22 = vld [vmem:[#allocation2 + $0xa8] sm:$0xff] }
  0x75   : > { %4833 = vmatprep.mubr.bf16.mxu1 %v5650_v46  ;;  %v2573_v38 = vpack.c.bf16 %v2547_v23, %v2546_v22  ;;  %v3277_v22 = vld [vmem:[#allocation2 + $0x3a] sm:$0xff] }
  0x7b   : > { %4882 = vmatmul.mubr.bf16.gmra.mxu0 %v5660_v1 }
  0x7c   : > { %4834 = vmatmul.mubr.bf16.gmra.mxu1 %v5658_v0  ;;  %4885 = vmatprep.mubr.bf16.mxu0 %v5664_v3 }
  0x7d   : > { %4837 = vmatprep.mubr.bf16.mxu1 %v5662_v2 }
  0x83   : > { %4886 = vmatmul.mubr.bf16.gmra.mxu0 %v5672_v27 }
  0x84   : > { %4838 = vmatmul.mubr.bf16.gmra.mxu1 %v5670_v26  ;;  %4889 = vmatprep.mubr.bf16.mxu0 %v5676_v34 }
  0x85   : > { %4841 = vmatprep.mubr.bf16.mxu1 %v5674_v28 }
  0x8b   : > { %4890 = vmatmul.mubr.bf16.gmra.mxu0 %v5684_v58 }
  0x8c   : > { %4842 = vmatmul.mubr.bf16.gmra.mxu1 %v5682_v49  ;;  %4957 = vmatprep.mubr.bf16.mxu0 %v5547_v7  ;;  %v5267_v7 = vld [vmem:[%s6325_s1 + $0x1a8] sm:$0xff]  }
  0x8d   : > { %4909 = vmatprep.mubr.bf16.mxu1 %v5445_v52  ;;  %v5266_v52 = vld [vmem:[%s6325_s1 + $0x168] sm:$0xff]  }
  0x93   : > { %4958 = vmatmul.mubr.bf16.vlgmr.msra.gmra.mxu0 %v5551_v11  ;;  %v5270_v11 = vld [vmem:[%s6325_s1 + $0x158] sm:$0xff]  }
  0x94   : > { %4910 = vmatmul.mubr.bf16.vlgmr.msra.gmra.mxu1 %v5467_v8  ;;  %5038 = vmatpush3.bf16.msra.mxu0 %v5263_v43  ;;  %v5268_v8 = vld [vmem:[%s6325_s1 + $0x160] sm:$0xff]  }
  0x95   : > { %4990 = vmatpush3.bf16.msra.mxu1 %v5262_v40  ;;  %4913 = vmatprep.mubr.bf16.mxu1 %v5481_v17  ;;  %v5269_v17 = vld [vmem:[%s6325_s1 + $0x1a0] sm:$0xff]  }
  0x96   : > { %4961 = vmatprep.mubr.bf16.mxu0 %v5571_v29  ;;  %4991 = vmatprep.subr.bf16.mxu1 %v5264_v59  ;;  %v5271_v29 = vld [vmem:[%s6325_s1 + $0x198] sm:$0xff]  }
  0x97   : > { %5039 = vmatprep.subr.bf16.mxu0 %v5265_v60 }
  0x98   : > { %5040 = vmatpush3.bf16.msra.mxu0 %v5265_v60  ;;  %v2552_v60 = vld [vmem:[#allocation2 + $0xf0] sm:$0xff] }
  0x99   : > { %4992 = vmatpush3.bf16.msra.mxu1 %v5264_v59  ;;  %5041 = vmatprep.subr.bf16.mxu0 %v5267_v7  ;;  %v2551_v59 = vld [vmem:[#allocation2 + $0xe0] sm:$0xff] }
  0x9a   : > { %4993 = vmatprep.subr.bf16.mxu1 %v5266_v52 }
  0x9b   : > { %4962 = vmatmul.mubr.bf16.gmra.mxu0 %v5575_v32  ;;  %v5274_v32 = vld [vmem:[%s6325_s1 + $0x148] sm:$0xff]  }
  0x9c   : > { %4914 = vmatmul.mubr.bf16.gmra.mxu1 %v5491_v24  ;;  %4965 = vmatprep.mubr.bf16.mxu0 %v5595_v54  ;;  %v5272_v24 = vld [vmem:[%s6325_s1 + $0x150] sm:$0xff]   ;;  %v5275_v54 = vld [vmem:[%s6325_s1 + $0x188] sm:$0xff]  }
  0x9d   : > { %4917 = vmatprep.mubr.bf16.mxu1 %v5505_v36  ;;  %4994 = vmatpush3.bf16.msra.mxu1 %v5266_v52  ;;  %v5273_v36 = vld [vmem:[%s6325_s1 + $0x190] sm:$0xff]   ;;  %v2553_v52 = vld [vmem:[#allocation2 + $0xf8] sm:$0xff] }
  0x9e   : > { %5042 = vmatpush3.bf16.msra.mxu0 %v5267_v7  ;;  %4995 = vmatprep.subr.bf16.mxu1 %v5268_v8  ;;  %v5290_v7 = vld [vmem:[%s6325_s1 + $0x1c8] sm:$0xff]  }
  0x9f   : > { %5043 = vmatprep.subr.bf16.mxu0 %v5269_v17 }
  0xa1   : > { %4996 = vmatpush3.bf16.msra.mxu1 %v5268_v8 }
  0xa2   : > { %5044 = vmatpush3.bf16.msra.mxu0 %v5269_v17  ;;  %4997 = vmatprep.subr.bf16.mxu1 %v5270_v11  ;;  %v2576_v17 = vpack.c.bf16 %v2553_v52, %v2552_v60  ;;  %v3279_v60 = vld [vmem:[#allocation2 + $0x52] sm:$0xff]  ;;  %v2910_v52 = vld [vmem:[#allocation2 + $0x61] sm:$0xff] }
  0xa3   : > { %5045 = vmatprep.subr.bf16.mxu0 %v5271_v29  ;;  %4966 = vmatmul.mubr.bf16.gmra.mxu0 %v5599_v56  ;;  %v5278_v56 = vld [vmem:[%s6325_s1 + $0x1f8] sm:$0xff]  }
  0xa4   : > { %4918 = vmatmul.mubr.bf16.gmra.mxu1 %v5515_v41  ;;  %4969 = vmatprep.mubr.bf16.mxu0 %v5619_v6  ;;  %v5276_v41 = vld [vmem:[%s6325_s1 + $0x140] sm:$0xff]   ;;  %v5279_v6 = vld [vmem:[%s6325_s1 + $0x238] sm:$0xff]  }
  0xa5   : > { %4921 = vmatprep.mubr.bf16.mxu1 %v5529_v50  ;;  %4998 = vmatpush3.bf16.msra.mxu1 %v5270_v11  ;;  %v5277_v50 = vld [vmem:[%s6325_s1 + $0x180] sm:$0xff]  }
  0xa6   : > { %5046 = vmatpush3.bf16.msra.mxu0 %v5271_v29  ;;  %4999 = vmatprep.subr.bf16.mxu1 %v5272_v24  ;;  %v5293_v11 = vld [vmem:[%s6325_s1 + $0x200] sm:$0xff]   ;;  %v2554_v29 = vld [vmem:[#allocation2 + $0x108] sm:$0xff] }
  0xa7   : > { %5047 = vmatprep.subr.bf16.mxu0 %v5273_v36 }
  0xa9   : > { %5000 = vmatpush3.bf16.msra.mxu1 %v5272_v24  ;;  %v2555_v24 = vld [vmem:[#allocation2 + $0x110] sm:$0xff] }
  0xaa   : > { %5048 = vmatpush3.bf16.msra.mxu0 %v5273_v36  ;;  %5001 = vmatprep.subr.bf16.mxu1 %v5274_v32  ;;  %v2556_v36 = vld [vmem:[#allocation2 + $0x120] sm:$0xff] }
  0xab   : > { %5049 = vmatprep.subr.bf16.mxu0 %v5275_v54  ;;  %4970 = vmatmul.mubr.bf16.gmra.mxu0 %v5623_v14  ;;  %v2536_v14 = vld [vmem:[#allocation2 + $0x30] sm:$0xff] }
  0xac   : > { %4922 = vmatmul.mubr.bf16.gmra.mxu1 %v5418_v31  ;;  %4973 = vmatprep.mubr.bf16.mxu0 %v5646_v44  ;;  %v1455_v31 = vld [vmem:[#allocation2 + $0x180] sm:$0xff] }
  0xad   : > { %4925 = vmatprep.mubr.bf16.mxu1 %v5447_v53  ;;  %5002 = vmatpush3.bf16.msra.mxu1 %v5274_v32  ;;  %v1456_v53 = vld [vmem:[#allocation2 + $0x188] sm:$0xff]  ;;  %v2540_v44 = vld [vmem:[#allocation2 + $0x60] sm:$0xff] }
  0xae   : > { %5050 = vmatpush3.bf16.msra.mxu0 %v5275_v54  ;;  %5003 = vmatprep.subr.bf16.mxu1 %v5276_v41  ;;  %v5766_v40 = vpack.c.bf16 %v1456_v53, %v1455_v31  ;;  %v2557_v32 = vld [vmem:[#allocation2 + $0x128] sm:$0xff]  ;;  %v2577_v54 = vpack.c.bf16 %v2555_v24, %v2554_v29  ;;  %v2560_v53 = vld [vmem:[#allocation2 + $0x150] sm:$0xff] }
  0xaf   : > { %5051 = vmatprep.subr.bf16.mxu0 %v5277_v50 }
  0xb1   : > { %5004 = vmatpush3.bf16.msra.mxu1 %v5276_v41  ;;  %v2578_v41 = vpack.c.bf16 %v2557_v32, %v2556_v36 }
  0xb2   : > { %5052 = vmatpush3.bf16.msra.mxu0 %v5277_v50  ;;  %5085 = vmatprep.subr.bf16.mxu1 %v5278_v56 }
  0xb3   : > { %5133 = vmatprep.subr.bf16.mxu0 %v5279_v6  ;;  %4974 = vmatmul.mubr.bf16.gmra.mxu0 %v5650_v46  ;;  %v2541_v46 = vld [vmem:[#allocation2 + $0x68] sm:$0xff] }
  0xb4   : > { %4926 = vmatmul.mubr.bf16.gmra.mxu1 %v5469_v9  ;;  %4977 = vmatprep.mubr.bf16.mxu0 %v5658_v0  ;;  %v1825_v9 = vld [vmem:[#allocation2 + $0x181] sm:$0xff]  ;;  %v2570_v62 = vpack.c.bf16 %v2541_v46, %v2540_v44  ;;  %v5281_v0 = vld [vmem:[%s6325_s1 + $0x230] sm:$0xff]  }
  0xb5   : > { %4929 = vmatprep.mubr.bf16.mxu1 %v5483_v18  ;;  %v1826_v18 = vld [vmem:[#allocation2 + $0x189] sm:$0xff] }
  0xb6   : > { %v5768_v43 = vpack.c.bf16 %v1826_v18, %v1825_v9  ;;  %v2561_v9 = vld [vmem:[#allocation2 + $0x158] sm:$0xff]  ;;  %v2562_v44 = vld [vmem:[#allocation2 + $0x168] sm:$0xff]  ;;  %v2563_v46 = vld [vmem:[#allocation2 + $0x170] sm:$0xff] }
  0xbb   : > { %4978 = vmatmul.mubr.bf16.gmra.mxu0 %v5662_v2  ;;  %v2543_v2 = vld [vmem:[#allocation2 + $0x80] sm:$0xff] }
  0xbc   : > { %4930 = vmatmul.mubr.bf16.gmra.mxu1 %v5493_v25  ;;  %4981 = vmatprep.mubr.bf16.mxu0 %v5670_v26  ;;  %v2537_v25 = vld [vmem:[#allocation2 + $0x38] sm:$0xff]  ;;  %v2548_v26 = vld [vmem:[#allocation2 + $0xc0] sm:$0xff] }
  0xbd   : > { %4933 = vmatprep.mubr.bf16.mxu1 %v5507_v37  ;;  %v2568_v37 = vpack.c.bf16 %v2537_v25, %v2536_v14 }
  0xc3   : > { %4982 = vmatmul.mubr.bf16.gmra.mxu0 %v5674_v28  ;;  %v2549_v28 = vld [vmem:[#allocation2 + $0xc8] sm:$0xff] }
  0xc4   : > { %4934 = vmatmul.mubr.bf16.gmra.mxu1 %v5517_v42  ;;  %4985 = vmatprep.mubr.bf16.mxu0 %v5682_v49  ;;  %v2538_v42 = vld [vmem:[#allocation2 + $0x48] sm:$0xff]  ;;  %v2574_v39 = vpack.c.bf16 %v2549_v28, %v2548_v26  ;;  %v2550_v49 = vld [vmem:[#allocation2 + $0xd8] sm:$0xff]  ;;  %v5294_v28 = vld [vmem:[#allocation2] sm:$0xff] }
  0xc5   : > { %4937 = vmatprep.mubr.bf16.mxu1 %v5531_v51  ;;  %v2539_v51 = vld [vmem:[#allocation2 + $0x50] sm:$0xff]  ;;  %v2575_v8 = vpack.c.bf16 %v2551_v59, %v2550_v49 }
  0xc6   : > { %v2569_v61 = vpack.c.bf16 %v2539_v51, %v2538_v42  ;;  %v2909_v49 = vld [vmem:[#allocation2 + $0x51] sm:$0xff] }
  0xc7   : > { %v3278_v59 = vld [vmem:[#allocation2 + $0x4a] sm:$0xff] }
  0xc8   : > { %v3309_v36 = vpack.c.bf16 %v3279_v60, %v3278_v59 }
  0xcb   : > { %4986 = vmatmul.mubr.bf16.gmra.mxu0 %v5768_v43 }
  0xcc   : > { %4938 = vmatmul.mubr.bf16.gmra.mxu1 %v5766_v40  ;;  %5053 = vmatprep.mubr.bf16.mxu0 %v2568_v37  ;;  %v2580_v37 = vpack.c.bf16 %v2561_v9, %v2560_v53  ;;  %v2912_v9 = vld [vmem:[#allocation2 + $0x79] sm:$0xff] }
  0xcd   : > { %5005 = vmatprep.mubr.bf16.mxu1 %v5549_v10  ;;  %v2542_v10 = vld [vmem:[#allocation2 + $0x78] sm:$0xff] }
  0xd3   : > { %5054 = vmatmul.mubr.bf16.vlgmr.msra.gmra.mxu0 %v2569_v61 }
  0xd4   : > { %5006 = vmatmul.mubr.bf16.vlgmr.msra.gmra.mxu1 %v5553_v12  ;;  %5134 = vmatpush3.bf16.msra.mxu0 %v5279_v6  ;;  %v2571_v12 = vpack.c.bf16 %v2543_v2, %v2542_v10  ;;  %v2581_v10 = vpack.c.bf16 %v2563_v46, %v2562_v44  ;;  %v3282_v44 = vld [vmem:[#allocation2 + $0x7a] sm:$0xff]  ;;  %v3283_v46 = vld [vmem:[#allocation2 + $0x82] sm:$0xff] }
  0xd5   : > { %5086 = vmatpush3.bf16.msra.mxu1 %v5278_v56  ;;  %5009 = vmatprep.mubr.bf16.mxu1 %v5573_v30  ;;  %v5284_v30 = vld [vmem:[%s6325_s1 + $0x1e0] sm:$0xff]  }
  0xd6   : > { %5057 = vmatprep.mubr.bf16.mxu0 %v2570_v62  ;;  %5087 = vmatprep.subr.bf16.mxu1 %v5280_v63 }
  0xd7   : > { %5135 = vmatprep.subr.bf16.mxu0 %v5281_v0 }
  0xd8   : > { %5136 = vmatpush3.bf16.msra.mxu0 %v5281_v0 }
  0xd9   : > { %5088 = vmatpush3.bf16.msra.mxu1 %v5280_v63  ;;  %5137 = vmatprep.subr.bf16.mxu0 %v5283_v19 }
  0xda   : > { %5089 = vmatprep.subr.bf16.mxu1 %v5282_v16 }
  0xdb   : > { %5058 = vmatmul.mubr.bf16.gmra.mxu0 %v2571_v12 }
  0xdc   : > { %5010 = vmatmul.mubr.bf16.gmra.mxu1 %v5577_v33  ;;  %5061 = vmatprep.mubr.bf16.mxu0 %v2572_v20  ;;  %v5287_v33 = vld [vmem:[%s6325_s1 + $0x218] sm:$0xff]  }
  0xdd   : > { %5013 = vmatprep.mubr.bf16.mxu1 %v5597_v55  ;;  %5090 = vmatpush3.bf16.msra.mxu1 %v5282_v16  ;;  %v5288_v55 = vld [vmem:[%s6325_s1 + $0x1d0] sm:$0xff]  }
  0xde   : > { %5138 = vmatpush3.bf16.msra.mxu0 %v5283_v19  ;;  %5091 = vmatprep.subr.bf16.mxu1 %v5284_v30  ;;  %v2196_v16 = vld [vmem:[#allocation2 + $0x18a] sm:$0xff] }
  0xdf   : > { %5139 = vmatprep.subr.bf16.mxu0 %v5285_v21  ;;  %v2906_v19 = vld [vmem:[#allocation2 + $0x31] sm:$0xff] }
  0xe1   : > { %5092 = vmatpush3.bf16.msra.mxu1 %v5284_v30  ;;  %v2907_v30 = vld [vmem:[#allocation2 + $0x39] sm:$0xff] }
  0xe2   : > { %5140 = vmatpush3.bf16.msra.mxu0 %v5285_v21  ;;  %5093 = vmatprep.subr.bf16.mxu1 %v5286_v35  ;;  %v3276_v21 = vld [vmem:[#allocation2 + $0x32] sm:$0xff] }
  0xe3   : > { %5141 = vmatprep.subr.bf16.mxu0 %v5287_v33  ;;  %5062 = vmatmul.mubr.bf16.gmra.mxu0 %v2573_v38 }
  0xe4   : > { %5014 = vmatmul.mubr.bf16.gmra.mxu1 %v5601_v57  ;;  %5065 = vmatprep.mubr.bf16.mxu0 %v2574_v39  ;;  %v5291_v57 = vld [vmem:[%s6325_s1 + $0x208] sm:$0xff]  }
  0xe5   : > { %5017 = vmatprep.mubr.bf16.mxu1 %v5621_v13  ;;  %5094 = vmatpush3.bf16.msra.mxu1 %v5286_v35  ;;  %v5292_v13 = vld [vmem:[%s6325_s1 + $0x1c0] sm:$0xff]   ;;  %v2938_v35 = vpack.c.bf16 %v2907_v30, %v2906_v19  ;;  %v3284_v30 = vld [vmem:[#allocation2 + $0x92] sm:$0xff] }
  0xe6   : > { %5142 = vmatpush3.bf16.msra.mxu0 %v5287_v33  ;;  %5095 = vmatprep.subr.bf16.mxu1 %v5288_v55  ;;  %v2915_v19 = vld [vmem:[#allocation2 + $0x99] sm:$0xff] }
  0xe7   : > { %5143 = vmatprep.subr.bf16.mxu0 %v5289_v48 }
  0xe9   : > { %5096 = vmatpush3.bf16.msra.mxu1 %v5288_v55 }
  0xea   : > { %5144 = vmatpush3.bf16.msra.mxu0 %v5289_v48  ;;  %5097 = vmatprep.subr.bf16.mxu1 %v5290_v7  ;;  %v2908_v48 = vld [vmem:[#allocation2 + $0x49] sm:$0xff] }
  0xeb   : > { %5145 = vmatprep.subr.bf16.mxu0 %v5291_v57  ;;  %5066 = vmatmul.mubr.bf16.gmra.mxu0 %v2575_v8  ;;  %v2911_v8 = vld [vmem:[#allocation2 + $0x69] sm:$0xff]  ;;  %v2939_v24 = vpack.c.bf16 %v2909_v49, %v2908_v48  ;;  %v3311_v48 = vpack.c.bf16 %v3283_v46, %v3282_v44 }
  0xec   : > { %5018 = vmatmul.mubr.bf16.gmra.mxu1 %v5625_v15  ;;  %5069 = vmatprep.mubr.bf16.mxu0 %v2576_v17  ;;  %v2558_v15 = vld [vmem:[#allocation2 + $0x138] sm:$0xff]  ;;  %v3280_v17 = vld [vmem:[#allocation2 + $0x62] sm:$0xff]  ;;  %v2940_v32 = vpack.c.bf16 %v2911_v8, %v2910_v52 }
  0xed   : > { %5021 = vmatprep.mubr.bf16.mxu1 %v5648_v45  ;;  %5098 = vmatpush3.bf16.msra.mxu1 %v5290_v7  ;;  %v2559_v45 = vld [vmem:[#allocation2 + $0x140] sm:$0xff]  ;;  %v2919_v44 = vld [vmem:[#allocation2 + $0xc9] sm:$0xff] }
  0xee   : > { %5146 = vmatpush3.bf16.msra.mxu0 %v5291_v57  ;;  %5099 = vmatprep.subr.bf16.mxu1 %v5292_v13  ;;  %v2579_v25 = vpack.c.bf16 %v2559_v45, %v2558_v15  ;;  %v3288_v46 = vld [vmem:[#allocation2 + $0xc2] sm:$0xff] }
  0xef   : > { %5147 = vmatprep.subr.bf16.mxu0 %v5293_v11 }
  0xf1   : > { %5100 = vmatpush3.bf16.msra.mxu1 %v5292_v13  ;;  %v3281_v13 = vld [vmem:[#allocation2 + $0x6a] sm:$0xff] }
  0xf2   : > { %5148 = vmatpush3.bf16.msra.mxu0 %v5293_v11 }
  0xf3   : > { %v5823_v50 = vpop.f32.mrf.mxu0  ;;  %5070 = vmatmul.mubr.bf16.gmra.mxu0 %v2577_v54  ;;  %v3310_v54 = vpack.c.bf16 %v3281_v13, %v3280_v17 }
  0xf4   : > { %v5825_v56 = vpop.f32.mrf.mxu1  ;;  %5022 = vmatmul.mubr.bf16.gmra.mxu1 %v5652_v47  ;;  %5073 = vmatprep.mubr.bf16.mxu0 %v2578_v41 }
  0xf5   : > { %5025 = vmatprep.mubr.bf16.mxu1 %v5660_v1  ;;  %v5829_v6 = vpop.f32.mrf.mxu0 }
  0xf6   : > { %v5831_v31 = vpop.f32.mrf.mxu1 }
  0xf7   : > { %v5833_v18 = vpop.f32.mrf.mxu0 }
  0xf8   : > { %v5835_v14 = vpop.f32.mrf.mxu1 }
  0xf9   : > { %v5837_v42 = vpop.f32.mrf.mxu0 }
  0xfa   : > { %v5839_v47 = vpop.f32.mrf.mxu1 }
  0xfb   : > { %v5841_v1 = vpop.f32.mrf.mxu0  ;;  %5074 = vmatmul.mubr.bf16.gmra.mxu0 %v2579_v25  ;;  %v2913_v25 = vld [vmem:[#allocation2 + $0x81] sm:$0xff] }
  0xfc   : > { %v5843_v51 = vpop.f32.mrf.mxu1  ;;  %5026 = vmatmul.mubr.bf16.gmra.mxu1 %v5664_v3  ;;  %5077 = vmatprep.mubr.bf16.mxu0 %v2580_v37 }
  0xfd   : > { %5029 = vmatprep.mubr.bf16.mxu1 %v5672_v27  ;;  %v5847_v61 = vpop.f32.mrf.mxu0  ;;  %v2195_v27 = vld [vmem:[#allocation2 + $0x182] sm:$0xff] }
  0xfe   : > { %v5849_v62 = vpop.f32.mrf.mxu1 }
  0xff   : > { %v5851_v63 = vpop.f32.mrf.mxu0 }
 0x100   : > { %v5853_v0 = vpop.f32.mrf.mxu1 }
 0x101   : > { %v5855_v2 = vpop.f32.mrf.mxu0 }
 0x102   : > { %v5857_v4 = vpop.f32.mrf.mxu1 }
 0x103   : > { %v5859_v3 = vpop.f32.mrf.mxu0  ;;  %5078 = vmatmul.mubr.bf16.gmra.mxu0 %v2581_v10  ;;  %v2914_v10 = vld [vmem:[#allocation2 + $0x91] sm:$0xff] }
 0x104   : > { %v5861_v5 = vpop.f32.mrf.mxu1  ;;  %5030 = vmatmul.mubr.bf16.gmra.mxu1 %v5676_v34  ;;  %5081 = vmatprep.mubr.bf16.mxu0 %v5766_v40  ;;  %v5874_v34 = vpack.c.bf16 %v2196_v16, %v2195_v27  ;;  %v3308_v40 = vpack.c.bf16 %v3277_v22, %v3276_v21  ;;  %v3285_v21 = vld [vmem:[#allocation2 + $0x9a] sm:$0xff]  ;;  %v2942_v59 = vpack.c.bf16 %v2915_v19, %v2914_v10 }
 0x105   : > { %5033 = vmatprep.mubr.bf16.mxu1 %v5684_v58  ;;  %v5866_v12 = vpop.f32.mrf.mxu0  ;;  %v2583_v58 = vpack.c.bf16 %v5294_v28, %v5294_v28  ;;  %v3312_v60 = vpack.c.bf16 %v3285_v21, %v3284_v30 }
 0x106   : > { %v5868_v20 = vpop.f32.mrf.mxu1 }
 0x107   : > { %v5870_v23 = vpop.f32.mrf.mxu0 }
 0x108   : > { %v5872_v26 = vpop.f32.mrf.mxu1 }
 0x109   : > { %v5876_v33 = vpop.f32.mrf.mxu0 }
 0x10a   : > { %v5878_v38 = vpop.f32.mrf.mxu1 }
 0x10b   : > { %v5880_v39 = vpop.f32.mrf.mxu0  ;;  %5082 = vmatmul.mubr.bf16.gmra.mxu0 %v2583_v58 }
 0x10c   : > { %v5882_v55 = vpop.f32.mrf.mxu1  ;;  %5034 = vmatmul.mubr.bf16.gmra.mxu1 %v5874_v34  ;;  %5149 = vmatprep.mubr.bf16.mxu0 %v3308_v40  ;;  %v2941_v40 = vpack.c.bf16 %v2913_v25, %v2912_v9  ;;  %v2918_v9 = vld [vmem:[#allocation2 + $0xc1] sm:$0xff] }
 0x10d   : > { %5101 = vmatprep.mubr.bf16.mxu1 %v2938_v35  ;;  %v5885_v7 = vpop.f32.mrf.mxu0 }
 0x10e   : > { %v5887_v57 = vpop.f32.mrf.mxu1 }
 0x10f   : > { %v5889_v11 = vpop.f32.mrf.mxu0 }
 0x110   : > { %v5891_v29 = vpop.f32.mrf.mxu1 }
 0x111   : > { %v5893_v41 = vpop.f32.mrf.mxu0 }
 0x112   : > { %v5895_v15 = vpop.f32.mrf.mxu1 }
 0x113   : > { %v4863_v53 = vpop.f32.mrf.mxu0  ;;  %5150 = vmatmul.mubr.bf16.vlgmr.msra.gmra.mxu0 %v3309_v36 }
 0x114   : > { %v4815_v45 = vpop.f32.mrf.mxu1  ;;  %5102 = vmatmul.mubr.bf16.vlgmr.msra.gmra.mxu1 %v2939_v24  ;;  %5153 = vmatprep.mubr.bf16.mxu0 %v3310_v54 }
 0x115   : > { %v993_v37 = vadd.f32 %v4815_v45, %v5823_v50  ;;  %5105 = vmatprep.mubr.bf16.mxu1 %v2940_v32  ;;  %v1202_v16 = vpop.f32.mrf.mxu0  ;;  %v2917_v32 = vld [vmem:[#allocation2 + $0xb1] sm:$0xff] }
 0x116   : > { %v832_v27 = vpop.f32.mrf.mxu1 }
 0x117   : > { %v5898_v22 = vadd.f32 %v4863_v53, %v993_v37  ;;  %v991_v28 = vadd.f32 %v832_v27, %v5829_v6  ;;  %v4864_v35 = vpop.f32.mrf.mxu0  ;;  %v2916_v6 = vld [vmem:[#allocation2 + $0xa9] sm:$0xff]  ;;  %v3287_v53 = vld [vmem:[#allocation2 + $0xb2] sm:$0xff] }
 0x118   : > { %v4816_v58 = vpop.f32.mrf.mxu1  ;;  %v2943_v30 = vpack.c.bf16 %v2917_v32, %v2916_v6  ;;  %v2922_v6 = vld [vmem:[#allocation2 + $0xf1] sm:$0xff] }
 0x119   : > { %v5901_v49 = vadd.f32 %v1202_v16, %v991_v28  ;;  %v994_v50 = vadd.f32 %v4816_v58, %v5833_v18  ;;  %v1205_v8 = vpop.f32.mrf.mxu0  ;;  %v3286_v18 = vld [vmem:[#allocation2 + $0xaa] sm:$0xff]  ;;  %v2944_v58 = vpack.c.bf16 %v2919_v44, %v2918_v9 }
 0x11a   : > { %v835_v52 = vpop.f32.mrf.mxu1  ;;  %v3313_v21 = vpack.c.bf16 %v3287_v53, %v3286_v18  ;;  %v2923_v18 = vld [vmem:[#allocation2 + $0xf9] sm:$0xff] }
 0x11b   : > { %v5904_v17 = vadd.f32 %v4864_v35, %v994_v50  ;;  %v992_v13 = vadd.f32 %v835_v52, %v5837_v42  ;;  %v4867_v36 = vpop.f32.mrf.mxu0  ;;  %5154 = vmatmul.mubr.bf16.gmra.mxu0 %v3311_v48  ;;  %v3289_v42 = vld [vmem:[#allocation2 + $0xca] sm:$0xff]  ;;  %v3292_v53 = vld [vmem:[#allocation2 + $0xf2] sm:$0xff] }
 0x11c   : > { %v4819_v24 = vpop.f32.mrf.mxu1  ;;  %5106 = vmatmul.mubr.bf16.gmra.mxu1 %v2941_v40  ;;  %5157 = vmatprep.mubr.bf16.mxu0 %v3312_v60  ;;  %v3314_v35 = vpack.c.bf16 %v3289_v42, %v3288_v46 }
 0x11d   : > { %v5907_v54 = vadd.f32 %v1205_v8, %v992_v13  ;;  %v997_v45 = vadd.f32 %v4819_v24, %v5841_v1  ;;  %5109 = vmatprep.mubr.bf16.mxu1 %v2942_v59  ;;  %v1218_v37 = vpop.f32.mrf.mxu0  ;;  %v2921_v8 = vld [vmem:[#allocation2 + $0xe1] sm:$0xff] }
 0x11e   : > { %v848_v25 = vpop.f32.mrf.mxu1 }
 0x11f   : > { %v5910_v10 = vadd.f32 %v4867_v36, %v997_v45  ;;  %v995_v27 = vadd.f32 %v848_v25, %v5847_v61  ;;  %v4868_v19 = vpop.f32.mrf.mxu0  ;;  %v2920_v61 = vld [vmem:[#allocation2 + $0xd9] sm:$0xff]  ;;  %v3291_v36 = vld [vmem:[#allocation2 + $0xe2] sm:$0xff] }
 0x120   : > { %v4820_v16 = vpop.f32.mrf.mxu1  ;;  %v2945_v46 = vpack.c.bf16 %v2921_v8, %v2920_v61  ;;  %v2926_v61 = vld [vmem:[#allocation2 + $0x121] sm:$0xff] }
 0x121   : > { %v5913_v28 = vadd.f32 %v1218_v37, %v995_v27  ;;  %v998_v1 = vadd.f32 %v4820_v16, %v5851_v63  ;;  %v1221_v48 = vpop.f32.mrf.mxu0  ;;  %v3290_v63 = vld [vmem:[#allocation2 + $0xda] sm:$0xff]  ;;  %v2946_v16 = vpack.c.bf16 %v2923_v18, %v2922_v6 }
 0x122   : > { %v851_v40 = vpop.f32.mrf.mxu1  ;;  %v3315_v42 = vpack.c.bf16 %v3291_v36, %v3290_v63  ;;  %v2927_v63 = vld [vmem:[#allocation2 + $0x129] sm:$0xff] }
 0x123   : > { %v5916_v50 = vadd.f32 %v4868_v19, %v998_v1  ;;  %v996_v59 = vadd.f32 %v851_v40, %v5855_v2  ;;  %v4871_v52 = vpop.f32.mrf.mxu0  ;;  %5158 = vmatmul.mubr.bf16.gmra.mxu0 %v3313_v21  ;;  %v3293_v2 = vld [vmem:[#allocation2 + $0xfa] sm:$0xff]  ;;  %v3296_v36 = vld [vmem:[#allocation2 + $0x122] sm:$0xff] }
 0x124   : > { %v4823_v60 = vpop.f32.mrf.mxu1  ;;  %5110 = vmatmul.mubr.bf16.gmra.mxu1 %v2943_v30  ;;  %5161 = vmatprep.mubr.bf16.mxu0 %v3314_v35  ;;  %v3316_v19 = vpack.c.bf16 %v3293_v2, %v3292_v53 }
 0x125   : > { %v5919_v13 = vadd.f32 %v1221_v48, %v996_v59  ;;  %v1001_v24 = vadd.f32 %v4823_v60, %v5859_v3  ;;  %5113 = vmatprep.mubr.bf16.mxu1 %v2944_v58  ;;  %v1234_v45 = vpop.f32.mrf.mxu0  ;;  %v2925_v48 = vld [vmem:[#allocation2 + $0x111] sm:$0xff] }
 0x126   : > { %v864_v32 = vpop.f32.mrf.mxu1 }
 0x127   : > { %v5922_v9 = vadd.f32 %v4871_v52, %v1001_v24  ;;  %v999_v25 = vadd.f32 %v864_v32, %v5866_v12  ;;  %v4872_v44 = vpop.f32.mrf.mxu0  ;;  %v2924_v12 = vld [vmem:[#allocation2 + $0x109] sm:$0xff]  ;;  %v3295_v52 = vld [vmem:[#allocation2 + $0x112] sm:$0xff] }
 0x128   : > { %v4824_v37 = vpop.f32.mrf.mxu1  ;;  %v2947_v53 = vpack.c.bf16 %v2925_v48, %v2924_v12  ;;  %v2930_v12 = vld [vmem:[#allocation2 + $0x151] sm:$0xff] }
 0x129   : > { %v5925_v27 = vadd.f32 %v1234_v45, %v999_v25  ;;  %v1002_v3 = vadd.f32 %v4824_v37, %v5870_v23  ;;  %v1237_v21 = vpop.f32.mrf.mxu0  ;;  %v3294_v23 = vld [vmem:[#allocation2 + $0x10a] sm:$0xff]  ;;  %v2948_v37 = vpack.c.bf16 %v2927_v63, %v2926_v61 }
 0x12a   : > { %v867_v30 = vpop.f32.mrf.mxu1  ;;  %v3317_v2 = vpack.c.bf16 %v3295_v52, %v3294_v23  ;;  %v2931_v23 = vld [vmem:[#allocation2 + $0x159] sm:$0xff] }
 0x12b   : > { %v5928_v1 = vadd.f32 %v4872_v44, %v1002_v3  ;;  %v1000_v58 = vadd.f32 %v867_v30, %v5876_v33  ;;  %v4875_v40 = vpop.f32.mrf.mxu0  ;;  %5162 = vmatmul.mubr.bf16.gmra.mxu0 %v3315_v42  ;;  %v3297_v33 = vld [vmem:[#allocation2 + $0x12a] sm:$0xff]  ;;  %v3300_v52 = vld [vmem:[#allocation2 + $0x152] sm:$0xff] }
 0x12c   : > { %v4827_v35 = vpop.f32.mrf.mxu1  ;;  %5114 = vmatmul.mubr.bf16.gmra.mxu1 %v2945_v46  ;;  %5165 = vmatprep.mubr.bf16.mxu0 %v3316_v19  ;;  %v3318_v44 = vpack.c.bf16 %v3297_v33, %v3296_v36 }
 0x12d   : > { %v5931_v59 = vadd.f32 %v1237_v21, %v1000_v58  ;;  %v1005_v60 = vadd.f32 %v4827_v35, %v5880_v39  ;;  %5117 = vmatprep.mubr.bf16.mxu1 %v2946_v16  ;;  %v1250_v24 = vpop.f32.mrf.mxu0  ;;  %v2929_v21 = vld [vmem:[#allocation2 + $0x141] sm:$0xff] }
 0x12e   : > { %v880_v8 = vpop.f32.mrf.mxu1 }
 0x12f   : > { %v5934_v6 = vadd.f32 %v4875_v40, %v1005_v60  ;;  %v1003_v32 = vadd.f32 %v880_v8, %v5885_v7  ;;  %v4876_v18 = vpop.f32.mrf.mxu0  ;;  %v2928_v7 = vld [vmem:[#allocation2 + $0x139] sm:$0xff]  ;;  %v3299_v40 = vld [vmem:[#allocation2 + $0x142] sm:$0xff] }
 0x130   : > { %v4828_v45 = vpop.f32.mrf.mxu1  ;;  %v2949_v36 = vpack.c.bf16 %v2929_v21, %v2928_v7 }
 0x131   : > { %v5937_v25 = vadd.f32 %v1250_v24, %v1003_v32  ;;  %v1006_v39 = vadd.f32 %v4828_v45, %v5889_v11  ;;  %v1253_v42 = vpop.f32.mrf.mxu0  ;;  %v3298_v11 = vld [vmem:[#allocation2 + $0x13a] sm:$0xff]  ;;  %v2950_v45 = vpack.c.bf16 %v2931_v23, %v2930_v12 }
 0x132   : > { %v883_v46 = vpop.f32.mrf.mxu1  ;;  %v3319_v33 = vpack.c.bf16 %v3299_v40, %v3298_v11 }
 0x133   : > { %v5940_v3 = vadd.f32 %v4876_v18, %v1006_v39  ;;  %v1004_v16 = vadd.f32 %v883_v46, %v5893_v41  ;;  %v4879_v30 = vpop.f32.mrf.mxu0  ;;  %5166 = vmatmul.mubr.bf16.gmra.mxu0 %v3317_v2  ;;  %v3301_v41 = vld [vmem:[#allocation2 + $0x15a] sm:$0xff] }
 0x134   : > { %v4831_v19 = vpop.f32.mrf.mxu1  ;;  %5118 = vmatmul.mubr.bf16.gmra.mxu1 %v2947_v53  ;;  %5169 = vmatprep.mubr.bf16.mxu0 %v3318_v44  ;;  %v3320_v18 = vpack.c.bf16 %v3301_v41, %v3300_v52 }
 0x135   : > { %v5943_v58 = vadd.f32 %v1253_v42, %v1004_v16  ;;  %v1009_v35 = vadd.f32 %v4831_v19, %v5825_v56  ;;  %5121 = vmatprep.mubr.bf16.mxu1 %v2948_v37  ;;  %v1266_v60 = vpop.f32.mrf.mxu0  ;;  %v3302_v19 = vld [vmem:[#allocation2 + $0x16a] sm:$0xff] }
 0x136   : > { %v896_v48 = vpop.f32.mrf.mxu1 }
 0x137   : > { %v5946_v61 = vadd.f32 %v4879_v30, %v1009_v35  ;;  %v1007_v8 = vadd.f32 %v896_v48, %v5831_v31  ;;  %v4880_v63 = vpop.f32.mrf.mxu0  ;;  %v2932_v31 = vld [vmem:[#allocation2 + $0x169] sm:$0xff]  ;;  %v3303_v30 = vld [vmem:[#allocation2 + $0x172] sm:$0xff] }
 0x138   : > { %v4832_v24 = vpop.f32.mrf.mxu1  ;;  %v3321_v48 = vpack.c.bf16 %v3303_v30, %v3302_v19 }
 0x139   : > { %v5949_v32 = vadd.f32 %v1266_v60, %v1007_v8  ;;  %v1010_v56 = vadd.f32 %v4832_v24, %v5835_v14  ;;  %v1269_v2 = vpop.f32.mrf.mxu0  ;;  %v2933_v14 = vld [vmem:[#allocation2 + $0x171] sm:$0xff] }
 0x13a   : > { %v899_v53 = vpop.f32.mrf.mxu1  ;;  %v2951_v12 = vpack.c.bf16 %v2933_v14, %v2932_v31 }
 0x13b   : > { %v5952_v39 = vadd.f32 %v4880_v63, %v1010_v56  ;;  %v1008_v37 = vadd.f32 %v899_v53, %v5839_v47  ;;  %v4883_v46 = vpop.f32.mrf.mxu0  ;;  %5170 = vmatmul.mubr.bf16.gmra.mxu0 %v3319_v33  ;;  %v3306_v56 = vld [vmem:[#allocation2 + $0x19a] sm:$0xff] }
 0x13c   : > { %v4835_v44 = vpop.f32.mrf.mxu1  ;;  %5122 = vmatmul.mubr.bf16.gmra.mxu1 %v2949_v36  ;;  %5173 = vmatprep.mubr.bf16.mxu0 %v3320_v18  ;;  %v2936_v36 = vld [vmem:[#allocation2 + $0x199] sm:$0xff] }
 0x13d   : > { %v5955_v42 = vadd.f32 %v1269_v2, %v1008_v37  ;;  %v1013_v16 = vadd.f32 %v4835_v44, %v5843_v51  ;;  %5125 = vmatprep.mubr.bf16.mxu1 %v2950_v45  ;;  %v1282_v21 = vpop.f32.mrf.mxu0  ;;  %v3307_v45 = vld [vmem:[#allocation2 + $0x1a2] sm:$0xff] }
 0x13e   : > { %v912_v7 = vpop.f32.mrf.mxu1  ;;  %v3323_v31 = vpack.c.bf16 %v3307_v45, %v3306_v56 }
 0x13f   : > { %v5958_v35 = vadd.f32 %v4883_v46, %v1013_v16  ;;  %v1011_v47 = vadd.f32 %v912_v7, %v5849_v62  ;;  %v4884_v40 = vpop.f32.mrf.mxu0 }
 0x140   : > { %v4836_v11 = vpop.f32.mrf.mxu1 }
 0x141   : > { %v5961_v60 = vadd.f32 %v1282_v21, %v1011_v47  ;;  %v1014_v23 = vadd.f32 %v4836_v11, %v5853_v0  ;;  %v1285_v52 = vpop.f32.mrf.mxu0  ;;  %v2937_v0 = vld [vmem:[#allocation2 + $0x1a1] sm:$0xff] }
 0x142   : > { %v915_v51 = vpop.f32.mrf.mxu1  ;;  %v2953_v46 = vpack.c.bf16 %v2937_v0, %v2936_v36 }
 0x143   : > { %v5964_v41 = vadd.f32 %v4884_v40, %v1014_v23  ;;  %v1012_v8 = vadd.f32 %v915_v51, %v5857_v4  ;;  %v4887_v63 = vpop.f32.mrf.mxu0  ;;  %5174 = vmatmul.mubr.bf16.gmra.mxu0 %v3321_v48 }
 0x144   : > { %v4839_v24 = vpop.f32.mrf.mxu1  ;;  %5126 = vmatmul.mubr.bf16.gmra.mxu1 %v2951_v12  ;;  %5177 = vmatprep.mubr.bf16.mxu0 %v5874_v34 }
 0x145   : > { %v5967_v62 = vadd.f32 %v1285_v52, %v1012_v8  ;;  %v1017_v33 = vadd.f32 %v4839_v24, %v5861_v5  ;;  %5129 = vmatprep.mubr.bf16.mxu1 %v5768_v43  ;;  %v1298_v53 = vpop.f32.mrf.mxu0 }
 0x146   : > { %v928_v18 = vpop.f32.mrf.mxu1 }
 0x147   : > { %v5972_v2 = vadd.f32 %v4887_v63, %v1017_v33  ;;  %v1015_v4 = vadd.f32 %v928_v18, %v5868_v20  ;;  %v4888_v44 = vpop.f32.mrf.mxu0 }
 0x148   : > { %v4840_v37 = vpop.f32.mrf.mxu1 }
 0x149   : > { %v5975_v16 = vadd.f32 %v1298_v53, %v1015_v4  ;;  %v1018_v5 = vadd.f32 %v4840_v37, %v5872_v26  ;;  %v1301_v14 = vpop.f32.mrf.mxu0 }
 0x14a   : > { %v931_v43 = vpop.f32.mrf.mxu1 }
 0x14b   : > { %v5978_v34 = vadd.f32 %v4888_v44, %v1018_v5  ;;  %v1016_v19 = vadd.f32 %v931_v43, %v5878_v38  ;;  %v4891_v7 = vpop.f32.mrf.mxu0  ;;  %5178 = vmatmul.mubr.bf16.gmra.mxu0 %v3323_v31 }
 0x14c   : > { %v4843_v30 = vpop.f32.mrf.mxu1  ;;  %5130 = vmatmul.mubr.bf16.gmra.mxu1 %v2953_v46 }
 0x14d   : > { %v5981_v21 = vadd.f32 %v1301_v14, %v1016_v19  ;;  %v1021_v20 = vadd.f32 %v4843_v30, %v5882_v55  ;;  %v1314_v11 = vpop.f32.mrf.mxu0 }
 0x14e   : > { %v944_v47 = vpop.f32.mrf.mxu1 }
 0x14f   : > { %v5984_v40 = vadd.f32 %v4891_v7, %v1021_v20  ;;  %v1019_v26 = vadd.f32 %v944_v47, %v5887_v57  ;;  %v4892_v48 = vpop.f32.mrf.mxu0 }
 0x150   : > { %v4844_v12 = vpop.f32.mrf.mxu1 }
 0x151   : > { %v5987_v23 = vadd.f32 %v1314_v11, %v1019_v26  ;;  %v1022_v38 = vadd.f32 %v4844_v12, %v5891_v29  ;;  %v1317_v52 = vpop.f32.mrf.mxu0 }
 0x152   : > { %v947_v51 = vpop.f32.mrf.mxu1 }
 0x153   : > { %v5990_v8 = vadd.f32 %v4892_v48, %v1022_v38  ;;  %v1020_v24 = vadd.f32 %v947_v51, %v5895_v15  ;;  %v4959_v55 = vpop.f32.mrf.mxu0 }
 0x154   : > { %v4911_v63 = vpop.f32.mrf.mxu1 }
 0x155   : > { %v5993_v36 = vadd.f32 %v1317_v52, %v1020_v24  ;;  %v1733_v33 = vadd.f32 %v4911_v63, %v5898_v22  ;;  %v1942_v57 = vpop.f32.mrf.mxu0 }
 0x156   : > { %v1572_v0 = vpop.f32.mrf.mxu1 }
 0x157   : > { %v5996_v56 = vadd.f32 %v4959_v55, %v1733_v33  ;;  %v1731_v45 = vadd.f32 %v1572_v0, %v5901_v49  ;;  %v4960_v29 = vpop.f32.mrf.mxu0 }
 0x158   : > { %v4912_v18 = vpop.f32.mrf.mxu1 }
 0x159   : > { %v5999_v53 = vadd.f32 %v1942_v57, %v1731_v45  ;;  %v1734_v4 = vadd.f32 %v4912_v18, %v5904_v17  ;;  %v1945_v15 = vpop.f32.mrf.mxu0 }
 0x15a   : > { %v1575_v37 = vpop.f32.mrf.mxu1 }
 0x15b   : > { %v6002_v44 = vadd.f32 %v4960_v29, %v1734_v4  ;;  %v1732_v46 = vadd.f32 %v1575_v37, %v5907_v54  ;;  %v4963_v22 = vpop.f32.mrf.mxu0 }
 0x15c   : > { %v4915_v31 = vpop.f32.mrf.mxu1 }
 0x15d   : > { %v6005_v5 = vadd.f32 %v1945_v15, %v1732_v46  ;;  %v1737_v43 = vadd.f32 %v4915_v31, %v5910_v10  ;;  %v1958_v49 = vpop.f32.mrf.mxu0 }
 0x15e   : > { %v1588_v14 = vpop.f32.mrf.mxu1 }
 0x15f   : > { %v6008_v19 = vadd.f32 %v4963_v22, %v1737_v43  ;;  %v1735_v30 = vadd.f32 %v1588_v14, %v5913_v28  ;;  %v4964_v17 = vpop.f32.mrf.mxu0 }
 0x160   : > { %v4916_v7 = vpop.f32.mrf.mxu1 }
 0x161   : > { %v6011_v20 = vadd.f32 %v1958_v49, %v1735_v30  ;;  %v1738_v47 = vadd.f32 %v4916_v7, %v5916_v50  ;;  %v1961_v54 = vpop.f32.mrf.mxu0 }
 0x162   : > { %v1591_v11 = vpop.f32.mrf.mxu1 }
 0x163   : > { %v6014_v26 = vadd.f32 %v4964_v17, %v1738_v47  ;;  %v1736_v12 = vadd.f32 %v1591_v11, %v5919_v13  ;;  %v4967_v10 = vpop.f32.mrf.mxu0 }
 0x164   : > { %v4919_v48 = vpop.f32.mrf.mxu1 }
 0x165   : > { %v6017_v38 = vadd.f32 %v1961_v54, %v1736_v12  ;;  %v1741_v51 = vadd.f32 %v4919_v48, %v5922_v9  ;;  %v1974_v28 = vpop.f32.mrf.mxu0 }
 0x166   : > { %v1604_v52 = vpop.f32.mrf.mxu1 }
 0x167   : > { %v6020_v24 = vadd.f32 %v4967_v10, %v1741_v51  ;;  %v1739_v63 = vadd.f32 %v1604_v52, %v5925_v27  ;;  %v4968_v50 = vpop.f32.mrf.mxu0 }
 0x168   : > { %v4920_v55 = vpop.f32.mrf.mxu1 }
 0x169   : > { %v6023_v33 = vadd.f32 %v1974_v28, %v1739_v63  ;;  %v1742_v0 = vadd.f32 %v4920_v55, %v5928_v1  ;;  %v1977_v13 = vpop.f32.mrf.mxu0 }
 0x16a   : > { %v1607_v57 = vpop.f32.mrf.mxu1 }
 0x16b   : > { %v6026_v45 = vadd.f32 %v4968_v50, %v1742_v0  ;;  %v1740_v18 = vadd.f32 %v1607_v57, %v5931_v59  ;;  %v4971_v9 = vpop.f32.mrf.mxu0 }
 0x16c   : > { %v4923_v29 = vpop.f32.mrf.mxu1 }
 0x16d   : > { %v6029_v4 = vadd.f32 %v1977_v13, %v1740_v18  ;;  %v1745_v37 = vadd.f32 %v4923_v29, %v5934_v6  ;;  %v1990_v27 = vpop.f32.mrf.mxu0 }
 0x16e   : > { %v1620_v15 = vpop.f32.mrf.mxu1 }
 0x16f   : > { %v6032_v46 = vadd.f32 %v4971_v9, %v1745_v37  ;;  %v1743_v31 = vadd.f32 %v1620_v15, %v5937_v25  ;;  %v4972_v1 = vpop.f32.mrf.mxu0 }
 0x170   : > { %v4924_v22 = vpop.f32.mrf.mxu1 }
 0x171   : > { %v6035_v43 = vadd.f32 %v1990_v27, %v1743_v31  ;;  %v1746_v14 = vadd.f32 %v4924_v22, %v5940_v3  ;;  %v1993_v59 = vpop.f32.mrf.mxu0 }
 0x172   : > { %v1623_v49 = vpop.f32.mrf.mxu1 }
 0x173   : > { %v6038_v30 = vadd.f32 %v4972_v1, %v1746_v14  ;;  %v1744_v7 = vadd.f32 %v1623_v49, %v5943_v58  ;;  %v4975_v6 = vpop.f32.mrf.mxu0 }
 0x174   : > { %v4927_v17 = vpop.f32.mrf.mxu1 }
 0x175   : > { %v6041_v47 = vadd.f32 %v1993_v59, %v1744_v7  ;;  %v1749_v11 = vadd.f32 %v4927_v17, %v5946_v61  ;;  %v2006_v25 = vpop.f32.mrf.mxu0 }
 0x176   : > { %v1636_v54 = vpop.f32.mrf.mxu1 }
 0x177   : > { %v6044_v12 = vadd.f32 %v4975_v6, %v1749_v11  ;;  %v1747_v48 = vadd.f32 %v1636_v54, %v5949_v32  ;;  %v4976_v3 = vpop.f32.mrf.mxu0 }
 0x178   : > { %v4928_v10 = vpop.f32.mrf.mxu1 }
 0x179   : > { %v6047_v51 = vadd.f32 %v2006_v25, %v1747_v48  ;;  %v1750_v52 = vadd.f32 %v4928_v10, %v5952_v39  ;;  %v2009_v58 = vpop.f32.mrf.mxu0 }
 0x17a   : > { %v1639_v28 = vpop.f32.mrf.mxu1 }
 0x17b   : > { %v6050_v63 = vadd.f32 %v4976_v3, %v1750_v52  ;;  %v1748_v55 = vadd.f32 %v1639_v28, %v5955_v42  ;;  %v4979_v61 = vpop.f32.mrf.mxu0 }
 0x17c   : > { %v4931_v50 = vpop.f32.mrf.mxu1 }
 0x17d   : > { %v6053_v0 = vadd.f32 %v2009_v58, %v1748_v55  ;;  %v1753_v57 = vadd.f32 %v4931_v50, %v5958_v35  ;;  %v2022_v32 = vpop.f32.mrf.mxu0 }
 0x17e   : > { %v1652_v13 = vpop.f32.mrf.mxu1 }
 0x17f   : > { %v6056_v18 = vadd.f32 %v4979_v61, %v1753_v57  ;;  %v1751_v29 = vadd.f32 %v1652_v13, %v5961_v60  ;;  %v4980_v39 = vpop.f32.mrf.mxu0 }
 0x180   : > { %v4932_v9 = vpop.f32.mrf.mxu1 }
 0x181   : > { %v6059_v37 = vadd.f32 %v2022_v32, %v1751_v29  ;;  %v1754_v15 = vadd.f32 %v4932_v9, %v5964_v41  ;;  %v2025_v42 = vpop.f32.mrf.mxu0 }
 0x182   : > { %v1655_v27 = vpop.f32.mrf.mxu1 }
 0x183   : > { %6328 = vst [vmem:[#allocation4_spill] sm:$0xff] %v6059_v37  ;;  %v6062_v31 = vadd.f32 %v4980_v39, %v1754_v15  ;;  %v1752_v22 = vadd.f32 %v1655_v27, %v5967_v62  ;;  %v4983_v35 = vpop.f32.mrf.mxu0 }
 0x184   : > { %v4935_v1 = vpop.f32.mrf.mxu1 }
 0x185   : > { %6329 = vst [vmem:[#allocation5_spill] sm:$0xff] %v6062_v31  ;;  %v6065_v14 = vadd.f32 %v2025_v42, %v1752_v22  ;;  %v1757_v49 = vadd.f32 %v4935_v1, %v5972_v2  ;;  %v2038_v60 = vpop.f32.mrf.mxu0 }
 0x186   : > { %v1668_v59 = vpop.f32.mrf.mxu1 }
 0x187   : > { %6330 = vst [vmem:[#allocation6_spill] sm:$0xff] %v6065_v14  ;;  %v6068_v7 = vadd.f32 %v4983_v35, %v1757_v49  ;;  %v1755_v17 = vadd.f32 %v1668_v59, %v5975_v16  ;;  %v4984_v41 = vpop.f32.mrf.mxu0 }
 0x188   : > { %v4936_v6 = vpop.f32.mrf.mxu1 }
 0x189   : > { %v6071_v11 = vadd.f32 %v2038_v60, %v1755_v17  ;;  %v1758_v54 = vadd.f32 %v4936_v6, %v5978_v34  ;;  %v2041_v62 = vpop.f32.mrf.mxu0 }
 0x18a   : > { %v1671_v25 = vpop.f32.mrf.mxu1 }
 0x18b   : > { %6331 = vst [vmem:[#allocation7_spill] sm:$0xff] %v6071_v11  ;;  %v6074_v48 = vadd.f32 %v4984_v41, %v1758_v54  ;;  %v1756_v10 = vadd.f32 %v1671_v25, %v5981_v21  ;;  %v4987_v2 = vpop.f32.mrf.mxu0 }
 0x18c   : > { %v4939_v3 = vpop.f32.mrf.mxu1 }
 0x18d   : > { %6332 = vst [vmem:[#allocation8_spill] sm:$0xff] %v6074_v48  ;;  %v6077_v52 = vadd.f32 %v2041_v62, %v1756_v10  ;;  %v1761_v28 = vadd.f32 %v4939_v3, %v5984_v40  ;;  %v2054_v16 = vpop.f32.mrf.mxu0 }
 0x18e   : > { %v1684_v58 = vpop.f32.mrf.mxu1 }
 0x18f   : > { %6333 = vst [vmem:[#allocation9_spill] sm:$0xff] %v6077_v52  ;;  %v6080_v55 = vadd.f32 %v4987_v2, %v1761_v28  ;;  %v1759_v50 = vadd.f32 %v1684_v58, %v5987_v23  ;;  %v4988_v34 = vpop.f32.mrf.mxu0 }
 0x190   : > { %v4940_v61 = vpop.f32.mrf.mxu1 }
 0x191   : > { %v6083_v57 = vadd.f32 %v2054_v16, %v1759_v50  ;;  %v1762_v13 = vadd.f32 %v4940_v61, %v5990_v8  ;;  %v2057_v21 = vpop.f32.mrf.mxu0 }
 0x192   : > { %v1687_v32 = vpop.f32.mrf.mxu1 }
 0x193   : > { %6334 = vst [vmem:[#allocation10_spill] sm:$0xff] %v6083_v57  ;;  %v6086_v29 = vadd.f32 %v4988_v34, %v1762_v13  ;;  %v1760_v9 = vadd.f32 %v1687_v32, %v5993_v36  ;;  %v5055_v40 = vpop.f32.mrf.mxu0 }
 0x194   : > { %v5007_v39 = vpop.f32.mrf.mxu1 }
 0x195   : > { %6335 = vst [vmem:[#allocation11_spill] sm:$0xff] %v6086_v29  ;;  %v6089_v15 = vadd.f32 %v2057_v21, %v1760_v9  ;;  %v2473_v27 = vadd.f32 %v5007_v39, %v5996_v56  ;;  %v2683_v23 = vpop.f32.mrf.mxu0 }
 0x196   : > { %v2312_v42 = vpop.f32.mrf.mxu1 }
 0x197   : > { %6336 = vst [vmem:[#allocation12_spill] sm:$0xff] %v6089_v15  ;;  %v6092_v22 = vadd.f32 %v5055_v40, %v2473_v27  ;;  %v2471_v1 = vadd.f32 %v2312_v42, %v5999_v53  ;;  %v6097_v8 = vpop.f32.mrf.mxu0 }
 0x198   : > { %v6095_v35 = vpop.f32.mrf.mxu1 }
 0x199   : > { %v6099_v49 = vadd.f32 %v2683_v23, %v2471_v1  ;;  %v6103_v36 = vpop.f32.mrf.mxu0 }
 0x19a   : > { %v6101_v59 = vpop.f32.mrf.mxu1 }
 0x19b   : > { %v5059_v17 = vpop.f32.mrf.mxu0 }
 0x19c   : > { %v5011_v60 = vpop.f32.mrf.mxu1 }
 0x19d   : > { %v2477_v56 = vadd.f32 %v5011_v60, %v6008_v19  ;;  %v6108_v41 = vpop.f32.mrf.mxu0 }
 0x19e   : > { %v6106_v6 = vpop.f32.mrf.mxu1 }
 0x19f   : > { %v6110_v54 = vadd.f32 %v5059_v17, %v2477_v56  ;;  %v6114_v25 = vpop.f32.mrf.mxu0 }
 0x1a0   : > { %v6112_v53 = vpop.f32.mrf.mxu1 }
 0x1a1   : > { %v6118_v10 = vpop.f32.mrf.mxu0 }
 0x1a2   : > { %v6116_v62 = vpop.f32.mrf.mxu1 }
 0x1a3   : > { %v5063_v2 = vpop.f32.mrf.mxu0 }
 0x1a4   : > { %v5015_v3 = vpop.f32.mrf.mxu1 }
 0x1a5   : > { %v2481_v28 = vadd.f32 %v5015_v3, %v6020_v24  ;;  %v6123_v19 = vpop.f32.mrf.mxu0 }
 0x1a6   : > { %v6121_v58 = vpop.f32.mrf.mxu1 }
 0x1a7   : > { %v6125_v16 = vadd.f32 %v5063_v2, %v2481_v28  ;;  %v6129_v61 = vpop.f32.mrf.mxu0 }
 0x1a8   : > { %v6127_v50 = vpop.f32.mrf.mxu1 }
 0x1a9   : > { %v6133_v13 = vpop.f32.mrf.mxu0 }
 0x1aa   : > { %v6131_v34 = vpop.f32.mrf.mxu1 }
 0x1ab   : > { %v5067_v21 = vpop.f32.mrf.mxu0 }
 0x1ac   : > { %v5019_v32 = vpop.f32.mrf.mxu1 }
 0x1ad   : > { %v2485_v9 = vadd.f32 %v5019_v32, %v6032_v46  ;;  %v6138_v24 = vpop.f32.mrf.mxu0 }
 0x1ae   : > { %v6136_v39 = vpop.f32.mrf.mxu1 }
 0x1af   : > { %v6140_v40 = vadd.f32 %v5067_v21, %v2485_v9  ;;  %v6144_v42 = vpop.f32.mrf.mxu0 }
 0x1b0   : > { %v6142_v27 = vpop.f32.mrf.mxu1 }
 0x1b1   : > { %v6148_v1 = vpop.f32.mrf.mxu0 }
 0x1b2   : > { %v6146_v23 = vpop.f32.mrf.mxu1 }
 0x1b3   : > { %v5071_v17 = vpop.f32.mrf.mxu0 }
 0x1b4   : > { %v5023_v60 = vpop.f32.mrf.mxu1 }
 0x1b5   : > { %v2489_v56 = vadd.f32 %v5023_v60, %v6044_v12  ;;  %v6153_v46 = vpop.f32.mrf.mxu0 }
 0x1b6   : > { %v6151_v3 = vpop.f32.mrf.mxu1 }
 0x1b7   : > { %v6155_v2 = vadd.f32 %v5071_v17, %v2489_v56  ;;  %v6159_v32 = vpop.f32.mrf.mxu0 }
 0x1b8   : > { %v6157_v28 = vpop.f32.mrf.mxu1 }
 0x1b9   : > { %v6163_v9 = vpop.f32.mrf.mxu0 }
 0x1ba   : > { %v6161_v21 = vpop.f32.mrf.mxu1  ;;  %6337 = vst [vmem:[#allocation13_spill] sm:$0xff] %v6163_v9 }
 0x1bb   : > { %v5075_v29 = vpop.f32.mrf.mxu0 }
 0x1bc   : > { %v5027_v15 = vpop.f32.mrf.mxu1 }
 0x1bd   : > { %v2493_v57 = vadd.f32 %v5027_v15, %v6056_v18  ;;  %v6168_v12 = vpop.f32.mrf.mxu0 }
 0x1be   : > { %v6166_v52 = vpop.f32.mrf.mxu1  ;;  %6338 = vst [vmem:[#allocation14_spill] sm:$0xff] %v6168_v12 }
 0x1bf   : > { %v6170_v60 = vadd.f32 %v5075_v29, %v2493_v57  ;;  %v6174_v56 = vpop.f32.mrf.mxu0 }
 0x1c0   : > { %v6172_v17 = vpop.f32.mrf.mxu1  ;;  %6341 = vst [vmem:[#allocation17_spill] sm:$0xff] %v6174_v56 }
 0x1c1   : > { %6339 = vst [vmem:[#allocation15_spill] sm:$0xff] %v6170_v60  ;;  %6340 = vst [vmem:[#allocation16_spill] sm:$0xff] %v6172_v17  ;;  %v6178_v11 = vpop.f32.mrf.mxu0 }
 0x1c2   : > { %v6176_v48 = vpop.f32.mrf.mxu1  ;;  %6343 = vst [vmem:[#allocation19_spill] sm:$0xff] %v6178_v11 }
 0x1c3   : > { %6342 = vst [vmem:[#allocation18_spill] sm:$0xff] %v6176_v48  ;;  %v5079_v31 = vpop.f32.mrf.mxu0 }
 0x1c4   : > { %v5031_v14 = vpop.f32.mrf.mxu1 }
 0x1c5   : > { %v2497_v37 = vadd.f32 %v5031_v14, %v6068_v7  ;;  %v6183_v18 = vpop.f32.mrf.mxu0 }
 0x1c6   : > { %v6181_v9 = vpop.f32.mrf.mxu1  ;;  %6344 = vst [vmem:[#allocation20_spill] sm:$0xff] %v6183_v18 }
 0x1c7   : > { %v6185_v15 = vadd.f32 %v5079_v31, %v2497_v37  ;;  %v6189_v29 = vpop.f32.mrf.mxu0 }
 0x1c8   : > { %v6187_v57 = vpop.f32.mrf.mxu1  ;;  %6347 = vst [vmem:[#allocation23_spill] sm:$0xff] %v6189_v29 }
 0x1c9   : > { %6345 = vst [vmem:[#allocation21_spill] sm:$0xff] %v6185_v15  ;;  %6346 = vst [vmem:[#allocation22_spill] sm:$0xff] %v6187_v57  ;;  %v6193_v56 = vpop.f32.mrf.mxu0 }
 0x1ca   : > { %v6191_v60 = vpop.f32.mrf.mxu1  ;;  %6349 = vst [vmem:[#allocation25_spill] sm:$0xff] %v6193_v56  ;;  %v2474_v56 = vadd.f32 %v6095_v35, %v6002_v44  ;;  %v2475_v44 = vadd.f32 %v6106_v6, %v6011_v20 }
 0x1cb   : > { %6348 = vst [vmem:[#allocation24_spill] sm:$0xff] %v6191_v60  ;;  %v5083_v11 = vpop.f32.mrf.mxu0 }
 0x1cc   : > { %v5035_v48 = vpop.f32.mrf.mxu1  ;;  %v2846_v6 = vadd.f32 %v6108_v41, %v2475_v44 }
 0x1cd   : > { %v2501_v12 = vadd.f32 %v5035_v48, %v6080_v55  ;;  %v6198_v14 = vpop.f32.mrf.mxu0  ;;  %v2472_v48 = vadd.f32 %v6101_v59, %v6005_v5  ;;  %v2478_v5 = vadd.f32 %v6112_v53, %v6014_v26 }
 0x1ce   : > { %v6196_v17 = vpop.f32.mrf.mxu1  ;;  %6351 = vst [vmem:[#allocation27_spill] sm:$0xff] %v6198_v14 }
 0x1cf   : > { %6350 = vst [vmem:[#allocation26_spill] sm:$0xff] %v6196_v17  ;;  %v6200_v7 = vadd.f32 %v5083_v11, %v2501_v12  ;;  %v6204_v31 = vpop.f32.mrf.mxu0  ;;  %v2845_v11 = vadd.f32 %v6097_v8, %v2474_v56  ;;  %v2849_v53 = vadd.f32 %v6114_v25, %v2478_v5 }
 0x1d0   : > { %v6202_v37 = vpop.f32.mrf.mxu1  ;;  %6354 = vst [vmem:[#allocation30_spill] sm:$0xff] %v6204_v31 }
 0x1d1   : > { %6352 = vst [vmem:[#allocation28_spill] sm:$0xff] %v6200_v7  ;;  %6353 = vst [vmem:[#allocation29_spill] sm:$0xff] %v6202_v37  ;;  %v6208_v29 = vpop.f32.mrf.mxu0 }
 0x1d2   : > { %v6206_v15 = vpop.f32.mrf.mxu1  ;;  %6356 = vst [vmem:[#allocation32_spill] sm:$0xff] %v6208_v29  ;;  %v2843_v29 = vadd.f32 %v6103_v36, %v2472_v48 }
 0x1d3   : > { %6355 = vst [vmem:[#allocation31_spill] sm:$0xff] %v6206_v15  ;;  %v5151_v18 = vpop.f32.mrf.mxu0 }
 0x1d4   : > { %v5103_v60 = vpop.f32.mrf.mxu1 }
 0x1d5   : > { %v3423_v14 = vpop.f32.mrf.mxu0  ;;  %v3214_v12 = vadd.f32 %v5103_v60, %v6092_v22  ;;  %v2476_v22 = vadd.f32 %v6116_v62, %v6017_v38 }
 0x1d6   : > { %v3053_v55 = vpop.f32.mrf.mxu1 }
 0x1d7   : > { %v3212_v7 = vadd.f32 %v3053_v55, %v6099_v49  ;;  %v5152_v15 = vpop.f32.mrf.mxu0  ;;  %v3584_v17 = vadd.f32 %v5151_v18, %v3214_v12 }
 0x1d8   : > { %v5104_v31 = vpop.f32.mrf.mxu1 }
 0x1d9   : > { %v3215_v37 = vadd.f32 %v5104_v31, %v2845_v11  ;;  %v3426_v59 = vpop.f32.mrf.mxu0  ;;  %v3582_v8 = vadd.f32 %v3423_v14, %v3212_v7  ;;  %v2847_v7 = vadd.f32 %v6118_v10, %v2476_v22  ;;  %v3878_v48 = vmul.f32 %v3584_v17, %v3584_v17 }
 0x1da   : > { %v3056_v35 = vpop.f32.mrf.mxu1  ;;  %v2482_v11 = vadd.f32 %v6127_v50, %v6026_v45 }
 0x1db   : > { %v3585_v56 = vadd.f32 %v5152_v15, %v3215_v37  ;;  %v3213_v57 = vadd.f32 %v3056_v35, %v2843_v29  ;;  %v5155_v49 = vpop.f32.mrf.mxu0  ;;  %v3876_v62 = vmul.f32 %v3582_v8, %v3582_v8  ;;  %v2479_v37 = vadd.f32 %v6121_v58, %v6023_v33 }
 0x1dc   : > { %v5107_v20 = vpop.f32.mrf.mxu1 }
 0x1dd   : > { %v4431_v36 = vpack.c.bf16 %v3585_v56, %v3584_v17  ;;  %v3583_v26 = vadd.f32 %v3426_v59, %v3213_v57  ;;  %v3218_v60 = vadd.f32 %v5107_v20, %v6110_v54  ;;  %v3439_v38 = vpop.f32.mrf.mxu0  ;;  %v3879_v12 = vmul.f32 %v3585_v56, %v3585_v56 }
 0x1de   : > { %v3069_v18 = vpop.f32.mrf.mxu1  ;;  %v2850_v22 = vadd.f32 %v6123_v19, %v2479_v37  ;;  %v2486_v37 = vadd.f32 %v6142_v27, %v6038_v30  ;;  %v2484_v30 = vadd.f32 %v6146_v23, %v6041_v47 }
 0x1df   : > { %4518 = vst [vmem:[%s6229_s10 + $0x8] sm:$0xff] %v4431_v36   ;;  %v4426_v15 = vpack.c.bf16 %v3583_v26, %v3582_v8  ;;  %v3838_v29 = vadd.f32 %v3583_v26, %v3582_v8  ;;  %v3877_v14 = vmul.f32 %v3583_v26, %v3583_v26  ;;  %v3216_v57 = vadd.f32 %v3069_v18, %v2846_v6  ;;  %v5156_v41 = vpop.f32.mrf.mxu0 }
 0x1e0   : > { %v5108_v31 = vpop.f32.mrf.mxu1  ;;  %v3588_v44 = vadd.f32 %v5155_v49, %v3218_v60  ;;  %v2855_v23 = vadd.f32 %v6148_v1, %v2484_v30 }
 0x1e1   : > { %4427 = vst [vmem:[%s6229_s10] sm:$0xff] %v4426_v15   ;;  %v3839_v25 = vadd.f32 %v3838_v29, %v3584_v17  ;;  %v3908_v55 = vadd.f32 %v3877_v14, %v3876_v62  ;;  %v3219_v54 = vadd.f32 %v5108_v31, %v2849_v53  ;;  %v3586_v5 = vadd.f32 %v3439_v38, %v3216_v57  ;;  %v3442_v59 = vpop.f32.mrf.mxu0 }
 0x1e2   : > { %v3072_v35 = vpop.f32.mrf.mxu1  ;;  %v2480_v17 = vadd.f32 %v6131_v34, %v6029_v4 }
 0x1e3   : > { %v3909_v10 = vadd.f32 %v3908_v55, %v3878_v48  ;;  %v3840_v8 = vadd.f32 %v3839_v25, %v3585_v56  ;;  %v3589_v33 = vadd.f32 %v5156_v41, %v3219_v54  ;;  %v3217_v58 = vadd.f32 %v3072_v35, %v2847_v7  ;;  %v5159_v36 = vpop.f32.mrf.mxu0 }
 0x1e4   : > { %v5111_v20 = vpop.f32.mrf.mxu1  ;;  %v3880_v6 = vmul.f32 %v3586_v5, %v3586_v5  ;;  %v2853_v56 = vadd.f32 %v6129_v61, %v2482_v11  ;;  %v2851_v14 = vadd.f32 %v6133_v13, %v2480_v17  ;;  %v2483_v7 = vadd.f32 %v6136_v39, %v6035_v43 }
 0x1e5   : > { %v3841_v26 = vadd.f32 %v3840_v8, %v3586_v5  ;;  %v3910_v45 = vadd.f32 %v3909_v10, %v3879_v12  ;;  %v4441_v50 = vpack.c.bf16 %v3589_v33, %v3588_v44  ;;  %v3587_v49 = vadd.f32 %v3442_v59, %v3217_v58  ;;  %v3455_v60 = vpop.f32.mrf.mxu0 }
 0x1e6   : > { %v3085_v53 = vpop.f32.mrf.mxu1  ;;  %v3222_v38 = vadd.f32 %v5111_v20, %v6125_v16  ;;  %v3882_v61 = vmul.f32 %v3588_v44, %v3588_v44  ;;  %v3883_v12 = vmul.f32 %v3589_v33, %v3589_v33  ;;  %v2854_v39 = vadd.f32 %v6138_v24, %v2483_v7 }
 0x1e7   : > { %v3911_v18 = vadd.f32 %v3910_v45, %v3880_v6  ;;  %4520 = vst [vmem:[%s6229_s10 + $0x18] sm:$0xff] %v4441_v50   ;;  %v3220_v19 = vadd.f32 %v3085_v53, %v2850_v22  ;;  %v4436_v62 = vpack.c.bf16 %v3587_v49, %v3586_v5  ;;  %v3842_v15 = vadd.f32 %v3841_v26, %v3587_v49  ;;  %v5160_v29 = vpop.f32.mrf.mxu0 }
 0x1e8   : > { %v3881_v4 = vmul.f32 %v3587_v49, %v3587_v49  ;;  %v5112_v34 = vpop.f32.mrf.mxu1  ;;  %v3592_v55 = vadd.f32 %v5159_v36, %v3222_v38  ;;  %v2857_v59 = vadd.f32 %v6144_v42, %v2486_v37  ;;  %v2487_v42 = vadd.f32 %v6151_v3, %v6047_v51 }
 0x1e9   : > { %v3223_v57 = vadd.f32 %v5112_v34, %v2853_v56  ;;  %4519 = vst [vmem:[%s6229_s10 + $0x10] sm:$0xff] %v4436_v62   ;;  %v3843_v31 = vadd.f32 %v3842_v15, %v3588_v44  ;;  %v3590_v16 = vadd.f32 %v3455_v60, %v3220_v19  ;;  %v3458_v25 = vpop.f32.mrf.mxu0  ;;  %v2490_v50 = vadd.f32 %v6157_v28, %v6050_v63 }
 0x1ea   : > { %v3912_v41 = vadd.f32 %v3911_v18, %v3881_v4  ;;  %v3088_v48 = vpop.f32.mrf.mxu1  ;;  %v3886_v53 = vmul.f32 %v3592_v55, %v3592_v55  ;;  %v2858_v3 = vadd.f32 %v6153_v46, %v2487_v42  ;;  %v2488_v63 = vadd.f32 %v6161_v21, %v6053_v0  ;;  %v6357_v21 = vld [vmem:[#allocation13_spill] sm:$0xff] }
 0x1eb   : > { %v3593_v54 = vadd.f32 %v5160_v29, %v3223_v57  ;;  %v3221_v11 = vadd.f32 %v3088_v48, %v2851_v14  ;;  %v3844_v5 = vadd.f32 %v3843_v31, %v3589_v33  ;;  %v5163_v43 = vpop.f32.mrf.mxu0  ;;  %v3884_v8 = vmul.f32 %v3590_v16, %v3590_v16 }
 0x1ec   : > { %v3913_v13 = vadd.f32 %v3912_v41, %v3882_v61  ;;  %v5115_v35 = vpop.f32.mrf.mxu1  ;;  %v2861_v7 = vadd.f32 %v6159_v32, %v2490_v50  ;;  %v6364_v50 = vld [vmem:[#allocation17_spill] sm:$0xff] }
 0x1ed   : > { %v4451_v27 = vpack.c.bf16 %v3593_v54, %v3592_v55  ;;  %v3591_v44 = vadd.f32 %v3458_v25, %v3221_v11  ;;  %v3845_v10 = vadd.f32 %v3844_v5, %v3590_v16  ;;  %v3471_v17 = vpop.f32.mrf.mxu0  ;;  %v3226_v36 = vadd.f32 %v5115_v35, %v6140_v40  ;;  %v6359_v5 = vld [vmem:[#allocation5_spill] sm:$0xff]  ;;  %v6360_v35 = vld [vmem:[#allocation16_spill] sm:$0xff] }
 0x1ee   : > { %v3914_v58 = vadd.f32 %v3913_v13, %v3883_v12  ;;  %v3101_v22 = vpop.f32.mrf.mxu1  ;;  %v3887_v4 = vmul.f32 %v3593_v54, %v3593_v54  ;;  %v2859_v12 = vadd.f32 %v6357_v21, %v2488_v63  ;;  %v6358_v13 = vld [vmem:[#allocation4_spill] sm:$0xff] }
 0x1ef   : > { %4522 = vst [vmem:[%s6229_s10 + $0x28] sm:$0xff] %v4451_v27   ;;  %v4446_v20 = vpack.c.bf16 %v3591_v44, %v3590_v16  ;;  %v3885_v33 = vmul.f32 %v3591_v44, %v3591_v44  ;;  %v3224_v26 = vadd.f32 %v3101_v22, %v2854_v39  ;;  %v3846_v6 = vadd.f32 %v3845_v10, %v3591_v44  ;;  %v5164_v47 = vpop.f32.mrf.mxu0 }
 0x1f0   : > { %v3915_v24 = vadd.f32 %v3914_v58, %v3884_v8  ;;  %v5116_v45 = vpop.f32.mrf.mxu1  ;;  %v3596_v19 = vadd.f32 %v5163_v43, %v3226_v36  ;;  %v2491_v32 = vadd.f32 %v6166_v52, %v6358_v13  ;;  %v2494_v43 = vadd.f32 %v6360_v35, %v6359_v5  ;;  %v6371_v35 = vld [vmem:[#allocation9_spill] sm:$0xff] }
 0x1f1   : > { %4521 = vst [vmem:[%s6229_s10 + $0x20] sm:$0xff] %v4446_v20   ;;  %v3227_v49 = vadd.f32 %v5116_v45, %v2857_v59  ;;  %v3847_v60 = vadd.f32 %v3846_v6, %v3592_v55  ;;  %v3594_v18 = vadd.f32 %v3471_v17, %v3224_v26  ;;  %v3474_v38 = vpop.f32.mrf.mxu0  ;;  %v6361_v26 = vld [vmem:[#allocation14_spill] sm:$0xff] }
 0x1f2   : > { %v3916_v56 = vadd.f32 %v3915_v24, %v3885_v33  ;;  %v3104_v40 = vpop.f32.mrf.mxu1  ;;  %v3890_v30 = vmul.f32 %v3596_v19, %v3596_v19  ;;  %v2862_v24 = vadd.f32 %v6361_v26, %v2491_v32  ;;  %v6362_v6 = vld [vmem:[#allocation6_spill] sm:$0xff]  ;;  %v6370_v32 = vld [vmem:[#allocation20_spill] sm:$0xff] }
 0x1f3   : > { %v3597_v62 = vadd.f32 %v5164_v47, %v3227_v49  ;;  %v3225_v15 = vadd.f32 %v3104_v40, %v2855_v23  ;;  %v3848_v34 = vadd.f32 %v3847_v60, %v3593_v54  ;;  %v5167_v51 = vpop.f32.mrf.mxu0  ;;  %v3888_v57 = vmul.f32 %v3594_v18, %v3594_v18  ;;  %v6363_v45 = vld [vmem:[#allocation18_spill] sm:$0xff] }
 0x1f4   : > { %v3917_v1 = vadd.f32 %v3916_v56, %v3886_v53  ;;  %v5119_v29 = vpop.f32.mrf.mxu1  ;;  %v2492_v47 = vadd.f32 %v6363_v45, %v6362_v6  ;;  %v2865_v49 = vadd.f32 %v6364_v50, %v2494_v43  ;;  %v6372_v43 = vld [vmem:[#allocation24_spill] sm:$0xff]  ;;  %v6377_v50 = vld [vmem:[#allocation26_spill] sm:$0xff] }
 0x1f5   : > { %v4461_v28 = vpack.c.bf16 %v3597_v62, %v3596_v19  ;;  %v3595_v14 = vadd.f32 %v3474_v38, %v3225_v15  ;;  %v3849_v37 = vadd.f32 %v3848_v34, %v3594_v18  ;;  %v3487_v41 = vpop.f32.mrf.mxu0  ;;  %v3230_v25 = vadd.f32 %v5119_v29, %v6155_v2 }
 0x1f6   : > { %v3918_v61 = vadd.f32 %v3917_v1, %v3887_v4  ;;  %v3117_v31 = vpop.f32.mrf.mxu1  ;;  %v3891_v17 = vmul.f32 %v3597_v62, %v3597_v62 }
 0x1f7   : > { %4524 = vst [vmem:[%s6229_s10 + $0x38] sm:$0xff] %v4461_v28   ;;  %v4456_v16 = vpack.c.bf16 %v3595_v14, %v3594_v18  ;;  %v3889_v48 = vmul.f32 %v3595_v14, %v3595_v14  ;;  %v3228_v55 = vadd.f32 %v3117_v31, %v2858_v3  ;;  %v3850_v54 = vadd.f32 %v3849_v37, %v3595_v14  ;;  %v5168_v0 = vpop.f32.mrf.mxu0  ;;  %v6366_v3 = vld [vmem:[#allocation19_spill] sm:$0xff]  ;;  %v6369_v37 = vld [vmem:[#allocation22_spill] sm:$0xff] }
 0x1f8   : > { %v3919_v46 = vadd.f32 %v3918_v61, %v3888_v57  ;;  %v5120_v11 = vpop.f32.mrf.mxu1  ;;  %v3600_v8 = vadd.f32 %v5167_v51, %v3230_v25  ;;  %v2863_v63 = vadd.f32 %v6366_v3, %v2492_v47  ;;  %v6367_v28 = vld [vmem:[#allocation7_spill] sm:$0xff]  ;;  %v6375_v47 = vld [vmem:[#allocation25_spill] sm:$0xff] }
 0x1f9   : > { %4523 = vst [vmem:[%s6229_s10 + $0x30] sm:$0xff] %v4456_v16   ;;  %v3231_v39 = vadd.f32 %v5120_v11, %v2861_v7  ;;  %v3851_v27 = vadd.f32 %v3850_v54, %v3596_v19  ;;  %v3598_v59 = vadd.f32 %v3487_v41, %v3228_v55  ;;  %v3490_v10 = vpop.f32.mrf.mxu0  ;;  %v2495_v14 = vadd.f32 %v6181_v9, %v6367_v28  ;;  %v6368_v7 = vld [vmem:[#allocation8_spill] sm:$0xff] }
 0x1fa   : > { %v3920_v44 = vadd.f32 %v3919_v46, %v3889_v48  ;;  %v3120_v2 = vpop.f32.mrf.mxu1  ;;  %v2498_v57 = vadd.f32 %v6369_v37, %v6368_v7  ;;  %v3894_v31 = vmul.f32 %v3600_v8, %v3600_v8  ;;  %v6380_v7 = vld [vmem:[#allocation27_spill] sm:$0xff] }
 0x1fb   : > { %v3601_v58 = vadd.f32 %v5168_v0, %v3231_v39  ;;  %v3229_v22 = vadd.f32 %v3120_v2, %v2859_v12  ;;  %v3852_v33 = vadd.f32 %v3851_v27, %v3597_v62  ;;  %v5171_v52 = vpop.f32.mrf.mxu0  ;;  %v3892_v60 = vmul.f32 %v3598_v59, %v3598_v59  ;;  %v6365_v62 = vld [vmem:[#allocation15_spill] sm:$0xff] }
 0x1fc   : > { %v3921_v20 = vadd.f32 %v3920_v44, %v3890_v30  ;;  %v5123_v36 = vpop.f32.mrf.mxu1  ;;  %v2866_v5 = vadd.f32 %v6370_v32, %v2495_v14  ;;  %v2496_v39 = vadd.f32 %v6372_v43, %v6371_v35  ;;  %v6373_v44 = vld [vmem:[#allocation23_spill] sm:$0xff] }
 0x1fd   : > { %v4471_v23 = vpack.c.bf16 %v3601_v58, %v3600_v8  ;;  %v3599_v42 = vadd.f32 %v3490_v10, %v3229_v22  ;;  %v3853_v53 = vadd.f32 %v3852_v33, %v3598_v59  ;;  %v3503_v40 = vpop.f32.mrf.mxu0  ;;  %v3234_v15 = vadd.f32 %v5123_v36, %v6365_v62  ;;  %v6374_v33 = vld [vmem:[#allocation21_spill] sm:$0xff] }
 0x1fe   : > { %v3922_v56 = vadd.f32 %v3921_v20, %v3891_v17  ;;  %v3133_v18 = vpop.f32.mrf.mxu1  ;;  %v3895_v0 = vmul.f32 %v3601_v58, %v3601_v58 }
 0x1ff   : > { %4526 = vst [vmem:[%s6229_s10 + $0x48] sm:$0xff] %v4471_v23   ;;  %v4466_v38 = vpack.c.bf16 %v3599_v42, %v3598_v59  ;;  %v3893_v19 = vmul.f32 %v3599_v42, %v3599_v42  ;;  %v3232_v4 = vadd.f32 %v3133_v18, %v2862_v24  ;;  %v3854_v34 = vadd.f32 %v3853_v53, %v3599_v42  ;;  %v5172_v51 = vpop.f32.mrf.mxu0  ;;  %v6376_v42 = vld [vmem:[#allocation10_spill] sm:$0xff]  ;;  %v6378_v53 = vld [vmem:[#allocation11_spill] sm:$0xff] }
 0x200   : > { %v3923_v1 = vadd.f32 %v3922_v56, %v3892_v60  ;;  %v5124_v29 = vpop.f32.mrf.mxu1  ;;  %v3604_v46 = vadd.f32 %v5171_v52, %v3234_v15  ;;  %v2869_v59 = vadd.f32 %v6373_v44, %v2498_v57  ;;  %v2867_v23 = vadd.f32 %v6375_v47, %v2496_v39  ;;  %v6379_v60 = vld [vmem:[#allocation29_spill] sm:$0xff]  ;;  %v6381_v57 = vld [vmem:[#allocation12_spill] sm:$0xff] }
 0x201   : > { %4525 = vst [vmem:[%s6229_s10 + $0x40] sm:$0xff] %v4466_v38   ;;  %v3235_v61 = vadd.f32 %v5124_v29, %v2865_v49  ;;  %v3855_v41 = vadd.f32 %v3854_v34, %v3600_v8  ;;  %v3602_v48 = vadd.f32 %v3503_v40, %v3232_v4  ;;  %v3506_v55 = vpop.f32.mrf.mxu0  ;;  %v2499_v49 = vadd.f32 %v6377_v50, %v6376_v42 }
 0x202   : > { %v3924_v16 = vadd.f32 %v3923_v1, %v3893_v19  ;;  %v3136_v25 = vpop.f32.mrf.mxu1  ;;  %v2502_v56 = vadd.f32 %v6379_v60, %v6378_v53  ;;  %v3898_v40 = vmul.f32 %v3604_v46, %v3604_v46 }
 0x203   : > { %v3605_v54 = vadd.f32 %v5172_v51, %v3235_v61  ;;  %v3233_v11 = vadd.f32 %v3136_v25, %v2863_v63  ;;  %v3856_v12 = vadd.f32 %v3855_v41, %v3601_v58  ;;  %v5175_v9 = vpop.f32.mrf.mxu0  ;;  %v3896_v10 = vmul.f32 %v3602_v48, %v3602_v48  ;;  %v6382_v61 = vld [vmem:[#allocation31_spill] sm:$0xff] }
 0x204   : > { %v3925_v21 = vadd.f32 %v3924_v16, %v3894_v31  ;;  %v5127_v13 = vpop.f32.mrf.mxu1  ;;  %v2870_v37 = vadd.f32 %v6380_v7, %v2499_v49  ;;  %v2500_v31 = vadd.f32 %v6382_v61, %v6381_v57 }
 0x205   : > { %v4481_v30 = vpack.c.bf16 %v3605_v54, %v3604_v46  ;;  %v3603_v27 = vadd.f32 %v3506_v55, %v3233_v11  ;;  %v3857_v2 = vadd.f32 %v3856_v12, %v3602_v48  ;;  %v3519_v17 = vpop.f32.mrf.mxu0  ;;  %v3238_v36 = vadd.f32 %v5127_v13, %v6374_v33  ;;  %v6384_v13 = vld [vmem:[#allocation28_spill] sm:$0xff] }
 0x206   : > { %v3926_v8 = vadd.f32 %v3925_v21, %v3895_v0  ;;  %v3149_v22 = vpop.f32.mrf.mxu1  ;;  %v3899_v51 = vmul.f32 %v3605_v54, %v3605_v54 }
 0x207   : > { %4528 = vst [vmem:[%s6229_s10 + $0x58] sm:$0xff] %v4481_v30   ;;  %v4476_v20 = vpack.c.bf16 %v3603_v27, %v3602_v48  ;;  %v3897_v58 = vmul.f32 %v3603_v27, %v3603_v27  ;;  %v3236_v52 = vadd.f32 %v3149_v22, %v2866_v5  ;;  %v3858_v24 = vadd.f32 %v3857_v2, %v3603_v27  ;;  %v5176_v45 = vpop.f32.mrf.mxu0  ;;  %v6383_v48 = vld [vmem:[#allocation30_spill] sm:$0xff]  ;;  %v6385_v30 = vld [vmem:[#allocation32_spill] sm:$0xff] }
 0x208   : > { %v3927_v26 = vadd.f32 %v3926_v8, %v3896_v10  ;;  %v5128_v6 = vpop.f32.mrf.mxu1  ;;  %v3608_v1 = vadd.f32 %v5175_v9, %v3238_v36  ;;  %v2873_v25 = vadd.f32 %v6383_v48, %v2502_v56  ;;  %v2871_v27 = vadd.f32 %v6385_v30, %v2500_v31 }
 0x209   : > { %4527 = vst [vmem:[%s6229_s10 + $0x50] sm:$0xff] %v4476_v20   ;;  %v3239_v18 = vadd.f32 %v5128_v6, %v2869_v59  ;;  %v3859_v38 = vadd.f32 %v3858_v24, %v3604_v46  ;;  %v3606_v62 = vadd.f32 %v3519_v17, %v3236_v52  ;;  %v3522_v4 = vpop.f32.mrf.mxu0 }
 0x20a   : > { %v3928_v19 = vadd.f32 %v3927_v26, %v3897_v58  ;;  %v3152_v15 = vpop.f32.mrf.mxu1  ;;  %v3902_v59 = vmul.f32 %v3608_v1, %v3608_v1 }
 0x20b   : > { %v3609_v34 = vadd.f32 %v5176_v45, %v3239_v18  ;;  %v3237_v29 = vadd.f32 %v3152_v15, %v2867_v23  ;;  %v3860_v63 = vadd.f32 %v3859_v38, %v3605_v54  ;;  %v5179_v14 = vpop.f32.mrf.mxu0  ;;  %v3900_v46 = vmul.f32 %v3606_v62, %v3606_v62 }
 0x20c   : > { %v3929_v3 = vadd.f32 %v3928_v19, %v3898_v40  ;;  %v5131_v28 = vpop.f32.mrf.mxu1 }
 0x20d   : > { %v4491_v41 = vpack.c.bf16 %v3609_v34, %v3608_v1  ;;  %v3607_v16 = vadd.f32 %v3522_v4, %v3237_v29  ;;  %v3861_v55 = vadd.f32 %v3860_v63, %v3606_v62  ;;  %v3535_v21 = vpop.f32.mrf.mxu0  ;;  %v3242_v9 = vadd.f32 %v5131_v28, %v6384_v13 }
 0x20e   : > { %v3930_v11 = vadd.f32 %v3929_v3, %v3899_v51  ;;  %v3165_v0 = vpop.f32.mrf.mxu1  ;;  %v3903_v33 = vmul.f32 %v3609_v34, %v3609_v34 }
 0x20f   : > { %4530 = vst [vmem:[%s6229_s10 + $0x68] sm:$0xff] %v4491_v41   ;;  %v4486_v12 = vpack.c.bf16 %v3607_v16, %v3606_v62  ;;  %v3901_v54 = vmul.f32 %v3607_v16, %v3607_v16  ;;  %v3240_v32 = vadd.f32 %v3165_v0, %v2870_v37  ;;  %v3862_v35 = vadd.f32 %v3861_v55, %v3607_v16  ;;  %v5180_v39 = vpop.f32.mrf.mxu0 }
 0x210   : > { %v3931_v5 = vadd.f32 %v3930_v11, %v3900_v46  ;;  %v5132_v43 = vpop.f32.mrf.mxu1  ;;  %v3612_v17 = vadd.f32 %v5179_v14, %v3242_v9 }
 0x211   : > { %4529 = vst [vmem:[%s6229_s10 + $0x60] sm:$0xff] %v4486_v12   ;;  %v3243_v44 = vadd.f32 %v5132_v43, %v2873_v25  ;;  %v3863_v2 = vadd.f32 %v3862_v35, %v3608_v1  ;;  %v3610_v8 = vadd.f32 %v3535_v21, %v3240_v32  ;;  %v3538_v26 = vpop.f32.mrf.mxu0 }
 0x212   : > { %v3932_v10 = vadd.f32 %v3931_v5, %v3901_v54  ;;  %v3168_v22 = vpop.f32.mrf.mxu1  ;;  %v3906_v60 = vmul.f32 %v3612_v17, %v3612_v17 }
 0x213   : > { %v3613_v20 = vadd.f32 %v5180_v39, %v3243_v44  ;;  %v3241_v58 = vadd.f32 %v3168_v22, %v2871_v27  ;;  %v3864_v52 = vadd.f32 %v3863_v2, %v3609_v34  ;;  %v3904_v47 = vmul.f32 %v3610_v8, %v3610_v8 }
 0x214   : > { %v3933_v36 = vadd.f32 %v3932_v10, %v3902_v59 }
 0x215   : > { %v4501_v24 = vpack.c.bf16 %v3613_v20, %v3612_v17  ;;  %v3611_v6 = vadd.f32 %v3538_v26, %v3241_v58  ;;  %v3865_v45 = vadd.f32 %v3864_v52, %v3610_v8  ;;  %v3907_v40 = vmul.f32 %v3613_v20, %v3613_v20 }
 0x216   : > { %v3934_v23 = vadd.f32 %v3933_v36, %v3903_v33 }
 0x217   : > { %4532 = vst [vmem:[%s6229_s10 + $0x78] sm:$0xff] %v4501_v24   ;;  %v4496_v42 = vpack.c.bf16 %v3611_v6, %v3610_v8  ;;  %v3905_v50 = vmul.f32 %v3611_v6, %v3611_v6  ;;  %v3866_v53 = vadd.f32 %v3865_v45, %v3611_v6 }
 0x218   : > { %v3935_v49 = vadd.f32 %v3934_v23, %v3904_v47 }
 0x219   : > { %4531 = vst [vmem:[%s6229_s10 + $0x70] sm:$0xff] %v4496_v42   ;;  %v3867_v56 = vadd.f32 %v3866_v53, %v3612_v17 }
 0x21a   : > { %v3936_v18 = vadd.f32 %v3935_v49, %v3905_v50 }
 0x21b   : > { %v3868_v38 = vadd.f32 %v3867_v56, %v3613_v20 }
 0x21c   : > { %v3937_v19 = vadd.f32 %v3936_v18, %v3906_v60 }
 0x21d   : > { %v3869_v62 = vrot.slane %v3868_v38, 4 }
 0x21e   : > { %v3938_v15 = vadd.f32 %v3937_v19, %v3907_v40 }
 0x21f   : > { %v3870_v4 = vadd.f32 %v3869_v62, %v3868_v38 }
 0x220   : > { %v3939_v1 = vrot.slane %v3938_v15, 4 }
 0x221   : > { %v3871_v34 = vrot.slane %v3870_v4, 2 }
 0x222   : > { %v3940_v29 = vadd.f32 %v3939_v1, %v3938_v15 }
 0x223   : > { %v3872_v51 = vadd.f32 %v3871_v34, %v3870_v4 }
 0x224   : > { %v3941_v3 = vrot.slane %v3940_v29, 2 }
 0x225   : > { %v3873_v63 = vrot.slane %v3872_v51, 1 }
 0x226   : > { %v3942_v28 = vadd.f32 %v3941_v3, %v3940_v29 }
 0x227   : > { %v3874_v14 = vadd.f32 %v3873_v63, %v3872_v51 }
 0x228   : > { %v3943_v7 = vrot.slane %v3942_v28, 1 }
 0x229   : > { %3875 = vst [vmem:[%s226_s17] sm:$0x1] %v3874_v14 }
 0x22a   : > { %v3944_v37 = vadd.f32 %v3943_v7, %v3942_v28 }
 0x22c   : > { %3945 = vst [vmem:[%s226_s17 + $0x1] sm:$0x1] %v3944_v37 }
 0x22d PF: > { %s14_s14 = sadd.s32 1, %s5317_s14   ;;  %s6386_s12 = smov %s5313_s13 }
 0x22e   : > { %p11_p5 = scmp.ge.s32.totalorder %s14_s14, 4   ;;  %s6387_s13 = smov %s6389_s15 }
 0x230   :  { %13 = sbr.rel (!%p11_p5) target bundleno = 2 (0x2), region = 83 }

// kernel: up_forward.4
= control target key start
LH: loop header
LB: loop body
LE: loop exit
PB: predicated region body
PF: predicated region fallthrough
CT: control target
= control target key end

     0   :  { %s5516_s18 = smov 0   ;;  %s5518_s19 = smov 0   ;;  %s6765_s0 = inlined_call_operand.vmem [shape: bf16[2,16,16,128], index: 0, kind: input, shape index: {}]   ;;  %s6766_s1 = inlined_call_operand.vmem [shape: f32[1,128], index: 1, kind: input, shape index: {}]   ;;  %s6767_s2 = inlined_call_operand.vmem [shape: f32[1,128], index: 2, kind: input, shape index: {}]   ;;  %s6768_s3 = inlined_call_operand.vmem [shape: bf16[9,128,128], index: 3, kind: input, shape index: {}]   ;;  %s6769_s4 = inlined_call_operand.vmem [shape: bf16[2,16,16,128], index: 4, kind: output, shape index: {0}]   ;;  %s6770_s5 = inlined_call_operand.vmem [shape: f32[2,2,128], index: 5, kind: output, shape index: {1}]  }
   0x1   :  { %s5520_s20 = smov 0  }
   0x2 LB: > { %s28_s21 = sadd.s32 1, %s5478_s19  ;;  %p4248_p0 = scmp.ge.s32.totalorder %s5482_s20, 1  ;;  %s5482_s20 = sphi %s5520_s20, %s16_s20   ;;  %s5478_s19 = sphi %s5518_s19, %s6856_s19   ;;  %s5474_s18 = sphi %s5516_s18, %s6855_s18  }
   0x3   : > { %p30_p1 = scmp.ge.s32.totalorder %s28_s21, 2  ;;  %p215_p2 = scmp.lt.s32.totalorder %s5482_s20, 3 }
   0x5   : > { %s6858_s21 = smov (%p30_p1, %s28_s21), 0  ;;  %p216_p3 = pnand %p4248_p0, %p215_p2 }
   0x7   : > { %219 = sbr.rel (%p216_p3) target bundleno = 557 (0x22d), region = 36 }
   0xc   : > { %v5387_v0 = vld [vmem:[%s6768_s3 + $0x38] sm:$0xff]   ;;  %v5542_v1 = vld [vmem:[%s6768_s3 + $0x30] sm:$0xff]   ;;  %v5484_v2 = vmov 0.0   ;;  %p257_p4 = scmp.lt.s32.totalorder %s5474_s18, 1  ;;  %v5389_v3 = vld [vmem:[%s6768_s3 + $0x28] sm:$0xff]   ;;  %v5485_v4 = vmov 0.0|0.0  }
   0xd   : > { %282 = vst [vmem:[#allocation2] sm:$0xff] %v5484_v2  ;;  %283 = vst [vmem:[#allocation2 + $0x8] sm:$0xff] %v5484_v2  ;;  %4914 = vmatprep.subr.bf16.mxu0 %v5387_v0  ;;  %5346 = vmatprep.subr.bf16.mxu1 %v5387_v0  ;;  %v5390_v5 = vld [vmem:[%s6768_s3 + $0x20] sm:$0xff]   ;;  %v5391_v19 = vld [vmem:[%s6768_s3 + $0x18] sm:$0xff]  }
   0xe   : > { %284 = vst [vmem:[#allocation2 + $0x10] sm:$0x3] %v5484_v2  ;;  %285 = vst [vmem:[#allocation2 + $0x18] sm:$0xff] %v5484_v2  ;;  %4915 = vmatpush3.bf16.msra.mxu0 %v5387_v0  ;;  %5354 = vmatpush3.bf16.msra.mxu1 %v5387_v0  ;;  %s6860_s18 = smov (!%p257_p4, %s5474_s18), 1  ;;  %v5570_v7 = vld [vmem:[%s6766_s1] ss:$0 sm:$0xff] }
   0xf   : > { %286 = vst [vmem:[#allocation2 + $0x20] sm:$0xff] %v5484_v2  ;;  %287 = vst [vmem:[#allocation2 + $0x28] sm:$0x3] %v5484_v2  ;;  %4916 = vmatprep.subr.bf16.mxu0 %v5542_v1  ;;  %5347 = vmatprep.subr.bf16.mxu1 %v5542_v1  ;;  %s4490_s28 = sshll.u32 %s6860_s18, 7  ;;  %v5577_v12 = vld [vmem:[%s6767_s2] ss:$0 sm:$0xff] }
  0x10   : > { %288 = vst [vmem:[#allocation2 + $0x30] sm:$0xff] %v5484_v2  ;;  %289 = vst [vmem:[#allocation2 + $0x38] sm:$0xff] %v5484_v2  ;;  %4930 = vmatprep.mubr.bf16.mxu0 %v5485_v4  ;;  %s5559_s6 = scalar_lea.vmem %s6765_s0, %s4490_s28  ;;  %v5392_v38 = vld [vmem:[%s6768_s3 + $0x10] sm:$0xff]   ;;  %v5393_v56 = vld [vmem:[%s6768_s3 + $0x8] sm:$0xff]   ;;  %s6670_s14 = scalar_lea.vmem %s6769_s4, %s4490_s28 }
  0x11   : > { %290 = vst [vmem:[#allocation2 + $0x40] sm:$0x3] %v5484_v2  ;;  %291 = vst [vmem:[#allocation2 + $0x48] sm:$0xff] %v5484_v2  ;;  %v4674_v6 = vld [vmem:[%s5559_s6 + $0x38] sm:$0xff]   ;;  %v4525_v10 = vld [vmem:[%s5559_s6] sm:$0xff]   ;;  %s4253_s28 = sshll.u32 %s6860_s18, 1 }
  0x12   : > { %292 = vst [vmem:[#allocation2 + $0x50] sm:$0xff] %v5484_v2  ;;  %293 = vst [vmem:[#allocation2 + $0x58] sm:$0x3] %v5484_v2  ;;  %4917 = vmatpush3.bf16.msra.mxu0 %v5542_v1  ;;  %5355 = vmatpush3.bf16.msra.mxu1 %v5542_v1  ;;  %v4554_v8 = vunpack.c.l.bf16 %v4674_v6  ;;  %v4555_v9 = vunpack.c.h.bf16 %v4674_v6  ;;  %v4675_v11 = vld [vmem:[%s5559_s6 + $0x40] sm:$0xff]   ;;  %v4526_v13 = vunpack.c.l.bf16 %v4525_v10  ;;  %v4527_v14 = vunpack.c.h.bf16 %v4525_v10  ;;  %v4668_v26 = vld [vmem:[%s5559_s6 + $0x8] sm:$0xff]   ;;  %s280_s17 = scalar_lea.vmem %s6770_s5, %s4253_s28 }
  0x13   : > { %294 = vst [vmem:[#allocation2 + $0x60] sm:$0xff] %v5484_v2  ;;  %295 = vst [vmem:[#allocation2 + $0x68] sm:$0xff] %v5484_v2  ;;  %4918 = vmatprep.subr.bf16.mxu0 %v5389_v3  ;;  %5348 = vmatprep.subr.bf16.mxu1 %v5389_v3  ;;  %v4558_v15 = vunpack.c.l.bf16 %v4675_v11  ;;  %v4559_v16 = vunpack.c.h.bf16 %v4675_v11  ;;  %v4530_v30 = vunpack.c.l.bf16 %v4668_v26  ;;  %v4676_v31 = vld [vmem:[%s5559_s6 + $0x48] sm:$0xff]   ;;  %v4669_v32 = vld [vmem:[%s5559_s6 + $0x10] sm:$0xff]   ;;  %v4531_v37 = vunpack.c.h.bf16 %v4668_v26 }
  0x14   : > { %296 = vst [vmem:[#allocation2 + $0x70] sm:$0x3] %v5484_v2  ;;  %297 = vst [vmem:[#allocation2 + $0x78] sm:$0xff] %v5484_v2  ;;  %v421_v17 = vmul.f32 %v4554_v8, %v5570_v7  ;;  %v422_v18 = vmul.f32 %v4555_v9, %v5570_v7  ;;  %v407_v20 = vmul.f32 %v4526_v13, %v5570_v7  ;;  %v4677_v33 = vld [vmem:[%s5559_s6 + $0x50] sm:$0xff]   ;;  %v4562_v45 = vunpack.c.l.bf16 %v4676_v31  ;;  %v4670_v55 = vld [vmem:[%s5559_s6 + $0x18] sm:$0xff]  }
  0x15   : > { %298 = vst [vmem:[#allocation2 + $0x80] sm:$0xff] %v5484_v2  ;;  %299 = vst [vmem:[#allocation2 + $0x88] sm:$0x3] %v5484_v2  ;;  %v408_v21 = vmul.f32 %v4527_v14, %v5570_v7  ;;  %v423_v22 = vmul.f32 %v4558_v15, %v5570_v7  ;;  %v424_v25 = vmul.f32 %v4559_v16, %v5570_v7  ;;  %v4563_v46 = vunpack.c.h.bf16 %v4676_v31  ;;  %v4678_v1 = vld [vmem:[%s5559_s6 + $0x58] sm:$0xff]   ;;  %v4671_v8 = vld [vmem:[%s5559_s6 + $0x20] sm:$0xff]  }
  0x16   : > { %300 = vst [vmem:[#allocation2 + $0x90] sm:$0xff] %v5484_v2  ;;  %301 = vst [vmem:[#allocation2 + $0x98] sm:$0xff] %v5484_v2  ;;  %4919 = vmatpush3.bf16.msra.mxu0 %v5389_v3  ;;  %5356 = vmatpush3.bf16.msra.mxu1 %v5389_v3  ;;  %v5588_v23 = vadd.f32 %v5577_v12, %v421_v17  ;;  %v5591_v24 = vadd.f32 %v5577_v12, %v422_v18  ;;  %v4534_v48 = vunpack.c.l.bf16 %v4669_v32 }
  0x17   : > { %302 = vst [vmem:[#allocation2 + $0xa0] sm:$0x3] %v5484_v2  ;;  %303 = vst [vmem:[#allocation2 + $0xa8] sm:$0xff] %v5484_v2  ;;  %4920 = vmatprep.subr.bf16.mxu0 %v5390_v5  ;;  %5349 = vmatprep.subr.bf16.mxu1 %v5390_v5  ;;  %v5596_v27 = vadd.f32 %v5577_v12, %v407_v20  ;;  %v5599_v28 = vadd.f32 %v5577_v12, %v408_v21  ;;  %v4535_v49 = vunpack.c.h.bf16 %v4669_v32  ;;  %v4679_v20 = vld [vmem:[%s5559_s6 + $0x60] sm:$0xff]  }
  0x18   : > { %304 = vst [vmem:[#allocation2 + $0xb0] sm:$0xff] %v5484_v2  ;;  %305 = vst [vmem:[#allocation2 + $0xb8] sm:$0x3] %v5484_v2  ;;  %v5602_v29 = vadd.f32 %v5577_v12, %v423_v22  ;;  %v492_v34 = vmax.f32 %v5588_v23, 0.0  ;;  %v493_v35 = vmax.f32 %v5591_v24, 0.0  ;;  %v5610_v36 = vadd.f32 %v5577_v12, %v424_v25 }
  0x19   : > { %306 = vst [vmem:[#allocation2 + $0xc0] sm:$0xff] %v5484_v2  ;;  %307 = vst [vmem:[#allocation2 + $0xc8] sm:$0xff] %v5484_v2  ;;  %v6781_v39 = vmax.f32 %v5596_v27, 0.0  ;;  %v6780_v40 = vmax.f32 %v5599_v28, 0.0  ;;  %v409_v42 = vmul.f32 %v4530_v30, %v5570_v7  ;;  %v410_v44 = vmul.f32 %v4531_v37, %v5570_v7 }
  0x1a   : > { %308 = vst [vmem:[#allocation2 + $0xd0] sm:$0x3] %v5484_v2  ;;  %309 = vst [vmem:[#allocation2 + $0xd8] sm:$0xff] %v5484_v2  ;;  %4921 = vmatpush3.bf16.msra.mxu0 %v5390_v5  ;;  %5357 = vmatpush3.bf16.msra.mxu1 %v5390_v5  ;;  %v494_v41 = vmax.f32 %v5602_v29, 0.0  ;;  %v495_v43 = vmax.f32 %v5610_v36, 0.0  ;;  %v4566_v50 = vunpack.c.l.bf16 %v4677_v33  ;;  %v425_v52 = vmul.f32 %v4562_v45, %v5570_v7 }
  0x1b   : > { %310 = vst [vmem:[#allocation2 + $0xe0] sm:$0xff] %v5484_v2  ;;  %311 = vst [vmem:[#allocation2 + $0xe8] sm:$0x3] %v5484_v2  ;;  %4922 = vmatprep.subr.bf16.mxu0 %v5391_v19  ;;  %5350 = vmatprep.subr.bf16.mxu1 %v5391_v19  ;;  %v5632_v47 = vadd.f32 %v5577_v12, %v409_v42  ;;  %v5637_v51 = vadd.f32 %v5577_v12, %v410_v44  ;;  %v4567_v54 = vunpack.c.h.bf16 %v4677_v33 }
  0x1c   : > { %312 = vst [vmem:[#allocation2 + $0xf0] sm:$0xff] %v5484_v2  ;;  %313 = vst [vmem:[#allocation2 + $0xf8] sm:$0xff] %v5484_v2  ;;  %v426_v53 = vmul.f32 %v4563_v46, %v5570_v7  ;;  %v411_v58 = vmul.f32 %v4534_v48, %v5570_v7  ;;  %v412_v59 = vmul.f32 %v4535_v49, %v5570_v7  ;;  %v4538_v6 = vunpack.c.l.bf16 %v4670_v55 }
  0x1d   : > { %314 = vst [vmem:[#allocation2 + $0x100] sm:$0x3] %v5484_v2  ;;  %315 = vst [vmem:[#allocation2 + $0x108] sm:$0xff] %v5484_v2  ;;  %v6779_v57 = vmax.f32 %v5632_v47, 0.0  ;;  %v427_v60 = vmul.f32 %v4566_v50, %v5570_v7  ;;  %v6777_v61 = vmax.f32 %v5637_v51, 0.0  ;;  %v5651_v62 = vadd.f32 %v5577_v12, %v425_v52  ;;  %v4672_v50 = vld [vmem:[%s5559_s6 + $0x28] sm:$0xff]  }
  0x1e   : > { %316 = vst [vmem:[#allocation2 + $0x110] sm:$0xff] %v5484_v2  ;;  %317 = vst [vmem:[#allocation2 + $0x118] sm:$0x3] %v5484_v2  ;;  %4923 = vmatpush3.bf16.msra.mxu0 %v5391_v19  ;;  %5358 = vmatpush3.bf16.msra.mxu1 %v5391_v19  ;;  %v5654_v63 = vadd.f32 %v5577_v12, %v426_v53  ;;  %v428_v0 = vmul.f32 %v4567_v54, %v5570_v7  ;;  %v4539_v13 = vunpack.c.h.bf16 %v4670_v55  ;;  %v5395_v52 = vld [vmem:[%s6768_s3 + $0x78] sm:$0xff]  }
  0x1f   : > { %318 = vst [vmem:[#allocation2 + $0x120] sm:$0xff] %v5484_v2  ;;  %319 = vst [vmem:[#allocation2 + $0x128] sm:$0xff] %v5484_v2  ;;  %4924 = vmatprep.subr.bf16.mxu0 %v5392_v38  ;;  %5351 = vmatprep.subr.bf16.mxu1 %v5392_v38  ;;  %v5666_v3 = vadd.f32 %v5577_v12, %v411_v58  ;;  %v5669_v4 = vadd.f32 %v5577_v12, %v412_v59  ;;  %v496_v9 = vmax.f32 %v5651_v62, 0.0  ;;  %v5396_v53 = vld [vmem:[%s6768_s3 + $0xb8] sm:$0xff]   ;;  %v5407_v62 = vld [vmem:[%s6768_s3 + $0x48] sm:$0xff]  }
  0x20   : > { %320 = vst [vmem:[#allocation2 + $0x130] sm:$0x3] %v5484_v2  ;;  %321 = vst [vmem:[#allocation2 + $0x138] sm:$0xff] %v5484_v2  ;;  %v5672_v5 = vadd.f32 %v5577_v12, %v427_v60  ;;  %v497_v10 = vmax.f32 %v5654_v63, 0.0  ;;  %v5680_v11 = vadd.f32 %v5577_v12, %v428_v0  ;;  %v413_v19 = vmul.f32 %v4538_v6, %v5570_v7 }
  0x21   : > { %322 = vst [vmem:[#allocation2 + $0x140] sm:$0xff] %v5484_v2  ;;  %323 = vst [vmem:[#allocation2 + $0x148] sm:$0x3] %v5484_v2  ;;  %v6776_v16 = vmax.f32 %v5666_v3, 0.0  ;;  %v6775_v17 = vmax.f32 %v5669_v4, 0.0  ;;  %v414_v31 = vmul.f32 %v4539_v13, %v5570_v7  ;;  %v4570_v32 = vunpack.c.l.bf16 %v4678_v1  ;;  %v5739_v13 = vld [vmem:[%s6768_s3 + $0x70] sm:$0xff]  }
  0x22   : > { %324 = vst [vmem:[#allocation2 + $0x150] sm:$0xff] %v5484_v2  ;;  %325 = vst [vmem:[#allocation2 + $0x158] sm:$0xff] %v5484_v2  ;;  %4925 = vmatpush3.bf16.msra.mxu0 %v5392_v38  ;;  %5359 = vmatpush3.bf16.msra.mxu1 %v5392_v38  ;;  %v498_v18 = vmax.f32 %v5672_v5, 0.0  ;;  %v499_v30 = vmax.f32 %v5680_v11, 0.0  ;;  %v5706_v38 = vadd.f32 %v5577_v12, %v413_v19  ;;  %v4571_v42 = vunpack.c.h.bf16 %v4678_v1  ;;  %v848_v11 = vld [vmem:[#allocation2 + $0x1] sm:$0xff] }
  0x23   : > { %326 = vst [vmem:[#allocation2 + $0x160] sm:$0x3] %v5484_v2  ;;  %327 = vst [vmem:[#allocation2 + $0x168] sm:$0xff] %v5484_v2  ;;  %4926 = vmatprep.subr.bf16.mxu0 %v5393_v56  ;;  %5352 = vmatprep.subr.bf16.mxu1 %v5393_v56  ;;  %v4542_v44 = vunpack.c.l.bf16 %v4671_v8  ;;  %v5713_v46 = vadd.f32 %v5577_v12, %v414_v31  ;;  %v429_v48 = vmul.f32 %v4570_v32, %v5570_v7 }
  0x24   : > { %328 = vst [vmem:[#allocation2 + $0x170] sm:$0xff] %v5484_v2  ;;  %329 = vst [vmem:[#allocation2 + $0x178] sm:$0x3] %v5484_v2  ;;  %v4543_v49 = vunpack.c.h.bf16 %v4671_v8  ;;  %v6772_v54 = vmax.f32 %v5706_v38, 0.0  ;;  %v430_v55 = vmul.f32 %v4571_v42, %v5570_v7  ;;  %v4574_v58 = vunpack.c.l.bf16 %v4679_v20  ;;  %v5734_v8 = vld [vmem:[%s5559_s6 + $0x68] sm:$0xff]  }
  0x25   : > { %330 = vst [vmem:[#allocation2 + $0x180] sm:$0xff] %v5484_v2  ;;  %331 = vst [vmem:[#allocation2 + $0x188] sm:$0xff] %v5484_v2  ;;  %v6771_v60 = vmax.f32 %v5713_v46, 0.0  ;;  %v5730_v0 = vadd.f32 %v5577_v12, %v429_v48  ;;  %v4575_v6 = vunpack.c.h.bf16 %v4679_v20  ;;  %v5896_v23 = vpack.c.bf16 %v497_v10, %v496_v9 }
  0x26   : > { %332 = vst [vmem:[#allocation2 + $0x190] sm:$0x3] %v5484_v2  ;;  %333 = vst [vmem:[#allocation2 + $0x198] sm:$0xff] %v5484_v2  ;;  %4927 = vmatpush3.bf16.msra.mxu0 %v5393_v56  ;;  %5360 = vmatpush3.bf16.msra.mxu1 %v5393_v56  ;;  %v415_v56 = vmul.f32 %v4542_v44, %v5570_v7  ;;  %v416_v1 = vmul.f32 %v4543_v49, %v5570_v7 }
  0x27   : > { %334 = vst [vmem:[#allocation2 + $0x1a0] sm:$0xff] %v5484_v2  ;;  %335 = vst [vmem:[#allocation2 + $0x1a8] sm:$0x3] %v5484_v2  ;;  %v5661_v2 = vld [vmem:[%s6768_s3] sm:$0xff]   ;;  %v5749_v19 = vadd.f32 %v5577_v12, %v430_v55  ;;  %v432_v32 = vmul.f32 %v4575_v6, %v5570_v7  ;;  %v4547_v55 = vunpack.c.h.bf16 %v4672_v50  ;;  %v5902_v24 = vpack.c.bf16 %v499_v30, %v498_v18 }
  0x28   : > { %525 = vst [vmem:[#allocation2 + $0xc1] sm:$0xff] %v492_v34  ;;  %526 = vst [vmem:[#allocation2 + $0xc9] sm:$0xff] %v493_v35  ;;  %4928 = vmatprep.subr.bf16.mxu0 %v5661_v2  ;;  %5353 = vmatprep.subr.bf16.mxu1 %v5661_v2  ;;  %v5752_v20 = vadd.f32 %v5577_v12, %v415_v56  ;;  %v5763_v31 = vadd.f32 %v5577_v12, %v416_v1  ;;  %v4681_v56 = vld [vmem:[%s5559_s6 + $0x70] sm:$0xff]  }
  0x29   : > { %511 = vst [vmem:[#allocation2 + $0x19] sm:$0xff] %v6781_v39  ;;  %512 = vst [vmem:[#allocation2 + $0x21] sm:$0xff] %v6780_v40  ;;  %v501_v48 = vmax.f32 %v5749_v19, 0.0  ;;  %v1218_v19 = vld [vmem:[#allocation2 + $0x2] sm:$0xff] }
  0x2a   : > { %527 = vst [vmem:[#allocation2 + $0xd9] sm:$0xff] %v494_v41  ;;  %528 = vst [vmem:[#allocation2 + $0xe1] sm:$0xff] %v495_v43  ;;  %4929 = vmatpush3.bf16.msra.mxu0 %v5661_v2  ;;  %5361 = vmatpush3.bf16.msra.mxu1 %v5661_v2  ;;  %v6774_v2 = vmax.f32 %v5752_v20, 0.0  ;;  %v6773_v6 = vmax.f32 %v5763_v31, 0.0 }
  0x2b   : > { %513 = vst [vmem:[#allocation2 + $0x31] sm:$0xff] %v6779_v57  ;;  %514 = vst [vmem:[#allocation2 + $0x39] sm:$0xff] %v6777_v61  ;;  %4962 = vmatprep.subr.bf16.mxu1 %v5395_v52  ;;  %5010 = vmatprep.subr.bf16.mxu0 %v5396_v53 }
  0x2c   : > { %529 = vst [vmem:[#allocation2 + $0xf1] sm:$0xff] %v496_v9  ;;  %530 = vst [vmem:[#allocation2 + $0xf9] sm:$0xff] %v497_v10 }
  0x2d   : > { %515 = vst [vmem:[#allocation2 + $0x49] sm:$0xff] %v6776_v16  ;;  %516 = vst [vmem:[#allocation2 + $0x51] sm:$0xff] %v6775_v17  ;;  %v4583_v17 = vunpack.c.h.bf16 %v4681_v56 }
  0x2e   : > { %531 = vst [vmem:[#allocation2 + $0x109] sm:$0xff] %v498_v18  ;;  %532 = vst [vmem:[#allocation2 + $0x111] sm:$0xff] %v499_v30  ;;  %v849_v30 = vld [vmem:[#allocation2 + $0x9] sm:$0xff] }
  0x2f   : > { %v559_v14 = vld [vmem:[#allocation2 + $0xc0] sm:$0xff]  ;;  %v560_v15 = vld [vmem:[#allocation2 + $0xc8] sm:$0xff]  ;;  %517 = vst [vmem:[#allocation2 + $0x61] sm:$0xff] %v6772_v54  ;;  %518 = vst [vmem:[#allocation2 + $0x69] sm:$0xff] %v6771_v60  ;;  %v5779_v60 = vadd.f32 %v5577_v12, %v432_v32  ;;  %v4578_v32 = vunpack.c.l.bf16 %v5734_v8 }
  0x30   : > { %v583_v21 = vpack.c.bf16 %v560_v15, %v559_v14  ;;  %v545_v22 = vld [vmem:[#allocation2 + $0x18] sm:$0xff]  ;;  %v546_v25 = vld [vmem:[#allocation2 + $0x20] sm:$0xff]  ;;  %v5744_v14 = vld [vmem:[%s6768_s3 + $0xb0] sm:$0xff]   ;;  %534 = vst [vmem:[#allocation2 + $0x129] sm:$0xff] %v501_v48 }
  0x31   : > { %v5687_v26 = vld [vmem:[#allocation2 + $0xd8] sm:$0xff]  ;;  %v5695_v33 = vpack.c.bf16 %v546_v25, %v545_v22  ;;  %v5697_v37 = vld [vmem:[#allocation2 + $0xe0] sm:$0xff]  ;;  %v4546_v22 = vunpack.c.l.bf16 %v4672_v50  ;;  %519 = vst [vmem:[#allocation2 + $0x79] sm:$0xff] %v6774_v2  ;;  %520 = vst [vmem:[#allocation2 + $0x81] sm:$0xff] %v6773_v6  ;;  %v4582_v2 = vunpack.c.l.bf16 %v4681_v56 }
  0x32   : > { %v584_v45 = vpack.c.bf16 %v5697_v37, %v5687_v26  ;;  %4946 = vmatprep.mubr.bf16.mxu1 %v583_v21  ;;  %v547_v59 = vld [vmem:[#allocation2 + $0x30] sm:$0xff]  ;;  %v548_v15 = vld [vmem:[#allocation2 + $0x38] sm:$0xff]  ;;  %v431_v21 = vmul.f32 %v4574_v58, %v5570_v7  ;;  %v500_v26 = vmax.f32 %v5730_v0, 0.0 }
  0x33   : > { %v5757_v25 = vpack.c.bf16 %v548_v15, %v547_v59  ;;  %v4673_v37 = vld [vmem:[%s5559_s6 + $0x30] sm:$0xff]   ;;  %v564_v44 = vld [vmem:[#allocation2 + $0xf8] sm:$0xff]  ;;  %v417_v54 = vmul.f32 %v4546_v22, %v5570_v7  ;;  %4931 = vmatmul.mubr.bf16.vlgmr.msra.gmra.mxu0 %v5695_v33 }
  0x34   : > { %v563_v42 = vld [vmem:[#allocation2 + $0xf0] sm:$0xff]  ;;  %v5770_v49 = vadd.f32 %v5577_v12, %v431_v21  ;;  %v549_v59 = vld [vmem:[#allocation2 + $0x48] sm:$0xff]  ;;  %533 = vst [vmem:[#allocation2 + $0x121] sm:$0xff] %v500_v26  ;;  %4947 = vmatmul.mubr.bf16.vlgmr.msra.gmra.mxu1 %v584_v45  ;;  %5011 = vmatpush3.bf16.msra.mxu0 %v5396_v53  ;;  %v503_v45 = vmax.f32 %v5779_v60, 0.0 }
  0x35   : > { %v585_v58 = vpack.c.bf16 %v564_v44, %v563_v42  ;;  %v550_v1 = vld [vmem:[#allocation2 + $0x50] sm:$0xff]  ;;  %v5773_v15 = vld [vmem:[#allocation2 + $0x108] sm:$0xff]  ;;  %v418_v44 = vmul.f32 %v4547_v55, %v5570_v7  ;;  %4963 = vmatpush3.bf16.msra.mxu1 %v5395_v52  ;;  %5012 = vmatprep.subr.bf16.mxu0 %v5744_v14  ;;  %v4550_v55 = vunpack.c.l.bf16 %v4673_v37 }
  0x36   : > { %v5783_v50 = vpack.c.bf16 %v550_v1, %v549_v59  ;;  %v566_v21 = vld [vmem:[#allocation2 + $0x110] sm:$0xff]  ;;  %v502_v42 = vmax.f32 %v5770_v49, 0.0  ;;  %v5797_v59 = vadd.f32 %v5577_v12, %v417_v54  ;;  %v4579_v1 = vunpack.c.h.bf16 %v5734_v8  ;;  %4964 = vmatprep.subr.bf16.mxu1 %v5739_v13  ;;  %v5399_v52 = vld [vmem:[%s6768_s3 + $0x68] sm:$0xff]   ;;  %4934 = vmatprep.mubr.bf16.mxu0 %v5757_v25  ;;  %536 = vst [vmem:[#allocation2 + $0x141] sm:$0xff] %v503_v45  ;;  %v551_v16 = vld [vmem:[#allocation2 + $0x60] sm:$0xff] }
  0x37   : > { %v586_v22 = vpack.c.bf16 %v566_v21, %v5773_v15  ;;  %v5400_v53 = vld [vmem:[%s6768_s3 + $0xa8] sm:$0xff]   ;;  %v5811_v54 = vadd.f32 %v5577_v12, %v418_v44  ;;  %v433_v8 = vmul.f32 %v4578_v32, %v5570_v7  ;;  %v4551_v15 = vunpack.c.h.bf16 %v4673_v37  ;;  %4950 = vmatprep.mubr.bf16.mxu1 %v585_v58  ;;  %v5410_v49 = vld [vmem:[%s6768_s3 + $0x80] sm:$0xff]  }
  0x38   : > { %535 = vst [vmem:[#allocation2 + $0x139] sm:$0xff] %v502_v42  ;;  %v6778_v21 = vmax.f32 %v5797_v59, 0.0  ;;  %v434_v6 = vmul.f32 %v4579_v1, %v5570_v7  ;;  %v552_v61 = vld [vmem:[#allocation2 + $0x68] sm:$0xff]  ;;  %v419_v37 = vmul.f32 %v4550_v55, %v5570_v7  ;;  %5013 = vmatpush3.bf16.msra.mxu0 %v5744_v14  ;;  %v435_v1 = vmul.f32 %v4582_v2, %v5570_v7  ;;  %v5402_v55 = vld [vmem:[%s6768_s3 + $0xa0] sm:$0xff]  }
  0x39   : > { %v6782_v44 = vmax.f32 %v5811_v54, 0.0  ;;  %v5821_v32 = vadd.f32 %v5577_v12, %v433_v8  ;;  %v420_v58 = vmul.f32 %v4551_v15, %v5570_v7  ;;  %4965 = vmatpush3.bf16.msra.mxu1 %v5739_v13  ;;  %5014 = vmatprep.subr.bf16.mxu0 %v5400_v53  ;;  %v5401_v8 = vld [vmem:[%s6768_s3 + $0x60] sm:$0xff]   ;;  %v436_v15 = vmul.f32 %v4583_v17, %v5570_v7  ;;  %v5404_v17 = vld [vmem:[%s6768_s3 + $0x98] sm:$0xff]  }
  0x3a   : > { %521 = vst [vmem:[#allocation2 + $0x91] sm:$0xff] %v6778_v21  ;;  %v473_v56 = vadd.f32 %v5577_v12, %v434_v6  ;;  %4966 = vmatprep.subr.bf16.mxu1 %v5399_v52  ;;  %v5841_v6 = vadd.f32 %v5577_v12, %v419_v37  ;;  %v5847_v21 = vpack.c.bf16 %v552_v61, %v551_v16  ;;  %v5403_v37 = vld [vmem:[%s6768_s3 + $0x58] sm:$0xff]  }
  0x3b   : > { %v567_v13 = vld [vmem:[#allocation2 + $0x120] sm:$0xff]  ;;  %522 = vst [vmem:[#allocation2 + $0x99] sm:$0xff] %v6782_v44  ;;  %v504_v14 = vmax.f32 %v5821_v32, 0.0  ;;  %v5844_v2 = vadd.f32 %v5577_v12, %v420_v58  ;;  %v568_v57 = vld [vmem:[#allocation2 + $0x128] sm:$0xff]  ;;  %v474_v39 = vadd.f32 %v5577_v12, %v435_v1  ;;  %4935 = vmatmul.mubr.bf16.gmra.mxu0 %v5783_v50  ;;  %v553_v32 = vld [vmem:[#allocation2 + $0x78] sm:$0xff]  ;;  %v475_v58 = vadd.f32 %v5577_v12, %v436_v15 }
  0x3c   : > { %v505_v40 = vmax.f32 %v473_v56, 0.0  ;;  %4951 = vmatmul.mubr.bf16.gmra.mxu1 %v586_v22  ;;  %v5851_v44 = vpack.c.bf16 %v568_v57, %v567_v13  ;;  %v6783_v61 = vmax.f32 %v5841_v6, 0.0  ;;  %5015 = vmatpush3.bf16.msra.mxu0 %v5400_v53  ;;  %v554_v57 = vld [vmem:[#allocation2 + $0x80] sm:$0xff] }
  0x3d   : > { %537 = vst [vmem:[#allocation2 + $0x151] sm:$0xff] %v504_v14  ;;  %v491_v16 = vmax.f32 %v5844_v2, 0.0  ;;  %4967 = vmatpush3.bf16.msra.mxu1 %v5399_v52  ;;  %v506_v56 = vmax.f32 %v474_v39, 0.0  ;;  %5016 = vmatprep.subr.bf16.mxu0 %v5402_v55  ;;  %v507_v13 = vmax.f32 %v475_v58, 0.0  ;;  %v5868_v52 = vpack.c.bf16 %v554_v57, %v553_v32  ;;  %v5405_v39 = vld [vmem:[%s6768_s3 + $0x50] sm:$0xff]   ;;  %v1236_v2 = vld [vmem:[#allocation2 + $0xda] sm:$0xff] }
  0x3e   : > { %538 = vst [vmem:[#allocation2 + $0x159] sm:$0xff] %v505_v40  ;;  %4968 = vmatprep.subr.bf16.mxu1 %v5401_v8  ;;  %523 = vst [vmem:[#allocation2 + $0xa9] sm:$0xff] %v6783_v61  ;;  %4938 = vmatprep.mubr.bf16.mxu0 %v5847_v21  ;;  %v5879_v58 = vpack.c.bf16 %v493_v35, %v492_v34  ;;  %v5885_v32 = vpack.c.bf16 %v495_v43, %v494_v41  ;;  %v1222_v57 = vld [vmem:[#allocation2 + $0x32] sm:$0xff] }
  0x3f   : > { %v569_v22 = vld [vmem:[#allocation2 + $0x138] sm:$0xff]  ;;  %v570_v1 = vld [vmem:[#allocation2 + $0x140] sm:$0xff]  ;;  %524 = vst [vmem:[#allocation2 + $0xb1] sm:$0xff] %v491_v16  ;;  %4954 = vmatprep.mubr.bf16.mxu1 %v5851_v44  ;;  %539 = vst [vmem:[#allocation2 + $0x169] sm:$0xff] %v506_v56  ;;  %v5908_v34 = vpack.c.bf16 %v501_v48, %v500_v26  ;;  %v5914_v35 = vpack.c.bf16 %v503_v45, %v502_v42  ;;  %v5916_v36 = vpack.c.bf16 %v505_v40, %v504_v14 }
  0x40   : > { %v5870_v53 = vpack.c.bf16 %v570_v1, %v569_v22  ;;  %540 = vst [vmem:[#allocation2 + $0x171] sm:$0xff] %v507_v13  ;;  %5017 = vmatpush3.bf16.msra.mxu0 %v5402_v55  ;;  %v5918_v41 = vpack.c.bf16 %v507_v13, %v506_v56  ;;  %v5408_v40 = vld [vmem:[%s6768_s3 + $0x88] sm:$0xff]   ;;  %v5409_v48 = vld [vmem:[%s6768_s3 + $0x40] sm:$0xff]   ;;  %v880_v42 = vpack.c.bf16 %v849_v30, %v848_v11  ;;  %v6784_v56 = vmax.f32 %v5596_v27, 0.0  ;;  %v1225_v27 = vld [vmem:[#allocation2 + $0x52] sm:$0xff] }
  0x41   : > { %v555_v15 = vld [vmem:[#allocation2 + $0x90] sm:$0xff]  ;;  %4969 = vmatpush3.bf16.msra.mxu1 %v5401_v8  ;;  %5018 = vmatprep.subr.bf16.mxu0 %v5404_v17  ;;  %v1220_v14 = vld [vmem:[#allocation2 + $0x1a] sm:$0xff]  ;;  %v6785_v1 = vmax.f32 %v5599_v28, 0.0  ;;  %v6789_v11 = vmax.f32 %v5669_v4, 0.0 }
  0x42   : > { %v556_v61 = vld [vmem:[#allocation2 + $0x98] sm:$0xff]  ;;  %4970 = vmatprep.subr.bf16.mxu1 %v5403_v37  ;;  %v5406_v8 = vld [vmem:[%s6768_s3 + $0x90] sm:$0xff]   ;;  %v5418_v4 = vld [vmem:[%s6768_s3 + $0x120] sm:$0xff]  }
  0x43   : > { %v5890_v55 = vpack.c.bf16 %v556_v61, %v555_v15  ;;  %4939 = vmatmul.mubr.bf16.gmra.mxu0 %v5868_v52  ;;  %v1219_v26 = vld [vmem:[#allocation2 + $0xa] sm:$0xff]  ;;  %v5412_v61 = vld [vmem:[%s6768_s3 + $0x138] sm:$0xff]   ;;  %v5954_v13 = vpack.c.bf16 %v6785_v1, %v6784_v56  ;;  %v6786_v15 = vmax.f32 %v5632_v47, 0.0  ;;  %v1226_v47 = vld [vmem:[#allocation2 + $0x62] sm:$0xff]  ;;  %v6794_v56 = vmax.f32 %v5797_v59, 0.0 }
  0x44   : > { %v571_v29 = vld [vmem:[#allocation2 + $0x150] sm:$0xff]  ;;  %4955 = vmatmul.mubr.bf16.gmra.mxu1 %v5870_v53  ;;  %5019 = vmatpush3.bf16.msra.mxu0 %v5404_v17  ;;  %v1250_v45 = vpack.c.bf16 %v1219_v26, %v1218_v19  ;;  %v5411_v17 = vld [vmem:[%s6768_s3 + $0xf8] sm:$0xff]   ;;  %v6790_v19 = vmax.f32 %v5706_v38, 0.0  ;;  %v6791_v26 = vmax.f32 %v5713_v46, 0.0  ;;  %v1229_v46 = vld [vmem:[#allocation2 + $0x82] sm:$0xff]  ;;  %v6795_v1 = vmax.f32 %v5811_v54, 0.0 }
  0x45   : > { %v572_v43 = vld [vmem:[#allocation2 + $0x158] sm:$0xff]  ;;  %4971 = vmatpush3.bf16.msra.mxu1 %v5403_v37  ;;  %v557_v5 = vld [vmem:[#allocation2 + $0xa8] sm:$0xff]  ;;  %5020 = vmatprep.subr.bf16.mxu0 %v5406_v8  ;;  %v5413_v28 = vld [vmem:[%s6768_s3 + $0xf0] sm:$0xff]  }
  0x46   : > { %v5925_v63 = vpack.c.bf16 %v572_v43, %v571_v29  ;;  %v558_v9 = vld [vmem:[#allocation2 + $0xb0] sm:$0xff]  ;;  %4972 = vmatprep.subr.bf16.mxu1 %v5405_v39  ;;  %v573_v10 = vld [vmem:[#allocation2 + $0x168] sm:$0xff]  ;;  %4942 = vmatprep.mubr.bf16.mxu0 %v5890_v55  ;;  %v1223_v22 = vld [vmem:[#allocation2 + $0x3a] sm:$0xff] }
  0x47   : > { %v574_v18 = vld [vmem:[#allocation2 + $0x170] sm:$0xff]  ;;  %v5932_v60 = vpack.c.bf16 %v558_v9, %v557_v5  ;;  %v1221_v37 = vld [vmem:[#allocation2 + $0x22] sm:$0xff]  ;;  %v5964_v43 = vpack.c.bf16 %v1223_v22, %v1222_v57  ;;  %v1228_v38 = vld [vmem:[#allocation2 + $0x7a] sm:$0xff] }
  0x48   : > { %4958 = vmatprep.mubr.bf16.mxu1 %v5925_v63  ;;  %v5934_v0 = vpack.c.bf16 %v574_v18, %v573_v10  ;;  %5021 = vmatpush3.bf16.msra.mxu0 %v5406_v8  ;;  %v6787_v8 = vmax.f32 %v5637_v51, 0.0  ;;  %v5414_v5 = vld [vmem:[%s6768_s3 + $0x130] sm:$0xff]   ;;  %v5415_v9 = vld [vmem:[%s6768_s3 + $0xe8] sm:$0xff]   ;;  %v6788_v10 = vmax.f32 %v5666_v3, 0.0  ;;  %v5417_v3 = vld [vmem:[%s6768_s3 + $0xe0] sm:$0xff]   ;;  %v6020_v22 = vpack.c.bf16 %v1229_v46, %v1228_v38 }
  0x49   : > { %4973 = vmatpush3.bf16.msra.mxu1 %v5405_v39  ;;  %5022 = vmatprep.subr.bf16.mxu0 %v5408_v40  ;;  %v5956_v39 = vpack.c.bf16 %v1221_v37, %v1220_v14  ;;  %v1227_v51 = vld [vmem:[#allocation2 + $0x6a] sm:$0xff]  ;;  %v5419_v14 = vld [vmem:[%s6768_s3 + $0xd8] sm:$0xff]  }
  0x4a   : > { %4974 = vmatprep.subr.bf16.mxu1 %v5407_v62  ;;  %v5962_v29 = vpack.c.bf16 %v6787_v8, %v6786_v15  ;;  %v5986_v18 = vpack.c.bf16 %v6789_v11, %v6788_v10  ;;  %v5420_v37 = vld [vmem:[%s6768_s3 + $0x118] sm:$0xff]   ;;  %v6026_v15 = vpack.c.bf16 %v6795_v1, %v6794_v56  ;;  %v1232_v59 = vld [vmem:[#allocation2 + $0xaa] sm:$0xff] }
  0x4b   : > { %4943 = vmatmul.mubr.bf16.gmra.mxu0 %v5932_v60  ;;  %v1233_v54 = vld [vmem:[#allocation2 + $0xb2] sm:$0xff]  ;;  %v1239_v46 = vld [vmem:[#allocation2 + $0xfa] sm:$0xff]  ;;  %v1240_v56 = vld [vmem:[#allocation2 + $0x10a] sm:$0xff] }
  0x4c   : > { %4959 = vmatmul.mubr.bf16.gmra.mxu1 %v5934_v0  ;;  %5023 = vmatpush3.bf16.msra.mxu0 %v5408_v40  ;;  %v5416_v40 = vld [vmem:[%s6768_s3 + $0x128] sm:$0xff]   ;;  %v4682_v10 = vld [vmem:[%s5559_s6 + $0x78] sm:$0xff]  }
  0x4d   : > { %4975 = vmatpush3.bf16.msra.mxu1 %v5407_v62  ;;  %5024 = vmatprep.subr.bf16.mxu0 %v5410_v49  ;;  %v1224_v62 = vld [vmem:[#allocation2 + $0x4a] sm:$0xff]  ;;  %v4586_v11 = vunpack.c.l.bf16 %v4682_v10  ;;  %v1238_v38 = vld [vmem:[#allocation2 + $0xf2] sm:$0xff] }
  0x4e   : > { %4976 = vmatprep.subr.bf16.mxu1 %v5409_v48  ;;  %4978 = vmatprep.mubr.bf16.mxu1 %v880_v42  ;;  %v5988_v30 = vpack.c.bf16 %v1225_v27, %v1224_v62  ;;  %v1230_v42 = vld [vmem:[#allocation2 + $0x92] sm:$0xff]  ;;  %v1234_v62 = vld [vmem:[#allocation2 + $0xc2] sm:$0xff]  ;;  %v1235_v27 = vld [vmem:[#allocation2 + $0xca] sm:$0xff] }
  0x4f   : > { %5026 = vmatprep.mubr.bf16.mxu0 %v1250_v45  ;;  %v1231_v45 = vld [vmem:[#allocation2 + $0x9a] sm:$0xff]  ;;  %v1241_v1 = vld [vmem:[#allocation2 + $0x112] sm:$0xff] }
  0x50   : > { %5025 = vmatpush3.bf16.msra.mxu0 %v5410_v49  ;;  %v5996_v49 = vpack.c.bf16 %v1227_v51, %v1226_v47  ;;  %v6028_v8 = vpack.c.bf16 %v1231_v45, %v1230_v42  ;;  %v6796_v47 = vmax.f32 %v5841_v6, 0.0  ;;  %v5426_v6 = vld [vmem:[%s6768_s3 + $0x100] sm:$0xff]  }
  0x51   : > { %4977 = vmatpush3.bf16.msra.mxu1 %v5409_v48  ;;  %5106 = vmatprep.subr.bf16.mxu0 %v5412_v61  ;;  %v5994_v48 = vpack.c.bf16 %v6791_v26, %v6790_v19  ;;  %v4587_v19 = vunpack.c.h.bf16 %v4682_v10  ;;  %v5425_v26 = vld [vmem:[%s6768_s3 + $0xc0] sm:$0xff]  }
  0x52   : > { %5058 = vmatprep.subr.bf16.mxu1 %v5411_v17  ;;  %v6050_v51 = vpack.c.bf16 %v491_v16, %v6796_v47  ;;  %v1237_v16 = vld [vmem:[#allocation2 + $0xe2] sm:$0xff]  ;;  %v1249_v47 = vld [vmem:[#allocation2 + $0x172] sm:$0xff] }
  0x53   : > { %5027 = vmatmul.mubr.bf16.vlgmr.msra.gmra.mxu0 %v5956_v39 }
  0x54   : > { %4979 = vmatmul.mubr.bf16.vlgmr.msra.gmra.mxu1 %v5954_v13  ;;  %5107 = vmatpush3.bf16.msra.mxu0 %v5412_v61  ;;  %v6793_v61 = vmax.f32 %v5763_v31, 0.0  ;;  %v5422_v31 = vld [vmem:[%s6768_s3 + $0x110] sm:$0xff]  }
  0x55   : > { %5059 = vmatpush3.bf16.msra.mxu1 %v5411_v17  ;;  %4982 = vmatprep.mubr.bf16.mxu1 %v5962_v29  ;;  %v6792_v17 = vmax.f32 %v5752_v20, 0.0  ;;  %v5421_v20 = vld [vmem:[%s6768_s3 + $0xd0] sm:$0xff]  }
  0x56   : > { %5030 = vmatprep.mubr.bf16.mxu0 %v5964_v43  ;;  %5060 = vmatprep.subr.bf16.mxu1 %v5413_v28 }
  0x57   : > { %5108 = vmatprep.subr.bf16.mxu0 %v5414_v5  ;;  %v6018_v57 = vpack.c.bf16 %v6793_v61, %v6792_v17  ;;  %v6079_v61 = vpack.c.bf16 %v1239_v46, %v1238_v38 }
  0x58   : > { %5109 = vmatpush3.bf16.msra.mxu0 %v5414_v5  ;;  %v5424_v5 = vld [vmem:[%s6768_s3 + $0x108] sm:$0xff]  }
  0x59   : > { %5061 = vmatpush3.bf16.msra.mxu1 %v5413_v28  ;;  %5110 = vmatprep.subr.bf16.mxu0 %v5416_v40  ;;  %v5423_v28 = vld [vmem:[%s6768_s3 + $0xc8] sm:$0xff]  }
  0x5a   : > { %5062 = vmatprep.subr.bf16.mxu1 %v5415_v9 }
  0x5b   : > { %5031 = vmatmul.mubr.bf16.gmra.mxu0 %v5988_v30 }
  0x5c   : > { %4983 = vmatmul.mubr.bf16.gmra.mxu1 %v5986_v18  ;;  %5034 = vmatprep.mubr.bf16.mxu0 %v5996_v49 }
  0x5d   : > { %4986 = vmatprep.mubr.bf16.mxu1 %v5994_v48  ;;  %5063 = vmatpush3.bf16.msra.mxu1 %v5415_v9  ;;  %v6052_v9 = vpack.c.bf16 %v1233_v54, %v1232_v59  ;;  %v6087_v59 = vpack.c.bf16 %v1241_v1, %v1240_v56  ;;  %v1608_v56 = vld [vmem:[#allocation2 + $0x108] sm:$0xff]  ;;  %v1609_v1 = vld [vmem:[#allocation2 + $0x110] sm:$0xff] }
  0x5e   : > { %5111 = vmatpush3.bf16.msra.mxu0 %v5416_v40  ;;  %5064 = vmatprep.subr.bf16.mxu1 %v5417_v3  ;;  %v6054_v40 = vpack.c.bf16 %v1235_v27, %v1234_v62  ;;  %v1244_v62 = vld [vmem:[#allocation2 + $0x13a] sm:$0xff]  ;;  %v1245_v27 = vld [vmem:[#allocation2 + $0x142] sm:$0xff] }
  0x5f   : > { %5112 = vmatprep.subr.bf16.mxu0 %v5418_v4 }
  0x61   : > { %5065 = vmatpush3.bf16.msra.mxu1 %v5417_v3  ;;  %v437_v3 = vmul.f32 %v4586_v11, %v5570_v7  ;;  %v5429_v11 = vld [vmem:[%s6768_s3 + $0x170] sm:$0xff]  }
  0x62   : > { %5113 = vmatpush3.bf16.msra.mxu0 %v5418_v4  ;;  %5066 = vmatprep.subr.bf16.mxu1 %v5419_v14  ;;  %v438_v4 = vmul.f32 %v4587_v19, %v5570_v7  ;;  %v5428_v7 = vld [vmem:[%s6768_s3 + $0x1b8] sm:$0xff]   ;;  %v5430_v19 = vld [vmem:[%s6768_s3 + $0x1b0] sm:$0xff]  }
  0x63   : > { %5114 = vmatprep.subr.bf16.mxu0 %v5420_v37  ;;  %5035 = vmatmul.mubr.bf16.gmra.mxu0 %v6020_v22  ;;  %v476_v42 = vadd.f32 %v5577_v12, %v437_v3  ;;  %v1974_v3 = vld [vmem:[#allocation2 + $0xd9] sm:$0xff] }
  0x64   : > { %4987 = vmatmul.mubr.bf16.gmra.mxu1 %v6018_v57  ;;  %5038 = vmatprep.mubr.bf16.mxu0 %v6028_v8  ;;  %v477_v45 = vadd.f32 %v5577_v12, %v438_v4  ;;  %v1975_v4 = vld [vmem:[#allocation2 + $0xe1] sm:$0xff] }
  0x65   : > { %4990 = vmatprep.mubr.bf16.mxu1 %v6026_v15  ;;  %5067 = vmatpush3.bf16.msra.mxu1 %v5419_v14  ;;  %v5427_v14 = vld [vmem:[%s6768_s3 + $0x178] sm:$0xff]   ;;  %v6163_v46 = vpack.c.bf16 %v1975_v4, %v1974_v3 }
  0x66   : > { %5115 = vmatpush3.bf16.msra.mxu0 %v5420_v37  ;;  %5068 = vmatprep.subr.bf16.mxu1 %v5421_v20  ;;  %v508_v37 = vmax.f32 %v476_v42, 0.0  ;;  %v509_v17 = vmax.f32 %v477_v45, 0.0  ;;  %v5441_v42 = vld [vmem:[%s6768_s3 + $0x140] sm:$0xff]   ;;  %v5452_v3 = vld [vmem:[%s6768_s3 + $0x218] sm:$0xff]  }
  0x67   : > { %5116 = vmatprep.subr.bf16.mxu0 %v5422_v31  ;;  %v5442_v45 = vld [vmem:[%s6768_s3 + $0x180] sm:$0xff]  }
  0x68   : > { %541 = vst [vmem:[#allocation2 + $0x181] sm:$0xff] %v508_v37  ;;  %542 = vst [vmem:[#allocation2 + $0x189] sm:$0xff] %v509_v17  ;;  %v6081_v12 = vpack.c.bf16 %v509_v17, %v508_v37  ;;  %v1976_v37 = vld [vmem:[#allocation2 + $0xf1] sm:$0xff]  ;;  %v1977_v17 = vld [vmem:[#allocation2 + $0xf9] sm:$0xff] }
  0x69   : > { %5069 = vmatpush3.bf16.msra.mxu1 %v5421_v20  ;;  %v1242_v20 = vld [vmem:[#allocation2 + $0x122] sm:$0xff] }
  0x6a   : > { %5117 = vmatpush3.bf16.msra.mxu0 %v5422_v31  ;;  %5070 = vmatprep.subr.bf16.mxu1 %v5423_v28  ;;  %v1243_v31 = vld [vmem:[#allocation2 + $0x12a] sm:$0xff] }
  0x6b   : > { %5118 = vmatprep.subr.bf16.mxu0 %v5424_v5  ;;  %5039 = vmatmul.mubr.bf16.gmra.mxu0 %v6052_v9  ;;  %v6089_v54 = vpack.c.bf16 %v1243_v31, %v1242_v20  ;;  %v1978_v20 = vld [vmem:[#allocation2 + $0x109] sm:$0xff]  ;;  %v1979_v31 = vld [vmem:[#allocation2 + $0x111] sm:$0xff] }
  0x6c   : > { %4991 = vmatmul.mubr.bf16.gmra.mxu1 %v6050_v51  ;;  %5042 = vmatprep.mubr.bf16.mxu0 %v6054_v40 }
  0x6d   : > { %4994 = vmatprep.mubr.bf16.mxu1 %v5879_v58  ;;  %5071 = vmatpush3.bf16.msra.mxu1 %v5423_v28  ;;  %v6077_v58 = vpack.c.bf16 %v1237_v16, %v1236_v2  ;;  %v6095_v28 = vpack.c.bf16 %v1245_v27, %v1244_v62  ;;  %v1604_v2 = vld [vmem:[#allocation2 + $0xd8] sm:$0xff]  ;;  %v1605_v16 = vld [vmem:[#allocation2 + $0xe0] sm:$0xff] }
  0x6e   : > { %5119 = vmatpush3.bf16.msra.mxu0 %v5424_v5  ;;  %5072 = vmatprep.subr.bf16.mxu1 %v5425_v26  ;;  %v6161_v38 = vpack.c.bf16 %v1605_v16, %v1604_v2  ;;  %v5443_v62 = vld [vmem:[%s6768_s3 + $0x1f8] sm:$0xff]   ;;  %v2710_v2 = vld [vmem:[#allocation2 + $0xb0] sm:$0xff] }
  0x6f   : > { %5120 = vmatprep.subr.bf16.mxu0 %v5426_v6  ;;  %v5444_v27 = vld [vmem:[%s6768_s3 + $0x238] sm:$0xff]  }
  0x70   : > { %v5451_v16 = vld [vmem:[%s6768_s3 + $0x1d8] sm:$0xff]  }
  0x71   : > { %5073 = vmatpush3.bf16.msra.mxu1 %v5425_v26  ;;  %v1972_v26 = vld [vmem:[#allocation2 + $0xc1] sm:$0xff] }
  0x72   : > { %5121 = vmatpush3.bf16.msra.mxu0 %v5426_v6  ;;  %5154 = vmatprep.subr.bf16.mxu1 %v5427_v14  ;;  %v1973_v6 = vld [vmem:[#allocation2 + $0xc9] sm:$0xff] }
  0x73   : > { %5202 = vmatprep.subr.bf16.mxu0 %v5428_v7  ;;  %5043 = vmatmul.mubr.bf16.gmra.mxu0 %v6077_v58 }
  0x74   : > { %4995 = vmatmul.mubr.bf16.gmra.mxu1 %v5885_v32  ;;  %5046 = vmatprep.mubr.bf16.mxu0 %v6079_v61  ;;  %v1246_v32 = vld [vmem:[#allocation2 + $0x152] sm:$0xff] }
  0x75   : > { %4998 = vmatprep.mubr.bf16.mxu1 %v5896_v23  ;;  %v1247_v23 = vld [vmem:[#allocation2 + $0x15a] sm:$0xff] }
  0x76   : > { %v6097_v5 = vpack.c.bf16 %v1247_v23, %v1246_v32  ;;  %v6183_v23 = vpack.c.bf16 %v1977_v17, %v1976_v37  ;;  %v2723_v17 = vld [vmem:[#allocation2 + $0x150] sm:$0xff] }
  0x7b   : > { %5047 = vmatmul.mubr.bf16.gmra.mxu0 %v6087_v59 }
  0x7c   : > { %4999 = vmatmul.mubr.bf16.gmra.mxu1 %v5902_v24  ;;  %5050 = vmatprep.mubr.bf16.mxu0 %v6089_v54  ;;  %v1248_v24 = vld [vmem:[#allocation2 + $0x16a] sm:$0xff] }
  0x7d   : > { %5002 = vmatprep.mubr.bf16.mxu1 %v5908_v34  ;;  %v6103_v10 = vpack.c.bf16 %v1249_v47, %v1248_v24  ;;  %v6185_v24 = vpack.c.bf16 %v1609_v1, %v1608_v56  ;;  %v6187_v47 = vpack.c.bf16 %v1979_v31, %v1978_v20  ;;  %v2724_v56 = vld [vmem:[#allocation2 + $0x158] sm:$0xff] }
  0x83   : > { %5051 = vmatmul.mubr.bf16.gmra.mxu0 %v6095_v28 }
  0x84   : > { %5003 = vmatmul.mubr.bf16.gmra.mxu1 %v5914_v35  ;;  %5054 = vmatprep.mubr.bf16.mxu0 %v6097_v5 }
  0x85   : > { %5006 = vmatprep.mubr.bf16.mxu1 %v5916_v36 }
  0x8b   : > { %5055 = vmatmul.mubr.bf16.gmra.mxu0 %v6103_v10 }
  0x8c   : > { %5007 = vmatmul.mubr.bf16.gmra.mxu1 %v5918_v41  ;;  %5122 = vmatprep.mubr.bf16.mxu0 %v5954_v13  ;;  %v5432_v13 = vld [vmem:[%s6768_s3 + $0x1a8] sm:$0xff]  }
  0x8d   : > { %5074 = vmatprep.mubr.bf16.mxu1 %v5695_v33  ;;  %v5431_v33 = vld [vmem:[%s6768_s3 + $0x168] sm:$0xff]  }
  0x93   : > { %5123 = vmatmul.mubr.bf16.vlgmr.msra.gmra.mxu0 %v5962_v29  ;;  %v5435_v29 = vld [vmem:[%s6768_s3 + $0x158] sm:$0xff]  }
  0x94   : > { %5075 = vmatmul.mubr.bf16.vlgmr.msra.gmra.mxu1 %v5757_v25  ;;  %5203 = vmatpush3.bf16.msra.mxu0 %v5428_v7  ;;  %v5433_v25 = vld [vmem:[%s6768_s3 + $0x160] sm:$0xff]   ;;  %v1607_v7 = vld [vmem:[#allocation2 + $0xf8] sm:$0xff] }
  0x95   : > { %5155 = vmatpush3.bf16.msra.mxu1 %v5427_v14  ;;  %5078 = vmatprep.mubr.bf16.mxu1 %v5783_v50  ;;  %v5434_v50 = vld [vmem:[%s6768_s3 + $0x1a0] sm:$0xff]   ;;  %v1606_v14 = vld [vmem:[#allocation2 + $0xf0] sm:$0xff] }
  0x96   : > { %5126 = vmatprep.mubr.bf16.mxu0 %v5986_v18  ;;  %5156 = vmatprep.subr.bf16.mxu1 %v5429_v11  ;;  %v5436_v18 = vld [vmem:[%s6768_s3 + $0x198] sm:$0xff]   ;;  %v6181_v32 = vpack.c.bf16 %v1607_v7, %v1606_v14 }
  0x97   : > { %5204 = vmatprep.subr.bf16.mxu0 %v5430_v19 }
  0x98   : > { %5205 = vmatpush3.bf16.msra.mxu0 %v5430_v19  ;;  %v1619_v19 = vld [vmem:[#allocation2 + $0x188] sm:$0xff] }
  0x99   : > { %5157 = vmatpush3.bf16.msra.mxu1 %v5429_v11  ;;  %5206 = vmatprep.subr.bf16.mxu0 %v5432_v13  ;;  %v1618_v11 = vld [vmem:[#allocation2 + $0x180] sm:$0xff] }
  0x9a   : > { %5158 = vmatprep.subr.bf16.mxu1 %v5431_v33 }
  0x9b   : > { %5127 = vmatmul.mubr.bf16.gmra.mxu0 %v5994_v48  ;;  %v1602_v48 = vld [vmem:[#allocation2 + $0xc0] sm:$0xff] }
  0x9c   : > { %5079 = vmatmul.mubr.bf16.gmra.mxu1 %v5847_v21  ;;  %5130 = vmatprep.mubr.bf16.mxu0 %v6018_v57  ;;  %v5437_v21 = vld [vmem:[%s6768_s3 + $0x150] sm:$0xff]   ;;  %v1603_v57 = vld [vmem:[#allocation2 + $0xc8] sm:$0xff] }
  0x9d   : > { %5082 = vmatprep.mubr.bf16.mxu1 %v5868_v52  ;;  %5159 = vmatpush3.bf16.msra.mxu1 %v5431_v33  ;;  %v5438_v52 = vld [vmem:[%s6768_s3 + $0x190] sm:$0xff]  }
  0x9e   : > { %5207 = vmatpush3.bf16.msra.mxu0 %v5432_v13  ;;  %5160 = vmatprep.subr.bf16.mxu1 %v5433_v25  ;;  %v2699_v33 = vld [vmem:[#allocation2 + $0x30] sm:$0xff]  ;;  %v2700_v13 = vld [vmem:[#allocation2 + $0x38] sm:$0xff] }
  0x9f   : > { %5208 = vmatprep.subr.bf16.mxu0 %v5434_v50 }
  0xa1   : > { %5161 = vmatpush3.bf16.msra.mxu1 %v5433_v25  ;;  %v6201_v25 = vpack.c.bf16 %v1619_v19, %v1618_v11  ;;  %v2726_v11 = vld [vmem:[#allocation2 + $0x170] sm:$0xff] }
  0xa2   : > { %5209 = vmatpush3.bf16.msra.mxu0 %v5434_v50  ;;  %5162 = vmatprep.subr.bf16.mxu1 %v5435_v29  ;;  %v5446_v50 = vld [vmem:[%s6768_s3 + $0x230] sm:$0xff]  }
  0xa3   : > { %5210 = vmatprep.subr.bf16.mxu0 %v5436_v18  ;;  %5131 = vmatmul.mubr.bf16.gmra.mxu0 %v6026_v15  ;;  %v6157_v15 = vpack.c.bf16 %v1603_v57, %v1602_v48  ;;  %v5448_v48 = vld [vmem:[%s6768_s3 + $0x228] sm:$0xff]  }
  0xa4   : > { %5083 = vmatmul.mubr.bf16.gmra.mxu1 %v5890_v55  ;;  %5134 = vmatprep.mubr.bf16.mxu0 %v6050_v51  ;;  %v5439_v55 = vld [vmem:[%s6768_s3 + $0x148] sm:$0xff]   ;;  %v6159_v51 = vpack.c.bf16 %v1973_v6, %v1972_v26  ;;  %v5450_v26 = vld [vmem:[%s6768_s3 + $0x220] sm:$0xff]  }
  0xa5   : > { %5086 = vmatprep.mubr.bf16.mxu1 %v5932_v60  ;;  %5163 = vmatpush3.bf16.msra.mxu1 %v5435_v29  ;;  %v5440_v60 = vld [vmem:[%s6768_s3 + $0x188] sm:$0xff]   ;;  %v2706_v29 = vld [vmem:[#allocation2 + $0x80] sm:$0xff] }
  0xa6   : > { %5211 = vmatpush3.bf16.msra.mxu0 %v5436_v18  ;;  %5164 = vmatprep.subr.bf16.mxu1 %v5437_v21  ;;  %v2707_v18 = vld [vmem:[#allocation2 + $0x90] sm:$0xff]  ;;  %v2709_v6 = vld [vmem:[#allocation2 + $0xa8] sm:$0xff] }
  0xa7   : > { %5212 = vmatprep.subr.bf16.mxu0 %v5438_v52  ;;  %v2736_v4 = vpack.c.bf16 %v2710_v2, %v2709_v6  ;;  %v3071_v2 = vld [vmem:[#allocation2 + $0x49] sm:$0xff] }
  0xa9   : > { %5165 = vmatpush3.bf16.msra.mxu1 %v5437_v21  ;;  %v2708_v21 = vld [vmem:[#allocation2 + $0x98] sm:$0xff] }
  0xaa   : > { %5213 = vmatpush3.bf16.msra.mxu0 %v5438_v52  ;;  %5166 = vmatprep.subr.bf16.mxu1 %v5439_v55  ;;  %v5447_v52 = vld [vmem:[%s6768_s3 + $0x1e8] sm:$0xff]   ;;  %v2735_v57 = vpack.c.bf16 %v2708_v21, %v2707_v18  ;;  %v3440_v18 = vld [vmem:[#allocation2 + $0x3a] sm:$0xff] }
  0xab   : > { %5214 = vmatprep.subr.bf16.mxu0 %v5440_v60  ;;  %5135 = vmatmul.mubr.bf16.gmra.mxu0 %v6159_v51 }
  0xac   : > { %5087 = vmatmul.mubr.bf16.gmra.mxu1 %v6157_v15  ;;  %5138 = vmatprep.mubr.bf16.mxu0 %v6163_v46 }
  0xad   : > { %5090 = vmatprep.mubr.bf16.mxu1 %v6161_v38  ;;  %5167 = vmatpush3.bf16.msra.mxu1 %v5439_v55  ;;  %v5455_v55 = vld [vmem:[%s6768_s3 + $0x1c8] sm:$0xff]  }
  0xae   : > { %5215 = vmatpush3.bf16.msra.mxu0 %v5440_v60  ;;  %5168 = vmatprep.subr.bf16.mxu1 %v5441_v42  ;;  %v5456_v60 = vld [vmem:[%s6768_s3 + $0x208] sm:$0xff]  }
  0xaf   : > { %5216 = vmatprep.subr.bf16.mxu0 %v5442_v45 }
  0xb1   : > { %5169 = vmatpush3.bf16.msra.mxu1 %v5441_v42  ;;  %v2720_v42 = vld [vmem:[#allocation2 + $0x128] sm:$0xff] }
  0xb2   : > { %5217 = vmatpush3.bf16.msra.mxu0 %v5442_v45  ;;  %5250 = vmatprep.subr.bf16.mxu1 %v5443_v62 }
  0xb3   : > { %5298 = vmatprep.subr.bf16.mxu0 %v5444_v27  ;;  %5139 = vmatmul.mubr.bf16.gmra.mxu0 %v6183_v23 }
  0xb4   : > { %5091 = vmatmul.mubr.bf16.gmra.mxu1 %v6181_v32  ;;  %5142 = vmatprep.mubr.bf16.mxu0 %v6187_v47 }
  0xb5   : > { %5094 = vmatprep.mubr.bf16.mxu1 %v6185_v24 }
  0xbb   : > { %5143 = vmatmul.mubr.bf16.gmra.mxu0 %v5908_v34  ;;  %v2702_v34 = vld [vmem:[#allocation2 + $0x50] sm:$0xff] }
  0xbc   : > { %5095 = vmatmul.mubr.bf16.gmra.mxu1 %v5851_v44  ;;  %5146 = vmatprep.mubr.bf16.mxu0 %v5914_v35  ;;  %v2731_v44 = vpack.c.bf16 %v2700_v13, %v2699_v33  ;;  %v2703_v35 = vld [vmem:[#allocation2 + $0x60] sm:$0xff] }
  0xbd   : > { %5098 = vmatprep.mubr.bf16.mxu1 %v5870_v53  ;;  %v2701_v53 = vld [vmem:[#allocation2 + $0x48] sm:$0xff] }
  0xc3   : > { %5147 = vmatmul.mubr.bf16.gmra.mxu0 %v5916_v36  ;;  %v2704_v36 = vld [vmem:[#allocation2 + $0x68] sm:$0xff] }
  0xc4   : > { %5099 = vmatmul.mubr.bf16.gmra.mxu1 %v5925_v63  ;;  %5150 = vmatprep.mubr.bf16.mxu0 %v5918_v41  ;;  %v2732_v63 = vpack.c.bf16 %v2702_v34, %v2701_v53  ;;  %v2733_v41 = vpack.c.bf16 %v2704_v36, %v2703_v35 }
  0xc5   : > { %5102 = vmatprep.mubr.bf16.mxu1 %v5934_v0  ;;  %v5445_v0 = vld [vmem:[%s6768_s3 + $0x1f0] sm:$0xff]  }
  0xcb   : > { %5151 = vmatmul.mubr.bf16.gmra.mxu0 %v6081_v12 }
  0xcc   : > { %5103 = vmatmul.mubr.bf16.gmra.mxu1 %v6201_v25  ;;  %5218 = vmatprep.mubr.bf16.mxu0 %v2731_v44 }
  0xcd   : > { %5170 = vmatprep.mubr.bf16.mxu1 %v5956_v39  ;;  %v2705_v39 = vld [vmem:[#allocation2 + $0x78] sm:$0xff] }
  0xd3   : > { %5219 = vmatmul.mubr.bf16.vlgmr.msra.gmra.mxu0 %v2732_v63  ;;  %v2359_v63 = vld [vmem:[#allocation2 + $0x18a] sm:$0xff] }
  0xd4   : > { %5171 = vmatmul.mubr.bf16.vlgmr.msra.gmra.mxu1 %v5964_v43  ;;  %5299 = vmatpush3.bf16.msra.mxu0 %v5444_v27  ;;  %v2734_v43 = vpack.c.bf16 %v2706_v29, %v2705_v39  ;;  %v3070_v39 = vld [vmem:[#allocation2 + $0x39] sm:$0xff] }
  0xd5   : > { %5251 = vmatpush3.bf16.msra.mxu1 %v5443_v62  ;;  %5174 = vmatprep.mubr.bf16.mxu1 %v5988_v30  ;;  %v5449_v30 = vld [vmem:[%s6768_s3 + $0x1e0] sm:$0xff]   ;;  %v2743_v62 = vpack.c.bf16 %v2724_v56, %v2723_v17  ;;  %v3439_v29 = vld [vmem:[#allocation2 + $0x32] sm:$0xff] }
  0xd6   : > { %5222 = vmatprep.mubr.bf16.mxu0 %v2733_v41  ;;  %5252 = vmatprep.subr.bf16.mxu1 %v5445_v0  ;;  %v3069_v41 = vld [vmem:[#allocation2 + $0x31] sm:$0xff] }
  0xd7   : > { %5300 = vmatprep.subr.bf16.mxu0 %v5446_v50 }
  0xd8   : > { %5301 = vmatpush3.bf16.msra.mxu0 %v5446_v50 }
  0xd9   : > { %5253 = vmatpush3.bf16.msra.mxu1 %v5445_v0  ;;  %5302 = vmatprep.subr.bf16.mxu0 %v5448_v48 }
  0xda   : > { %5254 = vmatprep.subr.bf16.mxu1 %v5447_v52 }
  0xdb   : > { %5223 = vmatmul.mubr.bf16.gmra.mxu0 %v2734_v43  ;;  %v3101_v43 = vpack.c.bf16 %v3070_v39, %v3069_v41  ;;  %v3446_v41 = vld [vmem:[#allocation2 + $0x82] sm:$0xff]  ;;  %v3077_v39 = vld [vmem:[#allocation2 + $0x91] sm:$0xff] }
  0xdc   : > { %5175 = vmatmul.mubr.bf16.gmra.mxu1 %v5996_v49  ;;  %5226 = vmatprep.mubr.bf16.mxu0 %v2735_v57  ;;  %v5453_v49 = vld [vmem:[%s6768_s3 + $0x1d0] sm:$0xff]  }
  0xdd   : > { %5178 = vmatprep.mubr.bf16.mxu1 %v6020_v22  ;;  %5255 = vmatpush3.bf16.msra.mxu1 %v5447_v52  ;;  %v5454_v22 = vld [vmem:[%s6768_s3 + $0x210] sm:$0xff]  }
  0xde   : > { %5303 = vmatpush3.bf16.msra.mxu0 %v5448_v48  ;;  %5256 = vmatprep.subr.bf16.mxu1 %v5449_v30  ;;  %v5459_v48 = vld [vmem:[#allocation2] sm:$0xff] }
  0xdf   : > { %5304 = vmatprep.subr.bf16.mxu0 %v5450_v26 }
  0xe1   : > { %5257 = vmatpush3.bf16.msra.mxu1 %v5449_v30 }
  0xe2   : > { %5305 = vmatpush3.bf16.msra.mxu0 %v5450_v26  ;;  %5258 = vmatprep.subr.bf16.mxu1 %v5451_v16 }
  0xe3   : > { %5306 = vmatprep.subr.bf16.mxu0 %v5452_v3  ;;  %5227 = vmatmul.mubr.bf16.gmra.mxu0 %v2736_v4  ;;  %v3442_v4 = vld [vmem:[#allocation2 + $0x52] sm:$0xff] }
  0xe4   : > { %5179 = vmatmul.mubr.bf16.gmra.mxu1 %v6028_v8  ;;  %5230 = vmatprep.mubr.bf16.mxu0 %v6157_v15  ;;  %v5457_v8 = vld [vmem:[%s6768_s3 + $0x1c0] sm:$0xff]  }
  0xe5   : > { %5182 = vmatprep.mubr.bf16.mxu1 %v6052_v9  ;;  %5259 = vmatpush3.bf16.msra.mxu1 %v5451_v16  ;;  %v5458_v9 = vld [vmem:[%s6768_s3 + $0x200] sm:$0xff]   ;;  %v3072_v16 = vld [vmem:[#allocation2 + $0x51] sm:$0xff] }
  0xe6   : > { %5307 = vmatpush3.bf16.msra.mxu0 %v5452_v3  ;;  %5260 = vmatprep.subr.bf16.mxu1 %v5453_v49  ;;  %v2719_v15 = vld [vmem:[#allocation2 + $0x120] sm:$0xff]  ;;  %v3441_v3 = vld [vmem:[#allocation2 + $0x4a] sm:$0xff] }
  0xe7   : > { %5308 = vmatprep.subr.bf16.mxu0 %v5454_v22  ;;  %v2741_v45 = vpack.c.bf16 %v2720_v42, %v2719_v15 }
  0xe9   : > { %5261 = vmatpush3.bf16.msra.mxu1 %v5453_v49  ;;  %v3073_v49 = vld [vmem:[#allocation2 + $0x61] sm:$0xff] }
  0xea   : > { %5309 = vmatpush3.bf16.msra.mxu0 %v5454_v22  ;;  %5262 = vmatprep.subr.bf16.mxu1 %v5455_v55 }
  0xeb   : > { %5310 = vmatprep.subr.bf16.mxu0 %v5456_v60  ;;  %5231 = vmatmul.mubr.bf16.gmra.mxu0 %v6161_v38 }
  0xec   : > { %5183 = vmatmul.mubr.bf16.gmra.mxu1 %v6054_v40  ;;  %5234 = vmatprep.mubr.bf16.mxu0 %v6181_v32  ;;  %v2721_v40 = vld [vmem:[#allocation2 + $0x138] sm:$0xff] }
  0xed   : > { %5186 = vmatprep.mubr.bf16.mxu1 %v6077_v58  ;;  %5263 = vmatpush3.bf16.msra.mxu1 %v5455_v55  ;;  %v2722_v58 = vld [vmem:[#allocation2 + $0x140] sm:$0xff] }
  0xee   : > { %5311 = vmatpush3.bf16.msra.mxu0 %v5456_v60  ;;  %5264 = vmatprep.subr.bf16.mxu1 %v5457_v8  ;;  %v2742_v31 = vpack.c.bf16 %v2722_v58, %v2721_v40  ;;  %v3074_v60 = vld [vmem:[#allocation2 + $0x69] sm:$0xff]  ;;  %v3472_v40 = vpack.c.bf16 %v3442_v4, %v3441_v3 }
  0xef   : > { %5312 = vmatprep.subr.bf16.mxu0 %v5458_v9  ;;  %v3103_v58 = vpack.c.bf16 %v3074_v60, %v3073_v49 }
  0xf1   : > { %5265 = vmatpush3.bf16.msra.mxu1 %v5457_v8  ;;  %v3443_v8 = vld [vmem:[#allocation2 + $0x62] sm:$0xff] }
  0xf2   : > { %5313 = vmatpush3.bf16.msra.mxu0 %v5458_v9  ;;  %v3444_v9 = vld [vmem:[#allocation2 + $0x6a] sm:$0xff] }
  0xf3   : > { %v6259_v14 = vpop.f32.mrf.mxu0  ;;  %5235 = vmatmul.mubr.bf16.gmra.mxu0 %v6185_v24  ;;  %v2725_v24 = vld [vmem:[#allocation2 + $0x168] sm:$0xff]  ;;  %v3473_v17 = vpack.c.bf16 %v3444_v9, %v3443_v8 }
  0xf4   : > { %v6261_v7 = vpop.f32.mrf.mxu1  ;;  %5187 = vmatmul.mubr.bf16.gmra.mxu1 %v6079_v61  ;;  %5238 = vmatprep.mubr.bf16.mxu0 %v2741_v45  ;;  %v2744_v53 = vpack.c.bf16 %v2726_v11, %v2725_v24  ;;  %v3102_v45 = vpack.c.bf16 %v3072_v16, %v3071_v2  ;;  %v3075_v11 = vld [vmem:[#allocation2 + $0x79] sm:$0xff] }
  0xf5   : > { %5190 = vmatprep.mubr.bf16.mxu1 %v6087_v59  ;;  %v6266_v38 = vpop.f32.mrf.mxu0 }
  0xf6   : > { %v6268_v37 = vpop.f32.mrf.mxu1 }
  0xf7   : > { %v6270_v1 = vpop.f32.mrf.mxu0 }
  0xf8   : > { %v6272_v20 = vpop.f32.mrf.mxu1 }
  0xf9   : > { %v6274_v61 = vpop.f32.mrf.mxu0 }
  0xfa   : > { %v6276_v27 = vpop.f32.mrf.mxu1 }
  0xfb   : > { %v6278_v59 = vpop.f32.mrf.mxu0  ;;  %5239 = vmatmul.mubr.bf16.gmra.mxu0 %v2742_v31 }
  0xfc   : > { %v6280_v32 = vpop.f32.mrf.mxu1  ;;  %5191 = vmatmul.mubr.bf16.gmra.mxu1 %v6089_v54  ;;  %5242 = vmatprep.mubr.bf16.mxu0 %v2743_v62 }
  0xfd   : > { %5194 = vmatprep.mubr.bf16.mxu1 %v6095_v28  ;;  %v6284_v19 = vpop.f32.mrf.mxu0  ;;  %v2358_v28 = vld [vmem:[#allocation2 + $0x182] sm:$0xff] }
  0xfe   : > { %v6286_v33 = vpop.f32.mrf.mxu1 }
  0xff   : > { %v6288_v13 = vpop.f32.mrf.mxu0 }
 0x100   : > { %v6290_v44 = vpop.f32.mrf.mxu1 }
 0x101   : > { %v6292_v34 = vpop.f32.mrf.mxu0 }
 0x102   : > { %v6294_v35 = vpop.f32.mrf.mxu1 }
 0x103   : > { %v6296_v54 = vpop.f32.mrf.mxu0  ;;  %5243 = vmatmul.mubr.bf16.gmra.mxu0 %v2744_v53  ;;  %v3076_v53 = vld [vmem:[#allocation2 + $0x81] sm:$0xff] }
 0x104   : > { %v6298_v36 = vpop.f32.mrf.mxu1  ;;  %5195 = vmatmul.mubr.bf16.gmra.mxu1 %v6097_v5  ;;  %5246 = vmatprep.mubr.bf16.mxu0 %v6201_v25  ;;  %v6311_v5 = vpack.c.bf16 %v2359_v63, %v2358_v28  ;;  %v3471_v25 = vpack.c.bf16 %v3440_v18, %v3439_v29  ;;  %v3445_v63 = vld [vmem:[#allocation2 + $0x7a] sm:$0xff]  ;;  %v3104_v4 = vpack.c.bf16 %v3076_v53, %v3075_v11  ;;  %v3449_v53 = vld [vmem:[#allocation2 + $0xaa] sm:$0xff] }
 0x105   : > { %5198 = vmatprep.mubr.bf16.mxu1 %v6103_v10  ;;  %v6303_v0 = vpop.f32.mrf.mxu0  ;;  %v2746_v10 = vpack.c.bf16 %v5459_v48, %v5459_v48  ;;  %v3078_v48 = vld [vmem:[#allocation2 + $0x99] sm:$0xff]  ;;  %v3474_v49 = vpack.c.bf16 %v3446_v41, %v3445_v63 }
 0x106   : > { %v6305_v50 = vpop.f32.mrf.mxu1  ;;  %v3105_v8 = vpack.c.bf16 %v3078_v48, %v3077_v39  ;;  %v3450_v63 = vld [vmem:[#allocation2 + $0xb2] sm:$0xff] }
 0x107   : > { %v6307_v21 = vpop.f32.mrf.mxu0 }
 0x108   : > { %v6309_v52 = vpop.f32.mrf.mxu1 }
 0x109   : > { %v6313_v57 = vpop.f32.mrf.mxu0 }
 0x10a   : > { %v6315_v30 = vpop.f32.mrf.mxu1 }
 0x10b   : > { %v6317_v26 = vpop.f32.mrf.mxu0  ;;  %5247 = vmatmul.mubr.bf16.gmra.mxu0 %v2746_v10  ;;  %v3447_v10 = vld [vmem:[#allocation2 + $0x92] sm:$0xff] }
 0x10c   : > { %v6319_v6 = vpop.f32.mrf.mxu1  ;;  %5199 = vmatmul.mubr.bf16.gmra.mxu1 %v6311_v5  ;;  %5314 = vmatprep.mubr.bf16.mxu0 %v3471_v25 }
 0x10d   : > { %5266 = vmatprep.mubr.bf16.mxu1 %v3101_v43  ;;  %v6322_v22 = vpop.f32.mrf.mxu0  ;;  %v3448_v43 = vld [vmem:[#allocation2 + $0x9a] sm:$0xff] }
 0x10e   : > { %v6324_v55 = vpop.f32.mrf.mxu1  ;;  %v3475_v9 = vpack.c.bf16 %v3448_v43, %v3447_v10 }
 0x10f   : > { %v6326_v15 = vpop.f32.mrf.mxu0 }
 0x110   : > { %v6328_v42 = vpop.f32.mrf.mxu1 }
 0x111   : > { %v6330_v56 = vpop.f32.mrf.mxu0 }
 0x112   : > { %v6332_v31 = vpop.f32.mrf.mxu1 }
 0x113   : > { %v5028_v24 = vpop.f32.mrf.mxu0  ;;  %5315 = vmatmul.mubr.bf16.vlgmr.msra.gmra.mxu0 %v3472_v40 }
 0x114   : > { %v4980_v62 = vpop.f32.mrf.mxu1  ;;  %5267 = vmatmul.mubr.bf16.vlgmr.msra.gmra.mxu1 %v3102_v45  ;;  %5318 = vmatprep.mubr.bf16.mxu0 %v3473_v17 }
 0x115   : > { %v1156_v28 = vadd.f32 %v4980_v62, %v6259_v14  ;;  %5270 = vmatprep.mubr.bf16.mxu1 %v3103_v58  ;;  %v1365_v18 = vpop.f32.mrf.mxu0 }
 0x116   : > { %v995_v29 = vpop.f32.mrf.mxu1 }
 0x117   : > { %v6335_v25 = vadd.f32 %v5028_v24, %v1156_v28  ;;  %v1154_v2 = vadd.f32 %v995_v29, %v6266_v38  ;;  %v5029_v3 = vpop.f32.mrf.mxu0  ;;  %v3079_v38 = vld [vmem:[#allocation2 + $0xa9] sm:$0xff] }
 0x118   : > { %v4981_v16 = vpop.f32.mrf.mxu1  ;;  %v3451_v29 = vld [vmem:[#allocation2 + $0xc2] sm:$0xff] }
 0x119   : > { %v6338_v60 = vadd.f32 %v1365_v18, %v1154_v2  ;;  %v1157_v14 = vadd.f32 %v4981_v16, %v6270_v1  ;;  %v1368_v40 = vpop.f32.mrf.mxu0  ;;  %v3080_v1 = vld [vmem:[#allocation2 + $0xb1] sm:$0xff]  ;;  %v3476_v16 = vpack.c.bf16 %v3450_v63, %v3449_v53 }
 0x11a   : > { %v998_v45 = vpop.f32.mrf.mxu1  ;;  %v3452_v18 = vld [vmem:[#allocation2 + $0xca] sm:$0xff]  ;;  %v3106_v2 = vpack.c.bf16 %v3080_v1, %v3079_v38  ;;  %v3456_v1 = vld [vmem:[#allocation2 + $0xfa] sm:$0xff] }
 0x11b   : > { %v6341_v58 = vadd.f32 %v5029_v3, %v1157_v14  ;;  %v1155_v17 = vadd.f32 %v998_v45, %v6274_v61  ;;  %v5032_v24 = vpop.f32.mrf.mxu0  ;;  %5319 = vmatmul.mubr.bf16.gmra.mxu0 %v3474_v49 }
 0x11c   : > { %v4984_v62 = vpop.f32.mrf.mxu1  ;;  %5271 = vmatmul.mubr.bf16.gmra.mxu1 %v3104_v4  ;;  %5322 = vmatprep.mubr.bf16.mxu0 %v3475_v9  ;;  %v3477_v4 = vpack.c.bf16 %v3452_v18, %v3451_v29 }
 0x11d   : > { %v6344_v28 = vadd.f32 %v1368_v40, %v1155_v17  ;;  %v1160_v11 = vadd.f32 %v4984_v62, %v6278_v59  ;;  %5274 = vmatprep.mubr.bf16.mxu1 %v3105_v8  ;;  %v1381_v39 = vpop.f32.mrf.mxu0  ;;  %v3453_v62 = vld [vmem:[#allocation2 + $0xda] sm:$0xff] }
 0x11e   : > { %v1011_v41 = vpop.f32.mrf.mxu1 }
 0x11f   : > { %v6347_v48 = vadd.f32 %v5032_v24, %v1160_v11  ;;  %v1158_v61 = vadd.f32 %v1011_v41, %v6284_v19  ;;  %v5033_v43 = vpop.f32.mrf.mxu0  ;;  %v3455_v11 = vld [vmem:[#allocation2 + $0xf2] sm:$0xff] }
 0x120   : > { %v4985_v10 = vpop.f32.mrf.mxu1  ;;  %v3479_v18 = vpack.c.bf16 %v3456_v1, %v3455_v11 }
 0x121   : > { %v6350_v3 = vadd.f32 %v1381_v39, %v1158_v61  ;;  %v1161_v59 = vadd.f32 %v4985_v10, %v6288_v13  ;;  %v1384_v14 = vpop.f32.mrf.mxu0  ;;  %v3454_v13 = vld [vmem:[#allocation2 + $0xe2] sm:$0xff] }
 0x122   : > { %v1014_v49 = vpop.f32.mrf.mxu1  ;;  %v3478_v39 = vpack.c.bf16 %v3454_v13, %v3453_v62 }
 0x123   : > { %v6353_v8 = vadd.f32 %v5033_v43, %v1161_v59  ;;  %v1159_v9 = vadd.f32 %v1014_v49, %v6292_v34  ;;  %v5036_v40 = vpop.f32.mrf.mxu0  ;;  %5323 = vmatmul.mubr.bf16.gmra.mxu0 %v3476_v16  ;;  %v3089_v49 = vld [vmem:[#allocation2 + $0x121] sm:$0xff] }
 0x124   : > { %v4988_v45 = vpop.f32.mrf.mxu1  ;;  %5275 = vmatmul.mubr.bf16.gmra.mxu1 %v3106_v2  ;;  %5326 = vmatprep.mubr.bf16.mxu0 %v3477_v4  ;;  %v3458_v4 = vld [vmem:[#allocation2 + $0x112] sm:$0xff] }
 0x125   : > { %v6356_v19 = vadd.f32 %v1384_v14, %v1159_v9  ;;  %v1164_v17 = vadd.f32 %v4988_v45, %v6296_v54  ;;  %5278 = vmatprep.mubr.bf16.mxu1 %v6159_v51  ;;  %v1397_v38 = vpop.f32.mrf.mxu0  ;;  %v3090_v45 = vld [vmem:[#allocation2 + $0x129] sm:$0xff] }
 0x126   : > { %v1027_v24 = vpop.f32.mrf.mxu1 }
 0x127   : > { %v6360_v53 = vadd.f32 %v5036_v40, %v1164_v17  ;;  %v1162_v34 = vadd.f32 %v1027_v24, %v6303_v0  ;;  %v5037_v41 = vpop.f32.mrf.mxu0  ;;  %v3459_v40 = vld [vmem:[#allocation2 + $0x122] sm:$0xff] }
 0x128   : > { %v4989_v63 = vpop.f32.mrf.mxu1 }
 0x129   : > { %v6363_v29 = vadd.f32 %v1397_v38, %v1162_v34  ;;  %v1165_v54 = vadd.f32 %v4989_v63, %v6307_v21  ;;  %v1400_v61 = vpop.f32.mrf.mxu0  ;;  %v3457_v21 = vld [vmem:[#allocation2 + $0x10a] sm:$0xff] }
 0x12a   : > { %v1030_v51 = vpop.f32.mrf.mxu1  ;;  %v3480_v24 = vpack.c.bf16 %v3458_v4, %v3457_v21  ;;  %v3094_v21 = vld [vmem:[#allocation2 + $0x159] sm:$0xff] }
 0x12b   : > { %v6366_v10 = vadd.f32 %v5037_v41, %v1165_v54  ;;  %v1163_v43 = vadd.f32 %v1030_v51, %v6313_v57  ;;  %v5040_v16 = vpop.f32.mrf.mxu0  ;;  %5327 = vmatmul.mubr.bf16.gmra.mxu0 %v3478_v39  ;;  %v3460_v57 = vld [vmem:[#allocation2 + $0x12a] sm:$0xff]  ;;  %v3464_v4 = vld [vmem:[#allocation2 + $0x15a] sm:$0xff] }
 0x12c   : > { %v4992_v2 = vpop.f32.mrf.mxu1  ;;  %5279 = vmatmul.mubr.bf16.gmra.mxu1 %v6163_v46  ;;  %5330 = vmatprep.mubr.bf16.mxu0 %v3479_v18  ;;  %v3481_v11 = vpack.c.bf16 %v3460_v57, %v3459_v40  ;;  %v3092_v18 = vld [vmem:[#allocation2 + $0x141] sm:$0xff] }
 0x12d   : > { %v6370_v0 = vadd.f32 %v1400_v61, %v1163_v43  ;;  %v1168_v59 = vadd.f32 %v4992_v2, %v6317_v26  ;;  %5282 = vmatprep.mubr.bf16.mxu1 %v6183_v23  ;;  %v1413_v9 = vpop.f32.mrf.mxu0  ;;  %v3111_v26 = vpack.c.bf16 %v3090_v45, %v3089_v49  ;;  %v3462_v43 = vld [vmem:[#allocation2 + $0x142] sm:$0xff]  ;;  %v3093_v2 = vld [vmem:[#allocation2 + $0x151] sm:$0xff] }
 0x12e   : > { %v1043_v14 = vpop.f32.mrf.mxu1 }
 0x12f   : > { %v6374_v17 = vadd.f32 %v5040_v16, %v1168_v59  ;;  %v1166_v46 = vadd.f32 %v1043_v14, %v6322_v22  ;;  %v5041_v13 = vpop.f32.mrf.mxu0  ;;  %v3091_v22 = vld [vmem:[#allocation2 + $0x139] sm:$0xff] }
 0x130   : > { %v4993_v62 = vpop.f32.mrf.mxu1  ;;  %v3112_v45 = vpack.c.bf16 %v3092_v18, %v3091_v22 }
 0x131   : > { %v6377_v38 = vadd.f32 %v1413_v9, %v1166_v46  ;;  %v1169_v23 = vadd.f32 %v4993_v62, %v6326_v15  ;;  %v1416_v34 = vpop.f32.mrf.mxu0  ;;  %v3461_v15 = vld [vmem:[#allocation2 + $0x13a] sm:$0xff]  ;;  %v3113_v46 = vpack.c.bf16 %v3094_v21, %v3093_v2 }
 0x132   : > { %v1046_v1 = vpop.f32.mrf.mxu1  ;;  %v3482_v40 = vpack.c.bf16 %v3462_v43, %v3461_v15 }
 0x133   : > { %v6380_v63 = vadd.f32 %v5041_v13, %v1169_v23  ;;  %v1167_v41 = vadd.f32 %v1046_v1, %v6330_v56  ;;  %v5044_v54 = vpop.f32.mrf.mxu0  ;;  %5331 = vmatmul.mubr.bf16.gmra.mxu0 %v3480_v24  ;;  %v3463_v56 = vld [vmem:[#allocation2 + $0x152] sm:$0xff] }
 0x134   : > { %v4996_v39 = vpop.f32.mrf.mxu1  ;;  %5283 = vmatmul.mubr.bf16.gmra.mxu1 %v6187_v47  ;;  %5334 = vmatprep.mubr.bf16.mxu0 %v3481_v11  ;;  %v3483_v62 = vpack.c.bf16 %v3464_v4, %v3463_v56 }
 0x135   : > { %v6384_v51 = vadd.f32 %v1416_v34, %v1167_v41  ;;  %v1172_v61 = vadd.f32 %v4996_v39, %v6261_v7  ;;  %5286 = vmatprep.mubr.bf16.mxu1 %v3111_v26  ;;  %v1429_v59 = vpop.f32.mrf.mxu0  ;;  %v3465_v39 = vld [vmem:[#allocation2 + $0x16a] sm:$0xff] }
 0x136   : > { %v1059_v16 = vpop.f32.mrf.mxu1 }
 0x137   : > { %v6387_v49 = vadd.f32 %v5044_v54, %v1172_v61  ;;  %v1170_v47 = vadd.f32 %v1059_v16, %v6268_v37  ;;  %v5045_v9 = vpop.f32.mrf.mxu0  ;;  %v3095_v37 = vld [vmem:[#allocation2 + $0x169] sm:$0xff]  ;;  %v3466_v54 = vld [vmem:[#allocation2 + $0x172] sm:$0xff] }
 0x138   : > { %v4997_v14 = vpop.f32.mrf.mxu1  ;;  %v3484_v16 = vpack.c.bf16 %v3466_v54, %v3465_v39 }
 0x139   : > { %v6390_v57 = vadd.f32 %v1429_v59, %v1170_v47  ;;  %v1173_v7 = vadd.f32 %v4997_v14, %v6272_v20  ;;  %v1432_v24 = vpop.f32.mrf.mxu0  ;;  %v3096_v20 = vld [vmem:[#allocation2 + $0x171] sm:$0xff] }
 0x13a   : > { %v1062_v13 = vpop.f32.mrf.mxu1  ;;  %v3114_v2 = vpack.c.bf16 %v3096_v20, %v3095_v37 }
 0x13b   : > { %v6393_v23 = vadd.f32 %v5045_v9, %v1173_v7  ;;  %v1171_v26 = vadd.f32 %v1062_v13, %v6276_v27  ;;  %v5048_v1 = vpop.f32.mrf.mxu0  ;;  %5335 = vmatmul.mubr.bf16.gmra.mxu0 %v3482_v40  ;;  %v3469_v7 = vld [vmem:[#allocation2 + $0x19a] sm:$0xff] }
 0x13c   : > { %v5000_v11 = vpop.f32.mrf.mxu1  ;;  %5287 = vmatmul.mubr.bf16.gmra.mxu1 %v3112_v45  ;;  %5338 = vmatprep.mubr.bf16.mxu0 %v3483_v62  ;;  %v3099_v45 = vld [vmem:[#allocation2 + $0x199] sm:$0xff] }
 0x13d   : > { %v6396_v34 = vadd.f32 %v1432_v24, %v1171_v26  ;;  %v1176_v41 = vadd.f32 %v5000_v11, %v6280_v32  ;;  %5290 = vmatprep.mubr.bf16.mxu1 %v3113_v46  ;;  %v1445_v18 = vpop.f32.mrf.mxu0  ;;  %v3470_v46 = vld [vmem:[#allocation2 + $0x1a2] sm:$0xff] }
 0x13e   : > { %v1075_v22 = vpop.f32.mrf.mxu1  ;;  %v3486_v37 = vpack.c.bf16 %v3470_v46, %v3469_v7 }
 0x13f   : > { %v6399_v61 = vadd.f32 %v5048_v1, %v1176_v41  ;;  %v1174_v27 = vadd.f32 %v1075_v22, %v6286_v33  ;;  %v5049_v43 = vpop.f32.mrf.mxu0 }
 0x140   : > { %v5001_v15 = vpop.f32.mrf.mxu1 }
 0x141   : > { %v6402_v59 = vadd.f32 %v1445_v18, %v1174_v27  ;;  %v1177_v21 = vadd.f32 %v5001_v15, %v6290_v44  ;;  %v1448_v56 = vpop.f32.mrf.mxu0  ;;  %v3100_v44 = vld [vmem:[#allocation2 + $0x1a1] sm:$0xff] }
 0x142   : > { %v1078_v32 = vpop.f32.mrf.mxu1  ;;  %v3116_v1 = vpack.c.bf16 %v3100_v44, %v3099_v45 }
 0x143   : > { %v6405_v4 = vadd.f32 %v5049_v43, %v1177_v21  ;;  %v1175_v47 = vadd.f32 %v1078_v32, %v6294_v35  ;;  %v5052_v9 = vpop.f32.mrf.mxu0  ;;  %5339 = vmatmul.mubr.bf16.gmra.mxu0 %v3484_v16 }
 0x144   : > { %v5004_v14 = vpop.f32.mrf.mxu1  ;;  %5291 = vmatmul.mubr.bf16.gmra.mxu1 %v3114_v2  ;;  %5342 = vmatprep.mubr.bf16.mxu0 %v6311_v5 }
 0x145   : > { %v6408_v33 = vadd.f32 %v1448_v56, %v1175_v47  ;;  %v1180_v40 = vadd.f32 %v5004_v14, %v6298_v36  ;;  %5294 = vmatprep.mubr.bf16.mxu1 %v6081_v12  ;;  %v1461_v13 = vpop.f32.mrf.mxu0 }
 0x146   : > { %v1091_v62 = vpop.f32.mrf.mxu1 }
 0x147   : > { %v6413_v24 = vadd.f32 %v5052_v9, %v1180_v40  ;;  %v1178_v35 = vadd.f32 %v1091_v62, %v6305_v50  ;;  %v5053_v11 = vpop.f32.mrf.mxu0 }
 0x148   : > { %v5005_v26 = vpop.f32.mrf.mxu1 }
 0x149   : > { %v6416_v41 = vadd.f32 %v1461_v13, %v1178_v35  ;;  %v1181_v36 = vadd.f32 %v5005_v26, %v6309_v52  ;;  %v1464_v20 = vpop.f32.mrf.mxu0 }
 0x14a   : > { %v1094_v12 = vpop.f32.mrf.mxu1 }
 0x14b   : > { %v6419_v5 = vadd.f32 %v5053_v11, %v1181_v36  ;;  %v1179_v39 = vadd.f32 %v1094_v12, %v6315_v30  ;;  %v5056_v22 = vpop.f32.mrf.mxu0  ;;  %5343 = vmatmul.mubr.bf16.gmra.mxu0 %v3486_v37 }
 0x14c   : > { %v5008_v54 = vpop.f32.mrf.mxu1  ;;  %5295 = vmatmul.mubr.bf16.gmra.mxu1 %v3116_v1 }
 0x14d   : > { %v6422_v18 = vadd.f32 %v1464_v20, %v1179_v39  ;;  %v1184_v50 = vadd.f32 %v5008_v54, %v6319_v6  ;;  %v1477_v15 = vpop.f32.mrf.mxu0 }
 0x14e   : > { %v1107_v27 = vpop.f32.mrf.mxu1 }
 0x14f   : > { %v6425_v43 = vadd.f32 %v5056_v22, %v1184_v50  ;;  %v1182_v52 = vadd.f32 %v1107_v27, %v6324_v55  ;;  %v5057_v16 = vpop.f32.mrf.mxu0 }
 0x150   : > { %v5009_v2 = vpop.f32.mrf.mxu1 }
 0x151   : > { %v6428_v21 = vadd.f32 %v1477_v15, %v1182_v52  ;;  %v1185_v30 = vadd.f32 %v5009_v2, %v6328_v42  ;;  %v1480_v56 = vpop.f32.mrf.mxu0 }
 0x152   : > { %v1110_v32 = vpop.f32.mrf.mxu1 }
 0x153   : > { %v6431_v47 = vadd.f32 %v5057_v16, %v1185_v30  ;;  %v1183_v14 = vadd.f32 %v1110_v32, %v6332_v31  ;;  %v5124_v6 = vpop.f32.mrf.mxu0 }
 0x154   : > { %v5076_v9 = vpop.f32.mrf.mxu1 }
 0x155   : > { %v6434_v45 = vadd.f32 %v1480_v56, %v1183_v14  ;;  %v1896_v40 = vadd.f32 %v5076_v9, %v6335_v25  ;;  %v2105_v55 = vpop.f32.mrf.mxu0 }
 0x156   : > { %v1735_v44 = vpop.f32.mrf.mxu1 }
 0x157   : > { %v6437_v7 = vadd.f32 %v5124_v6, %v1896_v40  ;;  %v1894_v46 = vadd.f32 %v1735_v44, %v6338_v60  ;;  %v5125_v42 = vpop.f32.mrf.mxu0 }
 0x158   : > { %v5077_v62 = vpop.f32.mrf.mxu1 }
 0x159   : > { %v6440_v13 = vadd.f32 %v2105_v55, %v1894_v46  ;;  %v1897_v35 = vadd.f32 %v5077_v62, %v6341_v58  ;;  %v2108_v31 = vpop.f32.mrf.mxu0 }
 0x15a   : > { %v1738_v26 = vpop.f32.mrf.mxu1 }
 0x15b   : > { %v6443_v11 = vadd.f32 %v5125_v42, %v1897_v35  ;;  %v1895_v1 = vadd.f32 %v1738_v26, %v6344_v28  ;;  %v5128_v25 = vpop.f32.mrf.mxu0 }
 0x15c   : > { %v5080_v37 = vpop.f32.mrf.mxu1 }
 0x15d   : > { %v6446_v36 = vadd.f32 %v2108_v31, %v1895_v1  ;;  %v1900_v12 = vadd.f32 %v5080_v37, %v6347_v48  ;;  %v2121_v60 = vpop.f32.mrf.mxu0 }
 0x15e   : > { %v1751_v20 = vpop.f32.mrf.mxu1 }
 0x15f   : > { %v6449_v39 = vadd.f32 %v5128_v25, %v1900_v12  ;;  %v1898_v54 = vadd.f32 %v1751_v20, %v6350_v3  ;;  %v5129_v58 = vpop.f32.mrf.mxu0 }
 0x160   : > { %v5081_v22 = vpop.f32.mrf.mxu1 }
 0x161   : > { %v6452_v50 = vadd.f32 %v2121_v60, %v1898_v54  ;;  %v1901_v27 = vadd.f32 %v5081_v22, %v6353_v8  ;;  %v2124_v28 = vpop.f32.mrf.mxu0 }
 0x162   : > { %v1754_v15 = vpop.f32.mrf.mxu1 }
 0x163   : > { %v6455_v52 = vadd.f32 %v5129_v58, %v1901_v27  ;;  %v1899_v2 = vadd.f32 %v1754_v15, %v6356_v19  ;;  %v5132_v48 = vpop.f32.mrf.mxu0 }
 0x164   : > { %v5084_v16 = vpop.f32.mrf.mxu1 }
 0x165   : > { %v6458_v30 = vadd.f32 %v2124_v28, %v1899_v2  ;;  %v1904_v32 = vadd.f32 %v5084_v16, %v6360_v53  ;;  %v2137_v3 = vpop.f32.mrf.mxu0 }
 0x166   : > { %v1767_v56 = vpop.f32.mrf.mxu1 }
 0x167   : > { %v6461_v14 = vadd.f32 %v5132_v48, %v1904_v32  ;;  %v1902_v9 = vadd.f32 %v1767_v56, %v6363_v29  ;;  %v5133_v8 = vpop.f32.mrf.mxu0 }
 0x168   : > { %v5085_v6 = vpop.f32.mrf.mxu1 }
 0x169   : > { %v6464_v40 = vadd.f32 %v2137_v3, %v1902_v9  ;;  %v1905_v44 = vadd.f32 %v5085_v6, %v6366_v10  ;;  %v2140_v19 = vpop.f32.mrf.mxu0 }
 0x16a   : > { %v1770_v55 = vpop.f32.mrf.mxu1 }
 0x16b   : > { %v6467_v46 = vadd.f32 %v5133_v8, %v1905_v44  ;;  %v1903_v62 = vadd.f32 %v1770_v55, %v6370_v0  ;;  %v5136_v53 = vpop.f32.mrf.mxu0 }
 0x16c   : > { %v5088_v42 = vpop.f32.mrf.mxu1 }
 0x16d   : > { %v6470_v35 = vadd.f32 %v2140_v19, %v1903_v62  ;;  %v1908_v26 = vadd.f32 %v5088_v42, %v6374_v17  ;;  %v2153_v29 = vpop.f32.mrf.mxu0 }
 0x16e   : > { %v1783_v31 = vpop.f32.mrf.mxu1 }
 0x16f   : > { %v6473_v1 = vadd.f32 %v5136_v53, %v1908_v26  ;;  %v1906_v37 = vadd.f32 %v1783_v31, %v6377_v38  ;;  %v5137_v10 = vpop.f32.mrf.mxu0 }
 0x170   : > { %v5089_v25 = vpop.f32.mrf.mxu1 }
 0x171   : > { %v6476_v12 = vadd.f32 %v2153_v29, %v1906_v37  ;;  %v1909_v20 = vadd.f32 %v5089_v25, %v6380_v63  ;;  %v2156_v0 = vpop.f32.mrf.mxu0 }
 0x172   : > { %v1786_v60 = vpop.f32.mrf.mxu1 }
 0x173   : > { %v6479_v54 = vadd.f32 %v5137_v10, %v1909_v20  ;;  %v1907_v22 = vadd.f32 %v1786_v60, %v6384_v51  ;;  %v5140_v17 = vpop.f32.mrf.mxu0 }
 0x174   : > { %v5092_v58 = vpop.f32.mrf.mxu1 }
 0x175   : > { %v6482_v27 = vadd.f32 %v2156_v0, %v1907_v22  ;;  %v1912_v15 = vadd.f32 %v5092_v58, %v6387_v49  ;;  %v2169_v38 = vpop.f32.mrf.mxu0 }
 0x176   : > { %v1799_v28 = vpop.f32.mrf.mxu1 }
 0x177   : > { %v6485_v2 = vadd.f32 %v5140_v17, %v1912_v15  ;;  %v1910_v16 = vadd.f32 %v1799_v28, %v6390_v57  ;;  %v5141_v63 = vpop.f32.mrf.mxu0 }
 0x178   : > { %v5093_v48 = vpop.f32.mrf.mxu1 }
 0x179   : > { %v6488_v32 = vadd.f32 %v2169_v38, %v1910_v16  ;;  %v1913_v56 = vadd.f32 %v5093_v48, %v6393_v23  ;;  %v2172_v51 = vpop.f32.mrf.mxu0 }
 0x17a   : > { %v1802_v3 = vpop.f32.mrf.mxu1 }
 0x17b   : > { %v6491_v9 = vadd.f32 %v5141_v63, %v1913_v56  ;;  %v1911_v6 = vadd.f32 %v1802_v3, %v6396_v34  ;;  %v5144_v49 = vpop.f32.mrf.mxu0 }
 0x17c   : > { %v5096_v8 = vpop.f32.mrf.mxu1 }
 0x17d   : > { %v6494_v44 = vadd.f32 %v2172_v51, %v1911_v6  ;;  %v1916_v55 = vadd.f32 %v5096_v8, %v6399_v61  ;;  %v2185_v57 = vpop.f32.mrf.mxu0 }
 0x17e   : > { %v1815_v19 = vpop.f32.mrf.mxu1 }
 0x17f   : > { %v6497_v62 = vadd.f32 %v5144_v49, %v1916_v55  ;;  %v1914_v42 = vadd.f32 %v1815_v19, %v6402_v59  ;;  %v5145_v23 = vpop.f32.mrf.mxu0 }
 0x180   : > { %v5097_v53 = vpop.f32.mrf.mxu1 }
 0x181   : > { %v6500_v26 = vadd.f32 %v2185_v57, %v1914_v42  ;;  %v1917_v31 = vadd.f32 %v5097_v53, %v6405_v4  ;;  %v2188_v34 = vpop.f32.mrf.mxu0 }
 0x182   : > { %v1818_v29 = vpop.f32.mrf.mxu1 }
 0x183   : > { %6797 = vst [vmem:[#allocation4_spill] sm:$0xff] %v6500_v26  ;;  %v6503_v37 = vadd.f32 %v5145_v23, %v1917_v31  ;;  %v1915_v25 = vadd.f32 %v1818_v29, %v6408_v33  ;;  %v5148_v61 = vpop.f32.mrf.mxu0 }
 0x184   : > { %v5100_v10 = vpop.f32.mrf.mxu1 }
 0x185   : > { %6798 = vst [vmem:[#allocation5_spill] sm:$0xff] %v6503_v37  ;;  %v6506_v20 = vadd.f32 %v2188_v34, %v1915_v25  ;;  %v1920_v60 = vadd.f32 %v5100_v10, %v6413_v24  ;;  %v2201_v59 = vpop.f32.mrf.mxu0 }
 0x186   : > { %v1831_v0 = vpop.f32.mrf.mxu1 }
 0x187   : > { %6799 = vst [vmem:[#allocation6_spill] sm:$0xff] %v6506_v20  ;;  %v6509_v22 = vadd.f32 %v5148_v61, %v1920_v60  ;;  %v1918_v58 = vadd.f32 %v1831_v0, %v6416_v41  ;;  %v5149_v4 = vpop.f32.mrf.mxu0 }
 0x188   : > { %v5101_v17 = vpop.f32.mrf.mxu1 }
 0x189   : > { %v6512_v15 = vadd.f32 %v2201_v59, %v1918_v58  ;;  %v1921_v28 = vadd.f32 %v5101_v17, %v6419_v5  ;;  %v2204_v33 = vpop.f32.mrf.mxu0 }
 0x18a   : > { %v1834_v38 = vpop.f32.mrf.mxu1 }
 0x18b   : > { %6800 = vst [vmem:[#allocation7_spill] sm:$0xff] %v6512_v15  ;;  %v6515_v16 = vadd.f32 %v5149_v4, %v1921_v28  ;;  %v1919_v48 = vadd.f32 %v1834_v38, %v6422_v18  ;;  %v5152_v24 = vpop.f32.mrf.mxu0 }
 0x18c   : > { %v5104_v63 = vpop.f32.mrf.mxu1 }
 0x18d   : > { %6801 = vst [vmem:[#allocation8_spill] sm:$0xff] %v6515_v16  ;;  %v6518_v56 = vadd.f32 %v2204_v33, %v1919_v48  ;;  %v1924_v3 = vadd.f32 %v5104_v63, %v6425_v43  ;;  %v2217_v41 = vpop.f32.mrf.mxu0 }
 0x18e   : > { %v1847_v51 = vpop.f32.mrf.mxu1 }
 0x18f   : > { %6802 = vst [vmem:[#allocation9_spill] sm:$0xff] %v6518_v56  ;;  %v6521_v6 = vadd.f32 %v5152_v24, %v1924_v3  ;;  %v1922_v8 = vadd.f32 %v1847_v51, %v6428_v21  ;;  %v5153_v5 = vpop.f32.mrf.mxu0 }
 0x190   : > { %v5105_v49 = vpop.f32.mrf.mxu1 }
 0x191   : > { %v6524_v55 = vadd.f32 %v2217_v41, %v1922_v8  ;;  %v1925_v19 = vadd.f32 %v5105_v49, %v6431_v47  ;;  %v2220_v18 = vpop.f32.mrf.mxu0 }
 0x192   : > { %v1850_v57 = vpop.f32.mrf.mxu1 }
 0x193   : > { %6803 = vst [vmem:[#allocation10_spill] sm:$0xff] %v6524_v55  ;;  %v6527_v42 = vadd.f32 %v5153_v5, %v1925_v19  ;;  %v1923_v53 = vadd.f32 %v1850_v57, %v6434_v45  ;;  %v5220_v43 = vpop.f32.mrf.mxu0 }
 0x194   : > { %v5172_v23 = vpop.f32.mrf.mxu1 }
 0x195   : > { %6804 = vst [vmem:[#allocation11_spill] sm:$0xff] %v6527_v42  ;;  %v6530_v31 = vadd.f32 %v2220_v18, %v1923_v53  ;;  %v2636_v29 = vadd.f32 %v5172_v23, %v6437_v7  ;;  %v2846_v21 = vpop.f32.mrf.mxu0 }
 0x196   : > { %v2475_v34 = vpop.f32.mrf.mxu1 }
 0x197   : > { %6805 = vst [vmem:[#allocation12_spill] sm:$0xff] %v6530_v31  ;;  %v6533_v25 = vadd.f32 %v5220_v43, %v2636_v29  ;;  %v2634_v10 = vadd.f32 %v2475_v34, %v6440_v13  ;;  %v6538_v47 = vpop.f32.mrf.mxu0 }
 0x198   : > { %v6536_v61 = vpop.f32.mrf.mxu1 }
 0x199   : > { %v6540_v60 = vadd.f32 %v2846_v21, %v2634_v10  ;;  %v6544_v45 = vpop.f32.mrf.mxu0 }
 0x19a   : > { %v6542_v0 = vpop.f32.mrf.mxu1 }
 0x19b   : > { %v5224_v58 = vpop.f32.mrf.mxu0 }
 0x19c   : > { %v5176_v59 = vpop.f32.mrf.mxu1 }
 0x19d   : > { %v2640_v7 = vadd.f32 %v5176_v59, %v6449_v39  ;;  %v6549_v4 = vpop.f32.mrf.mxu0 }
 0x19e   : > { %v6547_v17 = vpop.f32.mrf.mxu1 }
 0x19f   : > { %v6551_v28 = vadd.f32 %v5224_v58, %v2640_v7  ;;  %v6555_v38 = vpop.f32.mrf.mxu0 }
 0x1a0   : > { %v6553_v13 = vpop.f32.mrf.mxu1 }
 0x1a1   : > { %v6559_v48 = vpop.f32.mrf.mxu0 }
 0x1a2   : > { %v6557_v33 = vpop.f32.mrf.mxu1 }
 0x1a3   : > { %v5228_v24 = vpop.f32.mrf.mxu0 }
 0x1a4   : > { %v5180_v63 = vpop.f32.mrf.mxu1 }
 0x1a5   : > { %v2644_v3 = vadd.f32 %v5180_v63, %v6461_v14  ;;  %v6564_v39 = vpop.f32.mrf.mxu0 }
 0x1a6   : > { %v6562_v51 = vpop.f32.mrf.mxu1 }
 0x1a7   : > { %v6566_v41 = vadd.f32 %v5228_v24, %v2644_v3  ;;  %v6570_v49 = vpop.f32.mrf.mxu0 }
 0x1a8   : > { %v6568_v8 = vpop.f32.mrf.mxu1 }
 0x1a9   : > { %v6574_v19 = vpop.f32.mrf.mxu0 }
 0x1aa   : > { %v6572_v5 = vpop.f32.mrf.mxu1 }
 0x1ab   : > { %v5232_v18 = vpop.f32.mrf.mxu0 }
 0x1ac   : > { %v5184_v57 = vpop.f32.mrf.mxu1 }
 0x1ad   : > { %v2648_v53 = vadd.f32 %v5184_v57, %v6473_v1  ;;  %v6579_v14 = vpop.f32.mrf.mxu0 }
 0x1ae   : > { %v6577_v23 = vpop.f32.mrf.mxu1 }
 0x1af   : > { %v6581_v43 = vadd.f32 %v5232_v18, %v2648_v53  ;;  %v6585_v34 = vpop.f32.mrf.mxu0 }
 0x1b0   : > { %v6583_v29 = vpop.f32.mrf.mxu1 }
 0x1b1   : > { %v6589_v10 = vpop.f32.mrf.mxu0 }
 0x1b2   : > { %v6587_v21 = vpop.f32.mrf.mxu1 }
 0x1b3   : > { %v5236_v58 = vpop.f32.mrf.mxu0 }
 0x1b4   : > { %v5188_v59 = vpop.f32.mrf.mxu1 }
 0x1b5   : > { %v2652_v7 = vadd.f32 %v5188_v59, %v6485_v2  ;;  %v6594_v1 = vpop.f32.mrf.mxu0 }
 0x1b6   : > { %v6592_v63 = vpop.f32.mrf.mxu1 }
 0x1b7   : > { %v6596_v24 = vadd.f32 %v5236_v58, %v2652_v7  ;;  %v6600_v57 = vpop.f32.mrf.mxu0 }
 0x1b8   : > { %v6598_v3 = vpop.f32.mrf.mxu1 }
 0x1b9   : > { %v6604_v53 = vpop.f32.mrf.mxu0 }
 0x1ba   : > { %v6602_v18 = vpop.f32.mrf.mxu1  ;;  %6806 = vst [vmem:[#allocation13_spill] sm:$0xff] %v6604_v53 }
 0x1bb   : > { %v5240_v42 = vpop.f32.mrf.mxu0 }
 0x1bc   : > { %v5192_v31 = vpop.f32.mrf.mxu1 }
 0x1bd   : > { %v2656_v55 = vadd.f32 %v5192_v31, %v6497_v62  ;;  %v6609_v2 = vpop.f32.mrf.mxu0 }
 0x1be   : > { %v6607_v56 = vpop.f32.mrf.mxu1  ;;  %6807 = vst [vmem:[#allocation14_spill] sm:$0xff] %v6609_v2 }
 0x1bf   : > { %v6611_v59 = vadd.f32 %v5240_v42, %v2656_v55  ;;  %v6615_v7 = vpop.f32.mrf.mxu0 }
 0x1c0   : > { %v6613_v58 = vpop.f32.mrf.mxu1  ;;  %6810 = vst [vmem:[#allocation17_spill] sm:$0xff] %v6615_v7 }
 0x1c1   : > { %6808 = vst [vmem:[#allocation15_spill] sm:$0xff] %v6611_v59  ;;  %6809 = vst [vmem:[#allocation16_spill] sm:$0xff] %v6613_v58  ;;  %v6619_v15 = vpop.f32.mrf.mxu0 }
 0x1c2   : > { %v6617_v16 = vpop.f32.mrf.mxu1  ;;  %6812 = vst [vmem:[#allocation19_spill] sm:$0xff] %v6619_v15 }
 0x1c3   : > { %6811 = vst [vmem:[#allocation18_spill] sm:$0xff] %v6617_v16  ;;  %v5244_v37 = vpop.f32.mrf.mxu0 }
 0x1c4   : > { %v5196_v20 = vpop.f32.mrf.mxu1 }
 0x1c5   : > { %v2660_v26 = vadd.f32 %v5196_v20, %v6509_v22  ;;  %v6624_v62 = vpop.f32.mrf.mxu0 }
 0x1c6   : > { %v6622_v53 = vpop.f32.mrf.mxu1  ;;  %6813 = vst [vmem:[#allocation20_spill] sm:$0xff] %v6624_v62 }
 0x1c7   : > { %v6626_v31 = vadd.f32 %v5244_v37, %v2660_v26  ;;  %v6630_v42 = vpop.f32.mrf.mxu0 }
 0x1c8   : > { %v6628_v55 = vpop.f32.mrf.mxu1  ;;  %6816 = vst [vmem:[#allocation23_spill] sm:$0xff] %v6630_v42 }
 0x1c9   : > { %6814 = vst [vmem:[#allocation21_spill] sm:$0xff] %v6626_v31  ;;  %6815 = vst [vmem:[#allocation22_spill] sm:$0xff] %v6628_v55  ;;  %v6634_v7 = vpop.f32.mrf.mxu0 }
 0x1ca   : > { %v6632_v59 = vpop.f32.mrf.mxu1  ;;  %6818 = vst [vmem:[#allocation25_spill] sm:$0xff] %v6634_v7  ;;  %v2637_v7 = vadd.f32 %v6536_v61, %v6443_v11  ;;  %v2638_v11 = vadd.f32 %v6547_v17, %v6452_v50 }
 0x1cb   : > { %6817 = vst [vmem:[#allocation24_spill] sm:$0xff] %v6632_v59  ;;  %v5248_v15 = vpop.f32.mrf.mxu0 }
 0x1cc   : > { %v5200_v16 = vpop.f32.mrf.mxu1  ;;  %v3009_v17 = vadd.f32 %v6549_v4, %v2638_v11 }
 0x1cd   : > { %v2664_v2 = vadd.f32 %v5200_v16, %v6521_v6  ;;  %v6639_v20 = vpop.f32.mrf.mxu0  ;;  %v2635_v16 = vadd.f32 %v6542_v0, %v6446_v36  ;;  %v2641_v36 = vadd.f32 %v6553_v13, %v6455_v52 }
 0x1ce   : > { %v6637_v58 = vpop.f32.mrf.mxu1  ;;  %6820 = vst [vmem:[#allocation27_spill] sm:$0xff] %v6639_v20 }
 0x1cf   : > { %6819 = vst [vmem:[#allocation26_spill] sm:$0xff] %v6637_v58  ;;  %v6641_v22 = vadd.f32 %v5248_v15, %v2664_v2  ;;  %v6645_v37 = vpop.f32.mrf.mxu0  ;;  %v3008_v15 = vadd.f32 %v6538_v47, %v2637_v7  ;;  %v3012_v13 = vadd.f32 %v6555_v38, %v2641_v36 }
 0x1d0   : > { %v6643_v26 = vpop.f32.mrf.mxu1  ;;  %6823 = vst [vmem:[#allocation30_spill] sm:$0xff] %v6645_v37 }
 0x1d1   : > { %6821 = vst [vmem:[#allocation28_spill] sm:$0xff] %v6641_v22  ;;  %6822 = vst [vmem:[#allocation29_spill] sm:$0xff] %v6643_v26  ;;  %v6649_v42 = vpop.f32.mrf.mxu0 }
 0x1d2   : > { %v6647_v31 = vpop.f32.mrf.mxu1  ;;  %6825 = vst [vmem:[#allocation32_spill] sm:$0xff] %v6649_v42  ;;  %v3006_v42 = vadd.f32 %v6544_v45, %v2635_v16 }
 0x1d3   : > { %6824 = vst [vmem:[#allocation31_spill] sm:$0xff] %v6647_v31  ;;  %v5316_v62 = vpop.f32.mrf.mxu0 }
 0x1d4   : > { %v5268_v59 = vpop.f32.mrf.mxu1 }
 0x1d5   : > { %v3586_v20 = vpop.f32.mrf.mxu0  ;;  %v3377_v2 = vadd.f32 %v5268_v59, %v6533_v25  ;;  %v2639_v25 = vadd.f32 %v6557_v33, %v6458_v30 }
 0x1d6   : > { %v3216_v6 = vpop.f32.mrf.mxu1 }
 0x1d7   : > { %v3375_v22 = vadd.f32 %v3216_v6, %v6540_v60  ;;  %v5317_v31 = vpop.f32.mrf.mxu0  ;;  %v3747_v58 = vadd.f32 %v5316_v62, %v3377_v2 }
 0x1d8   : > { %v5269_v37 = vpop.f32.mrf.mxu1 }
 0x1d9   : > { %v3378_v26 = vadd.f32 %v5269_v37, %v3008_v15  ;;  %v3589_v0 = vpop.f32.mrf.mxu0  ;;  %v3745_v47 = vadd.f32 %v3586_v20, %v3375_v22  ;;  %v3010_v22 = vadd.f32 %v6559_v48, %v2639_v25  ;;  %v4041_v16 = vmul.f32 %v3747_v58, %v3747_v58 }
 0x1da   : > { %v3219_v61 = vpop.f32.mrf.mxu1  ;;  %v2645_v15 = vadd.f32 %v6568_v8, %v6467_v46 }
 0x1db   : > { %v3748_v7 = vadd.f32 %v5317_v31, %v3378_v26  ;;  %v3376_v55 = vadd.f32 %v3219_v61, %v3006_v42  ;;  %v5320_v60 = vpop.f32.mrf.mxu0  ;;  %v4039_v33 = vmul.f32 %v3745_v47, %v3745_v47  ;;  %v2642_v26 = vadd.f32 %v6562_v51, %v6464_v40 }
 0x1dc   : > { %v5272_v50 = vpop.f32.mrf.mxu1 }
 0x1dd   : > { %v4596_v45 = vpack.c.bf16 %v3748_v7, %v3747_v58  ;;  %v3746_v52 = vadd.f32 %v3589_v0, %v3376_v55  ;;  %v3381_v59 = vadd.f32 %v5272_v50, %v6551_v28  ;;  %v3602_v30 = vpop.f32.mrf.mxu0  ;;  %v4042_v2 = vmul.f32 %v3748_v7, %v3748_v7 }
 0x1de   : > { %v3232_v62 = vpop.f32.mrf.mxu1  ;;  %v3013_v25 = vadd.f32 %v6564_v39, %v2642_v26  ;;  %v2649_v26 = vadd.f32 %v6583_v29, %v6479_v54  ;;  %v2647_v54 = vadd.f32 %v6587_v21, %v6482_v27 }
 0x1df   : > { %4683 = vst [vmem:[%s6670_s14 + $0x8] sm:$0xff] %v4596_v45   ;;  %v4591_v31 = vpack.c.bf16 %v3746_v52, %v3745_v47  ;;  %v4001_v42 = vadd.f32 %v3746_v52, %v3745_v47  ;;  %v4040_v20 = vmul.f32 %v3746_v52, %v3746_v52  ;;  %v3379_v55 = vadd.f32 %v3232_v62, %v3009_v17  ;;  %v5321_v4 = vpop.f32.mrf.mxu0 }
 0x1e0   : > { %v5273_v37 = vpop.f32.mrf.mxu1  ;;  %v3751_v11 = vadd.f32 %v5320_v60, %v3381_v59  ;;  %v3018_v21 = vadd.f32 %v6589_v10, %v2647_v54 }
 0x1e1   : > { %4592 = vst [vmem:[%s6670_s14] sm:$0xff] %v4591_v31   ;;  %v4002_v38 = vadd.f32 %v4001_v42, %v3747_v58  ;;  %v4071_v6 = vadd.f32 %v4040_v20, %v4039_v33  ;;  %v3382_v28 = vadd.f32 %v5273_v37, %v3012_v13  ;;  %v3749_v36 = vadd.f32 %v3602_v30, %v3379_v55  ;;  %v3605_v0 = vpop.f32.mrf.mxu0 }
 0x1e2   : > { %v3235_v61 = vpop.f32.mrf.mxu1  ;;  %v2643_v58 = vadd.f32 %v6572_v5, %v6470_v35 }
 0x1e3   : > { %v4072_v48 = vadd.f32 %v4071_v6, %v4041_v16  ;;  %v4003_v47 = vadd.f32 %v4002_v38, %v3748_v7  ;;  %v3752_v40 = vadd.f32 %v5321_v4, %v3382_v28  ;;  %v3380_v51 = vadd.f32 %v3235_v61, %v3010_v22  ;;  %v5324_v45 = vpop.f32.mrf.mxu0 }
 0x1e4   : > { %v5276_v50 = vpop.f32.mrf.mxu1  ;;  %v4043_v17 = vmul.f32 %v3749_v36, %v3749_v36  ;;  %v3016_v7 = vadd.f32 %v6570_v49, %v2645_v15  ;;  %v3014_v20 = vadd.f32 %v6574_v19, %v2643_v58  ;;  %v2646_v22 = vadd.f32 %v6577_v23, %v6476_v12 }
 0x1e5   : > { %v4004_v52 = vadd.f32 %v4003_v47, %v3749_v36  ;;  %v4073_v46 = vadd.f32 %v4072_v48, %v4042_v2  ;;  %v4606_v8 = vpack.c.bf16 %v3752_v40, %v3751_v11  ;;  %v3750_v60 = vadd.f32 %v3605_v0, %v3380_v51  ;;  %v3618_v59 = vpop.f32.mrf.mxu0 }
 0x1e6   : > { %v3248_v13 = vpop.f32.mrf.mxu1  ;;  %v3385_v30 = vadd.f32 %v5276_v50, %v6566_v41  ;;  %v4045_v49 = vmul.f32 %v3751_v11, %v3751_v11  ;;  %v4046_v2 = vmul.f32 %v3752_v40, %v3752_v40  ;;  %v3017_v23 = vadd.f32 %v6579_v14, %v2646_v22 }
 0x1e7   : > { %v4074_v62 = vadd.f32 %v4073_v46, %v4043_v17  ;;  %4685 = vst [vmem:[%s6670_s14 + $0x18] sm:$0xff] %v4606_v8   ;;  %v3383_v39 = vadd.f32 %v3248_v13, %v3013_v25  ;;  %v4601_v33 = vpack.c.bf16 %v3750_v60, %v3749_v36  ;;  %v4005_v31 = vadd.f32 %v4004_v52, %v3750_v60  ;;  %v5325_v42 = vpop.f32.mrf.mxu0 }
 0x1e8   : > { %v4044_v35 = vmul.f32 %v3750_v60, %v3750_v60  ;;  %v5277_v5 = vpop.f32.mrf.mxu1  ;;  %v3755_v6 = vadd.f32 %v5324_v45, %v3385_v30  ;;  %v3020_v0 = vadd.f32 %v6585_v34, %v2649_v26  ;;  %v2650_v34 = vadd.f32 %v6592_v63, %v6488_v32 }
 0x1e9   : > { %v3386_v55 = vadd.f32 %v5277_v5, %v3016_v7  ;;  %4684 = vst [vmem:[%s6670_s14 + $0x10] sm:$0xff] %v4601_v33   ;;  %v4006_v37 = vadd.f32 %v4005_v31, %v3751_v11  ;;  %v3753_v41 = vadd.f32 %v3618_v59, %v3383_v39  ;;  %v3621_v38 = vpop.f32.mrf.mxu0  ;;  %v2653_v8 = vadd.f32 %v6598_v3, %v6491_v9 }
 0x1ea   : > { %v4075_v4 = vadd.f32 %v4074_v62, %v4044_v35  ;;  %v3251_v16 = vpop.f32.mrf.mxu1  ;;  %v4049_v13 = vmul.f32 %v3755_v6, %v3755_v6  ;;  %v3021_v63 = vadd.f32 %v6594_v1, %v2650_v34  ;;  %v2651_v9 = vadd.f32 %v6602_v18, %v6494_v44  ;;  %v6826_v18 = vld [vmem:[#allocation13_spill] sm:$0xff] }
 0x1eb   : > { %v3756_v28 = vadd.f32 %v5325_v42, %v3386_v55  ;;  %v3384_v15 = vadd.f32 %v3251_v16, %v3014_v20  ;;  %v4007_v36 = vadd.f32 %v4006_v37, %v3752_v40  ;;  %v5328_v12 = vpop.f32.mrf.mxu0  ;;  %v4047_v47 = vmul.f32 %v3753_v41, %v3753_v41 }
 0x1ec   : > { %v4076_v19 = vadd.f32 %v4075_v4, %v4045_v49  ;;  %v5280_v61 = vpop.f32.mrf.mxu1  ;;  %v3024_v22 = vadd.f32 %v6600_v57, %v2653_v8  ;;  %v6833_v8 = vld [vmem:[#allocation17_spill] sm:$0xff] }
 0x1ed   : > { %v4616_v29 = vpack.c.bf16 %v3756_v28, %v3755_v6  ;;  %v3754_v11 = vadd.f32 %v3621_v38, %v3384_v15  ;;  %v4008_v48 = vadd.f32 %v4007_v36, %v3753_v41  ;;  %v3634_v58 = vpop.f32.mrf.mxu0  ;;  %v3389_v45 = vadd.f32 %v5280_v61, %v6581_v43  ;;  %v6828_v36 = vld [vmem:[#allocation5_spill] sm:$0xff]  ;;  %v6829_v61 = vld [vmem:[#allocation16_spill] sm:$0xff] }
 0x1ee   : > { %v4077_v51 = vadd.f32 %v4076_v19, %v4046_v2  ;;  %v3264_v25 = vpop.f32.mrf.mxu1  ;;  %v4050_v35 = vmul.f32 %v3756_v28, %v3756_v28  ;;  %v3022_v2 = vadd.f32 %v6826_v18, %v2651_v9  ;;  %v6827_v19 = vld [vmem:[#allocation4_spill] sm:$0xff] }
 0x1ef   : > { %4687 = vst [vmem:[%s6670_s14 + $0x28] sm:$0xff] %v4616_v29   ;;  %v4611_v50 = vpack.c.bf16 %v3754_v11, %v3753_v41  ;;  %v4048_v40 = vmul.f32 %v3754_v11, %v3754_v11  ;;  %v3387_v52 = vadd.f32 %v3264_v25, %v3017_v23  ;;  %v4009_v17 = vadd.f32 %v4008_v48, %v3754_v11  ;;  %v5329_v27 = vpop.f32.mrf.mxu0 }
 0x1f0   : > { %v4078_v14 = vadd.f32 %v4077_v51, %v4047_v47  ;;  %v5281_v46 = vpop.f32.mrf.mxu1  ;;  %v3759_v39 = vadd.f32 %v5328_v12, %v3389_v45  ;;  %v2654_v57 = vadd.f32 %v6607_v56, %v6827_v19  ;;  %v2657_v12 = vadd.f32 %v6829_v61, %v6828_v36  ;;  %v6840_v61 = vld [vmem:[#allocation9_spill] sm:$0xff] }
 0x1f1   : > { %4686 = vst [vmem:[%s6670_s14 + $0x20] sm:$0xff] %v4611_v50   ;;  %v3390_v60 = vadd.f32 %v5281_v46, %v3020_v0  ;;  %v4010_v59 = vadd.f32 %v4009_v17, %v3755_v6  ;;  %v3757_v62 = vadd.f32 %v3634_v58, %v3387_v52  ;;  %v3637_v30 = vpop.f32.mrf.mxu0  ;;  %v6830_v52 = vld [vmem:[#allocation14_spill] sm:$0xff] }
 0x1f2   : > { %v4079_v7 = vadd.f32 %v4078_v14, %v4048_v40  ;;  %v3267_v43 = vpop.f32.mrf.mxu1  ;;  %v4053_v54 = vmul.f32 %v3759_v39, %v3759_v39  ;;  %v3025_v14 = vadd.f32 %v6830_v52, %v2654_v57  ;;  %v6831_v17 = vld [vmem:[#allocation6_spill] sm:$0xff]  ;;  %v6839_v57 = vld [vmem:[#allocation20_spill] sm:$0xff] }
 0x1f3   : > { %v3760_v33 = vadd.f32 %v5329_v27, %v3390_v60  ;;  %v3388_v31 = vadd.f32 %v3267_v43, %v3018_v21  ;;  %v4011_v5 = vadd.f32 %v4010_v59, %v3756_v28  ;;  %v5332_v32 = vpop.f32.mrf.mxu0  ;;  %v4051_v55 = vmul.f32 %v3757_v62, %v3757_v62  ;;  %v6832_v46 = vld [vmem:[#allocation18_spill] sm:$0xff] }
 0x1f4   : > { %v4080_v10 = vadd.f32 %v4079_v7, %v4049_v13  ;;  %v5284_v42 = vpop.f32.mrf.mxu1  ;;  %v2655_v27 = vadd.f32 %v6832_v46, %v6831_v17  ;;  %v3028_v60 = vadd.f32 %v6833_v8, %v2657_v12  ;;  %v6841_v12 = vld [vmem:[#allocation24_spill] sm:$0xff]  ;;  %v6846_v8 = vld [vmem:[#allocation26_spill] sm:$0xff] }
 0x1f5   : > { %v4626_v3 = vpack.c.bf16 %v3760_v33, %v3759_v39  ;;  %v3758_v20 = vadd.f32 %v3637_v30, %v3388_v31  ;;  %v4012_v26 = vadd.f32 %v4011_v5, %v3757_v62  ;;  %v3650_v4 = vpop.f32.mrf.mxu0  ;;  %v3393_v38 = vadd.f32 %v5284_v42, %v6596_v24 }
 0x1f6   : > { %v4081_v49 = vadd.f32 %v4080_v10, %v4050_v35  ;;  %v3280_v37 = vpop.f32.mrf.mxu1  ;;  %v4054_v58 = vmul.f32 %v3760_v33, %v3760_v33 }
 0x1f7   : > { %4689 = vst [vmem:[%s6670_s14 + $0x38] sm:$0xff] %v4626_v3   ;;  %v4621_v41 = vpack.c.bf16 %v3758_v20, %v3757_v62  ;;  %v4052_v16 = vmul.f32 %v3758_v20, %v3758_v20  ;;  %v3391_v6 = vadd.f32 %v3280_v37, %v3021_v63  ;;  %v4013_v28 = vadd.f32 %v4012_v26, %v3758_v20  ;;  %v5333_v44 = vpop.f32.mrf.mxu0  ;;  %v6835_v63 = vld [vmem:[#allocation19_spill] sm:$0xff]  ;;  %v6838_v26 = vld [vmem:[#allocation22_spill] sm:$0xff] }
 0x1f8   : > { %v4082_v1 = vadd.f32 %v4081_v49, %v4051_v55  ;;  %v5285_v15 = vpop.f32.mrf.mxu1  ;;  %v3763_v47 = vadd.f32 %v5332_v32, %v3393_v38  ;;  %v3026_v9 = vadd.f32 %v6835_v63, %v2655_v27  ;;  %v6836_v3 = vld [vmem:[#allocation7_spill] sm:$0xff]  ;;  %v6844_v27 = vld [vmem:[#allocation25_spill] sm:$0xff] }
 0x1f9   : > { %4688 = vst [vmem:[%s6670_s14 + $0x30] sm:$0xff] %v4621_v41   ;;  %v3394_v23 = vadd.f32 %v5285_v15, %v3024_v22  ;;  %v4014_v29 = vadd.f32 %v4013_v28, %v3759_v39  ;;  %v3761_v0 = vadd.f32 %v3650_v4, %v3391_v6  ;;  %v3653_v48 = vpop.f32.mrf.mxu0  ;;  %v2658_v20 = vadd.f32 %v6622_v53, %v6836_v3  ;;  %v6837_v22 = vld [vmem:[#allocation8_spill] sm:$0xff] }
 0x1fa   : > { %v4083_v11 = vadd.f32 %v4082_v1, %v4052_v16  ;;  %v3283_v24 = vpop.f32.mrf.mxu1  ;;  %v2661_v55 = vadd.f32 %v6838_v26, %v6837_v22  ;;  %v4057_v37 = vmul.f32 %v3763_v47, %v3763_v47  ;;  %v6849_v22 = vld [vmem:[#allocation27_spill] sm:$0xff] }
 0x1fb   : > { %v3764_v51 = vadd.f32 %v5333_v44, %v3394_v23  ;;  %v3392_v25 = vadd.f32 %v3283_v24, %v3022_v2  ;;  %v4015_v40 = vadd.f32 %v4014_v29, %v3760_v33  ;;  %v5336_v56 = vpop.f32.mrf.mxu0  ;;  %v4055_v59 = vmul.f32 %v3761_v0, %v3761_v0  ;;  %v6834_v33 = vld [vmem:[#allocation15_spill] sm:$0xff] }
 0x1fc   : > { %v4084_v50 = vadd.f32 %v4083_v11, %v4053_v54  ;;  %v5288_v45 = vpop.f32.mrf.mxu1  ;;  %v3029_v36 = vadd.f32 %v6839_v57, %v2658_v20  ;;  %v2659_v23 = vadd.f32 %v6841_v12, %v6840_v61  ;;  %v6842_v11 = vld [vmem:[#allocation23_spill] sm:$0xff] }
 0x1fd   : > { %v4636_v21 = vpack.c.bf16 %v3764_v51, %v3763_v47  ;;  %v3762_v34 = vadd.f32 %v3653_v48, %v3392_v25  ;;  %v4016_v13 = vadd.f32 %v4015_v40, %v3761_v0  ;;  %v3666_v43 = vpop.f32.mrf.mxu0  ;;  %v3397_v31 = vadd.f32 %v5288_v45, %v6834_v33  ;;  %v6843_v40 = vld [vmem:[#allocation21_spill] sm:$0xff] }
 0x1fe   : > { %v4085_v7 = vadd.f32 %v4084_v50, %v4054_v58  ;;  %v3296_v62 = vpop.f32.mrf.mxu1  ;;  %v4058_v44 = vmul.f32 %v3764_v51, %v3764_v51 }
 0x1ff   : > { %4691 = vst [vmem:[%s6670_s14 + $0x48] sm:$0xff] %v4636_v21   ;;  %v4631_v30 = vpack.c.bf16 %v3762_v34, %v3761_v0  ;;  %v4056_v39 = vmul.f32 %v3762_v34, %v3762_v34  ;;  %v3395_v35 = vadd.f32 %v3296_v62, %v3025_v14  ;;  %v4017_v5 = vadd.f32 %v4016_v13, %v3762_v34  ;;  %v5337_v32 = vpop.f32.mrf.mxu0  ;;  %v6845_v34 = vld [vmem:[#allocation10_spill] sm:$0xff]  ;;  %v6847_v13 = vld [vmem:[#allocation11_spill] sm:$0xff] }
 0x200   : > { %v4086_v10 = vadd.f32 %v4085_v7, %v4055_v59  ;;  %v5289_v42 = vpop.f32.mrf.mxu1  ;;  %v3767_v1 = vadd.f32 %v5336_v56, %v3397_v31  ;;  %v3032_v0 = vadd.f32 %v6842_v11, %v2661_v55  ;;  %v3030_v21 = vadd.f32 %v6844_v27, %v2659_v23  ;;  %v6848_v59 = vld [vmem:[#allocation29_spill] sm:$0xff]  ;;  %v6850_v55 = vld [vmem:[#allocation12_spill] sm:$0xff] }
 0x201   : > { %4690 = vst [vmem:[%s6670_s14 + $0x40] sm:$0xff] %v4631_v30   ;;  %v3398_v49 = vadd.f32 %v5289_v42, %v3028_v60  ;;  %v4018_v4 = vadd.f32 %v4017_v5, %v3763_v47  ;;  %v3765_v16 = vadd.f32 %v3666_v43, %v3395_v35  ;;  %v3669_v6 = vpop.f32.mrf.mxu0  ;;  %v2662_v60 = vadd.f32 %v6846_v8, %v6845_v34 }
 0x202   : > { %v4087_v41 = vadd.f32 %v4086_v10, %v4056_v39  ;;  %v3299_v38 = vpop.f32.mrf.mxu1  ;;  %v2665_v7 = vadd.f32 %v6848_v59, %v6847_v13  ;;  %v4061_v43 = vmul.f32 %v3767_v1, %v3767_v1 }
 0x203   : > { %v3768_v28 = vadd.f32 %v5337_v32, %v3398_v49  ;;  %v3396_v15 = vadd.f32 %v3299_v38, %v3026_v9  ;;  %v4019_v2 = vadd.f32 %v4018_v4, %v3764_v51  ;;  %v5340_v53 = vpop.f32.mrf.mxu0  ;;  %v4059_v48 = vmul.f32 %v3765_v16, %v3765_v16  ;;  %v6851_v49 = vld [vmem:[#allocation31_spill] sm:$0xff] }
 0x204   : > { %v4088_v18 = vadd.f32 %v4087_v41, %v4057_v37  ;;  %v5292_v19 = vpop.f32.mrf.mxu1  ;;  %v3033_v26 = vadd.f32 %v6849_v22, %v2662_v60  ;;  %v2663_v37 = vadd.f32 %v6851_v49, %v6850_v55 }
 0x205   : > { %v4646_v54 = vpack.c.bf16 %v3768_v28, %v3767_v1  ;;  %v3766_v29 = vadd.f32 %v3669_v6, %v3396_v15  ;;  %v4020_v24 = vadd.f32 %v4019_v2, %v3765_v16  ;;  %v3682_v58 = vpop.f32.mrf.mxu0  ;;  %v3401_v45 = vadd.f32 %v5292_v19, %v6843_v40  ;;  %v6853_v19 = vld [vmem:[#allocation28_spill] sm:$0xff] }
 0x206   : > { %v4089_v47 = vadd.f32 %v4088_v18, %v4058_v44  ;;  %v3312_v25 = vpop.f32.mrf.mxu1  ;;  %v4062_v32 = vmul.f32 %v3768_v28, %v3768_v28 }
 0x207   : > { %4693 = vst [vmem:[%s6670_s14 + $0x58] sm:$0xff] %v4646_v54   ;;  %v4641_v50 = vpack.c.bf16 %v3766_v29, %v3765_v16  ;;  %v4060_v51 = vmul.f32 %v3766_v29, %v3766_v29  ;;  %v3399_v56 = vadd.f32 %v3312_v25, %v3029_v36  ;;  %v4021_v14 = vadd.f32 %v4020_v24, %v3766_v29  ;;  %v5341_v46 = vpop.f32.mrf.mxu0  ;;  %v6852_v16 = vld [vmem:[#allocation30_spill] sm:$0xff]  ;;  %v6854_v54 = vld [vmem:[#allocation32_spill] sm:$0xff] }
 0x208   : > { %v4090_v52 = vadd.f32 %v4089_v47, %v4059_v48  ;;  %v5293_v17 = vpop.f32.mrf.mxu1  ;;  %v3771_v10 = vadd.f32 %v5340_v53, %v3401_v45  ;;  %v3036_v38 = vadd.f32 %v6852_v16, %v2665_v7  ;;  %v3034_v29 = vadd.f32 %v6854_v54, %v2663_v37 }
 0x209   : > { %4692 = vst [vmem:[%s6670_s14 + $0x50] sm:$0xff] %v4641_v50   ;;  %v3402_v62 = vadd.f32 %v5293_v17, %v3032_v0  ;;  %v4022_v30 = vadd.f32 %v4021_v14, %v3767_v1  ;;  %v3769_v33 = vadd.f32 %v3682_v58, %v3399_v56  ;;  %v3685_v35 = vpop.f32.mrf.mxu0 }
 0x20a   : > { %v4091_v39 = vadd.f32 %v4090_v52, %v4060_v51  ;;  %v3315_v31 = vpop.f32.mrf.mxu1  ;;  %v4065_v0 = vmul.f32 %v3771_v10, %v3771_v10 }
 0x20b   : > { %v3772_v5 = vadd.f32 %v5341_v46, %v3402_v62  ;;  %v3400_v42 = vadd.f32 %v3315_v31, %v3030_v21  ;;  %v4023_v9 = vadd.f32 %v4022_v30, %v3768_v28  ;;  %v5344_v20 = vpop.f32.mrf.mxu0  ;;  %v4063_v1 = vmul.f32 %v3769_v33, %v3769_v33 }
 0x20c   : > { %v4092_v63 = vadd.f32 %v4091_v39, %v4061_v43  ;;  %v5296_v3 = vpop.f32.mrf.mxu1 }
 0x20d   : > { %v4656_v4 = vpack.c.bf16 %v3772_v5, %v3771_v10  ;;  %v3770_v41 = vadd.f32 %v3685_v35, %v3400_v42  ;;  %v4024_v6 = vadd.f32 %v4023_v9, %v3769_v33  ;;  %v3698_v18 = vpop.f32.mrf.mxu0  ;;  %v3405_v53 = vadd.f32 %v5296_v3, %v6853_v19 }
 0x20e   : > { %v4093_v15 = vadd.f32 %v4092_v63, %v4062_v32  ;;  %v3328_v44 = vpop.f32.mrf.mxu1  ;;  %v4066_v40 = vmul.f32 %v3772_v5, %v3772_v5 }
 0x20f   : > { %4695 = vst [vmem:[%s6670_s14 + $0x68] sm:$0xff] %v4656_v4   ;;  %v4651_v2 = vpack.c.bf16 %v3770_v41, %v3769_v33  ;;  %v4064_v28 = vmul.f32 %v3770_v41, %v3770_v41  ;;  %v3403_v57 = vadd.f32 %v3328_v44, %v3033_v26  ;;  %v4025_v61 = vadd.f32 %v4024_v6, %v3770_v41  ;;  %v5345_v23 = vpop.f32.mrf.mxu0 }
 0x210   : > { %v4094_v36 = vadd.f32 %v4093_v15, %v4063_v1  ;;  %v5297_v12 = vpop.f32.mrf.mxu1  ;;  %v3775_v58 = vadd.f32 %v5344_v20, %v3405_v53 }
 0x211   : > { %4694 = vst [vmem:[%s6670_s14 + $0x60] sm:$0xff] %v4651_v2   ;;  %v3406_v11 = vadd.f32 %v5297_v12, %v3036_v38  ;;  %v4026_v24 = vadd.f32 %v4025_v61, %v3771_v10  ;;  %v3773_v47 = vadd.f32 %v3698_v18, %v3403_v57  ;;  %v3701_v52 = vpop.f32.mrf.mxu0 }
 0x212   : > { %v4095_v48 = vadd.f32 %v4094_v36, %v4064_v28  ;;  %v3331_v25 = vpop.f32.mrf.mxu1  ;;  %v4069_v59 = vmul.f32 %v3775_v58, %v3775_v58 }
 0x213   : > { %v3776_v50 = vadd.f32 %v5345_v23, %v3406_v11  ;;  %v3404_v51 = vadd.f32 %v3331_v25, %v3034_v29  ;;  %v4027_v56 = vadd.f32 %v4026_v24, %v3772_v5  ;;  %v4067_v27 = vmul.f32 %v3773_v47, %v3773_v47 }
 0x214   : > { %v4096_v45 = vadd.f32 %v4095_v48, %v4065_v0 }
 0x215   : > { %v4666_v14 = vpack.c.bf16 %v3776_v50, %v3775_v58  ;;  %v3774_v17 = vadd.f32 %v3701_v52, %v3404_v51  ;;  %v4028_v46 = vadd.f32 %v4027_v56, %v3773_v47  ;;  %v4070_v43 = vmul.f32 %v3776_v50, %v3776_v50 }
 0x216   : > { %v4097_v21 = vadd.f32 %v4096_v45, %v4066_v40 }
 0x217   : > { %4697 = vst [vmem:[%s6670_s14 + $0x78] sm:$0xff] %v4666_v14   ;;  %v4661_v34 = vpack.c.bf16 %v3774_v17, %v3773_v47  ;;  %v4068_v8 = vmul.f32 %v3774_v17, %v3774_v17  ;;  %v4029_v13 = vadd.f32 %v4028_v46, %v3774_v17 }
 0x218   : > { %v4098_v60 = vadd.f32 %v4097_v21, %v4067_v27 }
 0x219   : > { %4696 = vst [vmem:[%s6670_s14 + $0x70] sm:$0xff] %v4661_v34   ;;  %v4030_v7 = vadd.f32 %v4029_v13, %v3775_v58 }
 0x21a   : > { %v4099_v62 = vadd.f32 %v4098_v60, %v4068_v8 }
 0x21b   : > { %v4031_v30 = vadd.f32 %v4030_v7, %v3776_v50 }
 0x21c   : > { %v4100_v39 = vadd.f32 %v4099_v62, %v4069_v59 }
 0x21d   : > { %v4032_v33 = vrot.slane %v4031_v30, 4 }
 0x21e   : > { %v4101_v31 = vadd.f32 %v4100_v39, %v4070_v43 }
 0x21f   : > { %v4033_v35 = vadd.f32 %v4032_v33, %v4031_v30 }
 0x220   : > { %v4102_v10 = vrot.slane %v4101_v31, 4 }
 0x221   : > { %v4034_v5 = vrot.slane %v4033_v35, 2 }
 0x222   : > { %v4103_v42 = vadd.f32 %v4102_v10, %v4101_v31 }
 0x223   : > { %v4035_v32 = vadd.f32 %v4034_v5, %v4033_v35 }
 0x224   : > { %v4104_v63 = vrot.slane %v4103_v42, 2 }
 0x225   : > { %v4036_v9 = vrot.slane %v4035_v32, 1 }
 0x226   : > { %v4105_v3 = vadd.f32 %v4104_v63, %v4103_v42 }
 0x227   : > { %v4037_v20 = vadd.f32 %v4036_v9, %v4035_v32 }
 0x228   : > { %v4106_v22 = vrot.slane %v4105_v3, 1 }
 0x229   : > { %4038 = vst [vmem:[%s280_s17] sm:$0x1] %v4037_v20 }
 0x22a   : > { %v4107_v26 = vadd.f32 %v4106_v22, %v4105_v3 }
 0x22c   : > { %4108 = vst [vmem:[%s280_s17 + $0x1] sm:$0x1] %v4107_v26 }
 0x22d PF: > { %s16_s20 = sadd.s32 1, %s5482_s20   ;;  %s6855_s18 = smov %s5478_s19 }
 0x22e   : > { %p13_p5 = scmp.ge.s32.totalorder %s16_s20, 4   ;;  %s6856_s19 = smov %s6858_s21 }
 0x230   :  { %15 = sbr.rel (!%p13_p5) target bundleno = 2 (0x2), region = 91 }

</bundles_post_ra>
